<compile_context>
chip_gen: v7x
topology: tpu7x:2x2x1
jax: 0.10.0
libtpu: 0.0.40
codegen_flags: <defaults>
</compile_context>

<pallas_src>
import functools

import jax
import jax.numpy as jnp
from jax.experimental import pallas as pl
from jax.experimental.pallas import tpu as pltpu

USE_RELU = False                 # mirrors args.use_relu == 0 -> nn.Tanh()
MXU_INPUT_DTYPE = jnp.float32    # set to jnp.bfloat16 on v6e/v7x (relax tols)


# ----------------------------------------------------------------------------
# Kernel: one (batch_group, time_tile) grid step = T_TILE fused GRU steps.
#   inputs : x (T_TILE, B_TILE, D_in), h0 (B_TILE, H),
#            w1 (D_in, H), w_gates (2H, 4H), smalls (2, 4H)
#   outputs: values (T_TILE, B_TILE), final hidden (B_TILE, H)  [resident]
#   scratch: h_hist (T_TILE, B_TILE, H)
# ----------------------------------------------------------------------------
def critic_rnn_seq_kernel(x_ref, h0_ref, w1_ref, wg_ref, smalls_ref,
                          val_ref, h_out_ref, h_hist_ref):
    t_tile = x_ref.shape[0]
    H = h0_ref.shape[-1]

    # First time tile of this batch group: seed the resident hidden carry.
    @pl.when(pl.program_id(1) == 0)
    def _():
        h_out_ref[...] = h0_ref[...]

    # Loop-invariant parameter loads (weights stay resident for the tile).
    w1 = w1_ref[...]                          # (D_in, H)
    wg_top = wg_ref[0:H, :]                   # rows multiplying a = act(fc1 x)
    wg_bot = wg_ref[H:2 * H, :]               # rows multiplying h
    b_g = smalls_ref[0:1, :]                  # (1, 4H) packed gate bias
    b1 = smalls_ref[1:2, 0:H]                 # (1, H)  fc1 bias
    w2 = smalls_ref[1:2, H:2 * H]             # (1, H)  fc2 weight row
    b2 = smalls_ref[1:2, 2 * H:2 * H + 1]     # (1, 1)  fc2 bias

    def step(t, h):
        x_t = x_ref[t]                                            # (B_TILE, D_in)
        a = jnp.dot(x_t.astype(MXU_INPUT_DTYPE), w1,
                    preferred_element_type=jnp.float32) + b1
        a = jnp.maximum(a, 0.0) if USE_RELU else jnp.tanh(a)

        # Two accumulating MXU matmuls; no lane-axis concatenation.
        g = (jnp.dot(a.astype(MXU_INPUT_DTYPE), wg_top,
                     preferred_element_type=jnp.float32)
             + jnp.dot(h.astype(MXU_INPUT_DTYPE), wg_bot,
                       preferred_element_type=jnp.float32)
             + b_g)

        rz = jax.nn.sigmoid(g[:, 0:2 * H])        # r and z in one EUP pass
        r = rz[:, 0:H]
        z = rz[:, H:2 * H]
        n = jnp.tanh(g[:, 2 * H:3 * H] + r * g[:, 3 * H:4 * H])
        h_new = (1.0 - z) * n + z * h

        h_hist_ref[t] = h_new          # staged for the lane-dense fc2 readout
        return h_new

    h_final = jax.lax.fori_loop(0, t_tile, step, h_out_ref[...])
    h_out_ref[...] = h_final

    # fc2 readout for the whole tile: VPU multiply + lane reduce, stored as a
    # lane-dense (T_TILE, B_TILE) slab (batch along lanes, >= 128 lanes).
    h_hist = h_hist_ref[...]                              # (T_TILE, B_TILE, H)
    vals = jnp.sum(h_hist * w2, axis=-1) + b2             # (T_TILE, B_TILE)
    val_ref[...] = vals.astype(val_ref.dtype)


# ----------------------------------------------------------------------------
# Sequence wrapper: one pallas_call for all T steps.
#   x_seq: (T, B, D_in), h0: (B, H)  ->  values (T, B), final hidden (B, H)
# ----------------------------------------------------------------------------
@functools.partial(jax.jit, static_argnames=("b_tile", "t_tile"))
def critic_rnn_sequence(x_seq, h0, packed, *, b_tile=128, t_tile=128):
    T, B, D_in = x_seq.shape
    H = h0.shape[-1]
    b_tile = min(b_tile, B)
    t_tile = min(t_tile, T)
    assert B % b_tile == 0 and T % t_tile == 0, "B/T must be multiples of tiles"
    n_bg, n_tt = B // b_tile, T // t_tile

    grid_spec = pltpu.PrefetchScalarGridSpec(
        num_scalar_prefetch=0,
        grid=(n_bg, n_tt),
        in_specs=[
            pl.BlockSpec((t_tile, b_tile, D_in), lambda bg, tt: (tt, bg, 0)),
            pl.BlockSpec((b_tile, H), lambda bg, tt: (bg, 0)),
            pl.BlockSpec((D_in, H), lambda bg, tt: (0, 0)),        # w1 resident
            pl.BlockSpec((2 * H, 4 * H), lambda bg, tt: (0, 0)),   # gates resident
            pl.BlockSpec((2, 4 * H), lambda bg, tt: (0, 0)),       # smalls resident
        ],
        out_specs=(
            pl.BlockSpec((t_tile, b_tile), lambda bg, tt: (tt, bg)),  # values
            pl.BlockSpec((b_tile, H), lambda bg, tt: (bg, 0)),        # final hidden
        ),
        scratch_shapes=[pltpu.VMEM((t_tile, b_tile, H), jnp.float32)],
    )

    values, h_final = pl.pallas_call(
        critic_rnn_seq_kernel,
        out_shape=(jax.ShapeDtypeStruct((T, B), jnp.float32),
                   jax.ShapeDtypeStruct((B, H), jnp.float32)),
        grid_spec=grid_spec,
        compiler_params=pltpu.CompilerParams(
            dimension_semantics=("parallel", "arbitrary")),
    )(x_seq, h0, packed["w1"], packed["w_gates"], packed["smalls"])
    return values, h_final


def critic_rnn_forward(critic_input, rnn_hidden, packed):
    """Single-step forward matching the PyTorch module contract."""
    vals, h_new = critic_rnn_sequence(
        critic_input[None], rnn_hidden, packed,
        b_tile=min(128, rnn_hidden.shape[0]), t_tile=1)
    return vals[0, :, None], h_new          # value (B, 1), new hidden (B, H)


# ----------------------------------------------------------------------------
# Deterministic raw parameter init (orthogonal weights, zero biases), stored as
# (in_features, out_features) so the math is y = x @ W + b.
# ----------------------------------------------------------------------------
def orthogonal(key, shape, gain=1.0):
    a = jax.random.normal(key, shape, dtype=jnp.float32)
    if shape[0] < shape[1]:
        q, _ = jnp.linalg.qr(a.T)
        q = q.T
    else:
        q, _ = jnp.linalg.qr(a)
    return gain * q[: shape[0], : shape[1]].astype(jnp.float32)


def init_raw_params(key, critic_input_dim, hidden_dim):
    ks = jax.random.split(key, 4)
    H = hidden_dim
    w_ih = jnp.concatenate(
        [orthogonal(k, (H, H)) for k in jax.random.split(ks[1], 3)], axis=1)
    w_hh = jnp.concatenate(
        [orthogonal(k, (H, H)) for k in jax.random.split(ks[2], 3)], axis=1)
    return {
        "w1": orthogonal(ks[0], (critic_input_dim, H)),
        "b1": jnp.zeros((H,), jnp.float32),
        "w_ih": w_ih,                       # (H, 3H) = [W_ir | W_iz | W_in]
        "b_ih": jnp.zeros((3 * H,), jnp.float32),
        "w_hh": w_hh,                       # (H, 3H) = [W_hr | W_hz | W_hn]
        "b_hh": jnp.zeros((3 * H,), jnp.float32),
        "w2": orthogonal(ks[3], (H, 1)),
        "b2": jnp.zeros((1,), jnp.float32),
    }


# ----------------------------------------------------------------------------
# One-time packing (init time, never per step) into the fused kernel layout:
#   w_gates (2H, 4H):  rows 0..H  = [W_ir | W_iz | W_in |  0  ]
#                      rows H..2H = [W_hr | W_hz |  0   | W_hn]
#   smalls  (2, 4H):   row 0 = [b_ir+b_hr | b_iz+b_hz | b_in | b_hn]
#                      row 1 = [b1 (H) | w2_row (H) | b2 | zeros]
# ----------------------------------------------------------------------------
def pack_params(raw):
    H = raw["w1"].shape[1]
    w_ih, w_hh = raw["w_ih"], raw["w_hh"]
    zeros = jnp.zeros((H, H), jnp.float32)
    top = jnp.concatenate([w_ih[:, :H], w_ih[:, H:2 * H], w_ih[:, 2 * H:], zeros], 1)
    bot = jnp.concatenate([w_hh[:, :H], w_hh[:, H:2 * H], zeros, w_hh[:, 2 * H:]], 1)
    w_gates = jnp.concatenate([top, bot], axis=0)                     # (2H, 4H)

    b_ih, b_hh = raw["b_ih"], raw["b_hh"]
    b_gates = jnp.concatenate(
        [b_ih[:H] + b_hh[:H], b_ih[H:2 * H] + b_hh[H:2 * H],
         b_ih[2 * H:], b_hh[2 * H:]])                                  # (4H,)
    row1 = jnp.zeros((4 * H,), jnp.float32)
    row1 = row1.at[:H].set(raw["b1"])
    row1 = row1.at[H:2 * H].set(raw["w2"][:, 0])
    row1 = row1.at[2 * H].set(raw["b2"][0])
    smalls = jnp.stack([b_gates, row1], axis=0)                        # (2, 4H)

    return {
        "w1": raw["w1"].astype(MXU_INPUT_DTYPE),
        "w_gates": w_gates.astype(MXU_INPUT_DTYPE),
        "smalls": smalls,                                              # stays f32
    }


# ----------------------------------------------------------------------------
# Pure-JAX reference (standard un-fused GRU math) for correctness checking.
# ----------------------------------------------------------------------------
@jax.jit
def reference_sequence(x_seq, h0, raw):
    H = raw["w1"].shape[1]

    def step(h, x_t):
        a = x_t @ raw["w1"] + raw["b1"]
        a = jnp.maximum(a, 0.0) if USE_RELU else jnp.tanh(a)
        gi = a @ raw["w_ih"] + raw["b_ih"]
        gh = h @ raw["w_hh"] + raw["b_hh"]
        r = jax.nn.sigmoid(gi[:, :H] + gh[:, :H])
        z = jax.nn.sigmoid(gi[:, H:2 * H] + gh[:, H:2 * H])
        n = jnp.tanh(gi[:, 2 * H:] + r * gh[:, 2 * H:])
        h_new = (1.0 - z) * n + z * h
        v = (h_new @ raw["w2"] + raw["b2"])[:, 0]
        return h_new, v

    h_final, vals = jax.lax.scan(step, h0, x_seq)
    return vals, h_final                      # vals (T, B), h_final (B, H)


if __name__ == "__main__":
    # B >= 128 per the perf review (agents/envs folded into the batch);
    # 2 batch groups x 2 time tiles exercises both grid axes and the carries.
    T, B, D_IN, H = 16, 256, 48, 32

    key = jax.random.PRNGKey(0)
    k_x, k_p = jax.random.split(key, 2)

    raw = init_raw_params(k_p, D_IN, H)
    packed = pack_params(raw)                 # packed once at init

    x_seq = jax.random.normal(k_x, (T, B, D_IN), dtype=jnp.float32)
    h0 = jnp.zeros((B, H), jnp.float32)       # self.rnn_hidden = None -> zeros

    # Sequence-internalized forward: one pallas_call for all T steps.
    vals, h_final = critic_rnn_sequence(x_seq, h0, packed, b_tile=128, t_tile=8)
    jax.block_until_ready((vals, h_final))

    ref_vals, ref_h = reference_sequence(x_seq, h0, raw)
    assert vals.shape == (T, B) and h_final.shape == (B, H)
    assert jnp.allclose(vals, ref_vals, atol=2e-3, rtol=2e-3)
    assert jnp.allclose(h_final, ref_h, atol=2e-3, rtol=2e-3)

    # Single-step wrapper (the PyTorch module's forward() contract).
    v1, h1 = critic_rnn_forward(x_seq[0], h0, packed)
    ref_v1, ref_h1 = reference_sequence(x_seq[:1], h0, raw)
    assert v1.shape == (B, 1) and h1.shape == (B, H)
    assert jnp.allclose(v1[:, 0], ref_v1[0], atol=2e-3, rtol=2e-3)
    assert jnp.allclose(h1, ref_h1, atol=2e-3, rtol=2e-3)

    print("KERNEL_OK")
</pallas_src>

<mosaic_0001>
module attributes {stable_mosaic.version = 11 : i64} {
  func.func @critic_rnn_seq_kernel(%arg0: i32, %arg1: i32, %arg2: memref<8x128x48xf32, #tpu.memory_space<vmem>>, %arg3: memref<128x32xf32, #tpu.memory_space<vmem>>, %arg4: memref<48x32xf32, #tpu.memory_space<vmem>>, %arg5: memref<64x128xf32, #tpu.memory_space<vmem>>, %arg6: memref<2x128xf32, #tpu.memory_space<vmem>>, %arg7: memref<8x128xf32, #tpu.memory_space<vmem>>, %arg8: memref<128x32xf32, #tpu.memory_space<vmem>>, %arg9: memref<8x128x32xf32, #tpu.memory_space<vmem>>) attributes {dimension_semantics = [#tpu.dimension_semantics<parallel>, #tpu.dimension_semantics<arbitrary>], iteration_bounds = array<i64: 2, 2>, scalar_prefetch = 0 : i64, scratch_operands = 1 : i64, tpu.core_type = #tpu.core_type<tc>, window_params = [{transform_indices = @transform_0, window_bounds = array<i64: 8, 128, 48>}, {transform_indices = @transform_1, window_bounds = array<i64: 128, 32>}, {pipeline_mode = #tpu.pipeline_mode<synchronous>, transform_indices = @transform_2, window_bounds = array<i64: 48, 32>}, {pipeline_mode = #tpu.pipeline_mode<synchronous>, transform_indices = @transform_3, window_bounds = array<i64: 64, 128>}, {pipeline_mode = #tpu.pipeline_mode<synchronous>, transform_indices = @transform_4, window_bounds = array<i64: 2, 128>}, {transform_indices = @transform_5, window_bounds = array<i64: 8, 128>}, {transform_indices = @transform_6, window_bounds = array<i64: 128, 32>}]} {
    %c0_i32 = arith.constant 0 : i32
    %0 = arith.cmpi eq, %arg1, %c0_i32 : i32
    %1 = arith.extui %0 : i1 to i32
    %c0_i32_0 = arith.constant 0 : i32
    %2 = arith.cmpi ne, %1, %c0_i32_0 : i32
    scf.if %2 {
      %c0_22 = arith.constant 0 : index
      %c0_23 = arith.constant 0 : index
      %22 = vector.load %arg3[%c0_22, %c0_23] : memref<128x32xf32, #tpu.memory_space<vmem>>, vector<128x32xf32>
      %c0_24 = arith.constant 0 : index
      %c0_25 = arith.constant 0 : index
      %23 = vector.load %arg8[%c0_24, %c0_25] : memref<128x32xf32, #tpu.memory_space<vmem>>, vector<128x32xf32>
      tpu.vector_store %arg8[%c0_24, %c0_25], %22 {strides = array<i32>} : memref<128x32xf32, #tpu.memory_space<vmem>>, vector<128x32xf32>,
    } else {
    }
    %c0 = arith.constant 0 : index
    %c0_1 = arith.constant 0 : index
    %3 = vector.load %arg4[%c0, %c0_1] : memref<48x32xf32, #tpu.memory_space<vmem>>, vector<48x32xf32>
    %c0_2 = arith.constant 0 : index
    %c0_3 = arith.constant 0 : index
    %4 = vector.load %arg5[%c0_2, %c0_3] : memref<64x128xf32, #tpu.memory_space<vmem>>, vector<32x128xf32>
    %c32 = arith.constant 32 : index
    %c0_4 = arith.constant 0 : index
    %5 = vector.load %arg5[%c32, %c0_4] : memref<64x128xf32, #tpu.memory_space<vmem>>, vector<32x128xf32>
    %c0_5 = arith.constant 0 : index
    %c0_6 = arith.constant 0 : index
    %6 = vector.load %arg6[%c0_5, %c0_6] : memref<2x128xf32, #tpu.memory_space<vmem>>, vector<1x128xf32>
    %c1 = arith.constant 1 : index
    %c0_7 = arith.constant 0 : index
    %7 = vector.load %arg6[%c1, %c0_7] : memref<2x128xf32, #tpu.memory_space<vmem>>, vector<1x32xf32>
    %c1_8 = arith.constant 1 : index
    %c32_9 = arith.constant 32 : index
    %8 = vector.load %arg6[%c1_8, %c32_9] : memref<2x128xf32, #tpu.memory_space<vmem>>, vector<1x32xf32>
    %c1_10 = arith.constant 1 : index
    %c64 = arith.constant 64 : index
    %9 = vector.load %arg6[%c1_10, %c64] : memref<2x128xf32, #tpu.memory_space<vmem>>, vector<1x1xf32>
    %c0_11 = arith.constant 0 : index
    %c0_12 = arith.constant 0 : index
    %10 = vector.load %arg8[%c0_11, %c0_12] : memref<128x32xf32, #tpu.memory_space<vmem>>, vector<128x32xf32>
    %c0_i32_13 = arith.constant 0 : i32
    %c8_i32 = arith.constant 8 : i32
    %11 = arith.addi %c0_i32_13, %c8_i32 : i32
    %c1_i32 = arith.constant 1 : i32
    %12 = scf.for %arg10 = %c0_i32_13 to %11 step %c1_i32 iter_args(%arg11 = %10) -> (vector<128x32xf32>)  : i32 {
      %22 = arith.index_cast %arg10 : i32 to index
      %c0_22 = arith.constant 0 : index
      %c0_23 = arith.constant 0 : index
      %23 = vector.load %arg2[%22, %c0_22, %c0_23] : memref<8x128x48xf32, #tpu.memory_space<vmem>>, vector<1x128x48xf32>
      %24 = vector.shape_cast %23 : vector<1x128x48xf32> to vector<128x48xf32>
      %cst_24 = arith.constant dense<0.000000e+00> : vector<128x32xf32>
      %25 = tpu.matmul %24, %3, %cst_24 {dimension_numbers = #tpu.dot_dimension_numbers<[1], [0], [0], [1], [0, 0, 1, 1], [], []>} : vector<128x48xf32>, vector<48x32xf32>, vector<128x32xf32> -> vector<128x32xf32>
      %26 = vector.broadcast %7 : vector<1x32xf32> to vector<128x32xf32>
      %27 = arith.addf %25, %26 : vector<128x32xf32>
      %28 = math.tanh %27 : vector<128x32xf32>
      %cst_25 = arith.constant dense<0.000000e+00> : vector<128x128xf32>
      %29 = tpu.matmul %28, %4, %cst_25 {dimension_numbers = #tpu.dot_dimension_numbers<[1], [0], [0], [1], [0, 0, 1, 1], [], []>} : vector<128x32xf32>, vector<32x128xf32>, vector<128x128xf32> -> vector<128x128xf32>
      %cst_26 = arith.constant dense<0.000000e+00> : vector<128x128xf32>
      %30 = tpu.matmul %arg11, %5, %cst_26 {dimension_numbers = #tpu.dot_dimension_numbers<[1], [0], [0], [1], [0, 0, 1, 1], [], []>} : vector<128x32xf32>, vector<32x128xf32>, vector<128x128xf32> -> vector<128x128xf32>
      %31 = arith.addf %29, %30 : vector<128x128xf32>
      %32 = vector.broadcast %6 : vector<1x128xf32> to vector<128x128xf32>
      %33 = arith.addf %31, %32 : vector<128x128xf32>
      %34 = vector.extract_strided_slice %33 {offsets = [0, 0], sizes = [128, 64], strides = [1, 1]} : vector<128x128xf32> to vector<128x64xf32>
      %35 = arith.negf %34 : vector<128x64xf32>
      %36 = math.exp %35 : vector<128x64xf32>
      %cst_27 = arith.constant 1.000000e+00 : f32
      %37 = vector.broadcast %cst_27 : f32 to vector<128x64xf32>
      %38 = arith.addf %37, %36 : vector<128x64xf32>
      %39 = arith.divf %37, %38 : vector<128x64xf32>
      %40 = vector.extract_strided_slice %39 {offsets = [0, 0], sizes = [128, 32], strides = [1, 1]} : vector<128x64xf32> to vector<128x32xf32>
      %41 = vector.extract_strided_slice %39 {offsets = [0, 32], sizes = [128, 32], strides = [1, 1]} : vector<128x64xf32> to vector<128x32xf32>
      %42 = vector.extract_strided_slice %33 {offsets = [0, 64], sizes = [128, 32], strides = [1, 1]} : vector<128x128xf32> to vector<128x32xf32>
      %43 = vector.extract_strided_slice %33 {offsets = [0, 96], sizes = [128, 32], strides = [1, 1]} : vector<128x128xf32> to vector<128x32xf32>
      %44 = arith.mulf %40, %43 : vector<128x32xf32>
      %45 = arith.addf %42, %44 : vector<128x32xf32>
      %46 = math.tanh %45 : vector<128x32xf32>
      %cst_28 = arith.constant 1.000000e+00 : f32
      %47 = vector.broadcast %cst_28 : f32 to vector<128x32xf32>
      %48 = arith.subf %47, %41 : vector<128x32xf32>
      %49 = arith.mulf %48, %46 : vector<128x32xf32>
      %50 = arith.mulf %41, %arg11 : vector<128x32xf32>
      %51 = arith.addf %49, %50 : vector<128x32xf32>
      %52 = arith.index_cast %arg10 : i32 to index
      %c0_29 = arith.constant 0 : index
      %c0_30 = arith.constant 0 : index
      %53 = vector.load %arg9[%52, %c0_29, %c0_30] : memref<8x128x32xf32, #tpu.memory_space<vmem>>, vector<1x128x32xf32>
      %54 = vector.shape_cast %53 : vector<1x128x32xf32> to vector<128x32xf32>
      %55 = vector.shape_cast %51 : vector<128x32xf32> to vector<1x128x32xf32>
      tpu.vector_store %arg9[%52, %c0_29, %c0_30], %55 {strides = array<i32>} : memref<8x128x32xf32, #tpu.memory_space<vmem>>, vector<1x128x32xf32>,
      scf.yield %51 : vector<128x32xf32>
    }
    %c8_i32_14 = arith.constant 8 : i32
    %c0_15 = arith.constant 0 : index
    %c0_16 = arith.constant 0 : index
    %13 = vector.load %arg8[%c0_15, %c0_16] : memref<128x32xf32, #tpu.memory_space<vmem>>, vector<128x32xf32>
    tpu.vector_store %arg8[%c0_15, %c0_16], %12 {strides = array<i32>} : memref<128x32xf32, #tpu.memory_space<vmem>>, vector<128x32xf32>,
    %c0_17 = arith.constant 0 : index
    %c0_18 = arith.constant 0 : index
    %c0_19 = arith.constant 0 : index
    %14 = vector.load %arg9[%c0_17, %c0_18, %c0_19] : memref<8x128x32xf32, #tpu.memory_space<vmem>>, vector<8x128x32xf32>
    %15 = vector.shape_cast %8 : vector<1x32xf32> to vector<1x1x32xf32>
    %16 = vector.broadcast %15 : vector<1x1x32xf32> to vector<8x128x32xf32>
    %17 = arith.mulf %14, %16 : vector<8x128x32xf32>
    %cst = arith.constant dense<0.000000e+00> : vector<8x128xf32>
    %18 = vector.multi_reduction <add>, %17, %cst [2] : vector<8x128x32xf32> to vector<8x128xf32>
    %19 = vector.broadcast %9 : vector<1x1xf32> to vector<8x128xf32>
    %20 = arith.addf %18, %19 : vector<8x128xf32>
    %c0_20 = arith.constant 0 : index
    %c0_21 = arith.constant 0 : index
    %21 = vector.load %arg7[%c0_20, %c0_21] : memref<8x128xf32, #tpu.memory_space<vmem>>, vector<8x128xf32>
    tpu.vector_store %arg7[%c0_20, %c0_21], %20 {strides = array<i32>} : memref<8x128xf32, #tpu.memory_space<vmem>>, vector<8x128xf32>,
    return
  }
  func.func @transform_0(%arg0: i32, %arg1: i32) -> (i32, i32, i32) {
    %c0_i32 = arith.constant 0 : i32
    %c0_i32_0 = arith.constant 0 : i32
    return %arg1, %arg0, %c0_i32 : i32, i32, i32
  }
  func.func @transform_1(%arg0: i32, %arg1: i32) -> (i32, i32) {
    %c0_i32 = arith.constant 0 : i32
    %c0_i32_0 = arith.constant 0 : i32
    return %arg0, %c0_i32 : i32, i32
  }
  func.func @transform_2(%arg0: i32, %arg1: i32) -> (i32, i32) {
    %c0_i32 = arith.constant 0 : i32
    %c0_i32_0 = arith.constant 0 : i32
    %c0_i32_1 = arith.constant 0 : i32
    return %c0_i32, %c0_i32_0 : i32, i32
  }
  func.func @transform_3(%arg0: i32, %arg1: i32) -> (i32, i32) {
    %c0_i32 = arith.constant 0 : i32
    %c0_i32_0 = arith.constant 0 : i32
    %c0_i32_1 = arith.constant 0 : i32
    return %c0_i32, %c0_i32_0 : i32, i32
  }
  func.func @transform_4(%arg0: i32, %arg1: i32) -> (i32, i32) {
    %c0_i32 = arith.constant 0 : i32
    %c0_i32_0 = arith.constant 0 : i32
    %c0_i32_1 = arith.constant 0 : i32
    return %c0_i32, %c0_i32_0 : i32, i32
  }
  func.func @transform_5(%arg0: i32, %arg1: i32) -> (i32, i32) {
    %c0_i32 = arith.constant 0 : i32
    return %arg1, %arg0 : i32, i32
  }
  func.func @transform_6(%arg0: i32, %arg1: i32) -> (i32, i32) {
    %c0_i32 = arith.constant 0 : i32
    %c0_i32_0 = arith.constant 0 : i32
    return %arg0, %c0_i32 : i32, i32
  }
}

</mosaic_0001>

<bundles_post_ra>
// kernel: critic_rnn_sequence.1
= control target key start
LH: loop header
LB: loop body
LE: loop exit
PB: predicated region body
PF: predicated region fallthrough
CT: control target
= control target key end

     0   :  { %s7274_s0 = inlined_call_operand.vmem [shape: f32[16,256,48], index: 0, kind: input, shape index: {}]   ;;  %s7275_s1 = inlined_call_operand.vmem [shape: f32[256,32], index: 1, kind: input, shape index: {}]   ;;  %s7276_s2 = inlined_call_operand.vmem [shape: f32[48,32], index: 2, kind: input, shape index: {}]   ;;  %s7277_s3 = inlined_call_operand.vmem [shape: f32[64,128], index: 3, kind: input, shape index: {}]   ;;  %s7278_s4 = inlined_call_operand.vmem [shape: f32[2,128], index: 4, kind: input, shape index: {}]   ;;  %s7279_s5 = inlined_call_operand.hbm [shape: f32[16,256], index: 5, kind: output, shape index: {0}]   ;;  %s7280_s6 = inlined_call_operand.vmem [shape: f32[256,32], index: 6, kind: output, shape index: {1}]  }
   0x1   :  { %7289 = sst [smem:[#allocation62_spill]] %s7274_s0 }
   0x2   :  { %12 = vsyncpa [#allocation5], 0 }
   0x3   :  { %14 = vsyncpa [#allocation5 + $0x1], 0  ;;  %s4830_s21 = smov 0   ;;  %s4832_s22 = smov 0  }
   0x4   :  { %s4834_s23 = smov 0   ;;  %s4836_s24 = smov 0  }
   0x5   :  { %s4838_s25 = smov 0   ;;  %s4840_s26 = smov 0  }
   0x6   :  { %s4842_s27 = smov 0   ;;  %s4844_s28 = smov 0  }
   0x7 LB: > { %s3916_s29 = sadd.s32 4294967295, %s4719_s28   ;;  %s3917_s30 = sadd.s32 4294967294, %s4719_s28   ;;  %s4719_s28 = sphi %s4844_s28, %s20_s28   ;;  %s4715_s27 = sphi %s4842_s27, %s7515_s27   ;;  %s4711_s26 = sphi %s4840_s26, %s7514_s26   ;;  %s4707_s25 = sphi %s4838_s25, %s7513_s25   ;;  %s4703_s24 = sphi %s4836_s24, %s7512_s24   ;;  %s4699_s23 = sphi %s4834_s23, %s7511_s23   ;;  %s4695_s22 = sphi %s4832_s22, %s7510_s22   ;;  %s4691_s21 = sphi %s4830_s21, %s7509_s21  }
   0x8   : > { %s29_s7 = sadd.s32 1, %s4711_s26  ;;  %s32_s8 = sadd.s32 1, %s4715_s27 }
   0x9   : > { %p30_p0 = scmp.ge.s32.totalorder %s29_s7, 2  ;;  %p48_p1 = scmp.ne.s32.totalorder %s4699_s23, %s4695_s22 }
   0xa   : > { %p49_p2 = scmp.eq.s32.totalorder %s4719_s28, 0  ;;  %p169_p5 = scmp.eq.s32.totalorder %s3916_s29, 3 }
   0xb   : > { %s7517_s7 = smov (%p30_p0, %s29_s7), 0  ;;  %s7519_s8 = smov (!%p30_p0, %s32_s8), %s4715_s27 }
   0xc   : > { %s36_s9 = ssub.s32 %s4711_s26, %s7517_s7  ;;  %p4882_p3 = por %p49_p2, %p48_p1 }
   0xd   : > { %p34_p4 = scmp.ge.s32.totalorder %s7519_s8, 2  ;;  %p174_p6 = scmp.ne.s32.totalorder %s4695_s22, %s4691_s21 }
   0xe   : > { %p175_p7 = scmp.eq.s32.totalorder %s3917_s30, 3  ;;  %p4890_p8 = por %p169_p5, %p48_p1 }
   0xf   : > { %s7521_s8 = smov (%p34_p4, %s7519_s8), 0  ;;  %s41_s15 = sadd.s32 1, %s4699_s23 }
  0x10   : > { %7291 = sst [smem:[#allocation7_spill]] %s7521_s8  ;;  %p4894_p9 = por %p175_p7, %p174_p6 }
  0x11   : > { %s37_s13 = ssub.s32 %s4715_s27, %s7521_s8  ;;  %p3919_p11 = scmp.ge.s32.totalorder %s4719_s28, 4 }
  0x12   : > { %s38_s14 = sor.u32 %s37_s13, %s36_s9 }
  0x13   : > { %p39_p10 = scmp.eq.s32.totalorder %s38_s14, 0  ;;  %226 = sbr.rel (%p3919_p11) target bundleno = 100 (0x64), region = 28 }
  0x15   : > { %s4902_s16 = scalar_select %p39_p10, %s4699_s23, %s41_s15  }
  0x1a   : > { %229 = sbr.rel (!%p4882_p3) target bundleno = 100 (0x64), region = 32  ;;  %s231_s17 = sand.u32 (%p4882_p3), 1, %s4699_s23  }
  0x1b   : > { %s3922_s18 = sshll.u32 (%p4882_p3), %s4715_s27, 4  ;;  %s3920_s19 = sshll.u32 (%p4882_p3), %s231_s17, 10 }
  0x1c   : > { %s4004_s20 = sshll.u32 (%p4882_p3), %s4711_s26, 8  ;;  %s7294_s0 = sld [smem:[#allocation62_spill]] (%p4882_p3) }
  0x1d   : > { %s237_s29 = sadd.s32 (%p4882_p3), %s4004_s20, %s3922_s18  ;;  %s4918_s10 = scalar_lea.vmem (%p4882_p3), [#allocation3], %s3920_s19 }
  0x1e   : > { %s3924_s30 = sshll.u32 (%p4882_p3), %s237_s29, 3 }
  0x22   : > { %s4913_s14 = scalar_lea.vmem %s7294_s0, %s3924_s30 }
  0x23   : > { %v521_v0 = vld [vmem:[%s4913_s14] sm:$0xff]  ;;  %v523_v1 = vld [vmem:[%s4913_s14 + $0x8] sm:$0xff]  ;;  %v525_v2 = vld [vmem:[%s4913_s14 + $0x10] sm:$0xff] }
  0x24   : > { %522 = vst [vmem:[%s4918_s10] sm:$0xff] %v521_v0  ;;  %524 = vst [vmem:[%s4918_s10 + $0x8] sm:$0xff] %v523_v1  ;;  %v527_v3 = vld [vmem:[%s4913_s14 + $0x18] sm:$0xff]  ;;  %v529_v4 = vld [vmem:[%s4913_s14 + $0x20] sm:$0xff] }
  0x25   : > { %526 = vst [vmem:[%s4918_s10 + $0x10] sm:$0xff] %v525_v2  ;;  %v531_v5 = vld [vmem:[%s4913_s14 + $0x28] sm:$0xff]  ;;  %528 = vst [vmem:[%s4918_s10 + $0x18] sm:$0xff] %v527_v3  ;;  %v533_v6 = vld [vmem:[%s4913_s14 + $0x30] sm:$0xff] }
  0x26   : > { %530 = vst [vmem:[%s4918_s10 + $0x20] sm:$0xff] %v529_v4  ;;  %532 = vst [vmem:[%s4918_s10 + $0x28] sm:$0xff] %v531_v5  ;;  %v535_v7 = vld [vmem:[%s4913_s14 + $0x38] sm:$0xff]  ;;  %v537_v8 = vld [vmem:[%s4913_s14 + $0x40] sm:$0xff] }
  0x27   : > { %534 = vst [vmem:[%s4918_s10 + $0x30] sm:$0xff] %v533_v6  ;;  %536 = vst [vmem:[%s4918_s10 + $0x38] sm:$0xff] %v535_v7  ;;  %v539_v9 = vld [vmem:[%s4913_s14 + $0x48] sm:$0xff]  ;;  %v541_v10 = vld [vmem:[%s4913_s14 + $0x50] sm:$0xff] }
  0x28   : > { %538 = vst [vmem:[%s4918_s10 + $0x40] sm:$0xff] %v537_v8  ;;  %v543_v11 = vld [vmem:[%s4913_s14 + $0x58] sm:$0xff]  ;;  %540 = vst [vmem:[%s4918_s10 + $0x48] sm:$0xff] %v539_v9  ;;  %v545_v12 = vld [vmem:[%s4913_s14 + $0x60] sm:$0xff] }
  0x29   : > { %542 = vst [vmem:[%s4918_s10 + $0x50] sm:$0xff] %v541_v10  ;;  %544 = vst [vmem:[%s4918_s10 + $0x58] sm:$0xff] %v543_v11  ;;  %v547_v13 = vld [vmem:[%s4913_s14 + $0x68] sm:$0xff]  ;;  %v549_v14 = vld [vmem:[%s4913_s14 + $0x70] sm:$0xff] }
  0x2a   : > { %546 = vst [vmem:[%s4918_s10 + $0x60] sm:$0xff] %v545_v12  ;;  %548 = vst [vmem:[%s4918_s10 + $0x68] sm:$0xff] %v547_v13  ;;  %v551_v15 = vld [vmem:[%s4913_s14 + $0x78] sm:$0xff]  ;;  %v553_v16 = vld [vmem:[%s4913_s14 + $0x100] sm:$0xff] }
  0x2b   : > { %550 = vst [vmem:[%s4918_s10 + $0x70] sm:$0xff] %v549_v14  ;;  %v555_v17 = vld [vmem:[%s4913_s14 + $0x108] sm:$0xff]  ;;  %552 = vst [vmem:[%s4918_s10 + $0x78] sm:$0xff] %v551_v15  ;;  %v557_v18 = vld [vmem:[%s4913_s14 + $0x110] sm:$0xff] }
  0x2c   : > { %554 = vst [vmem:[%s4918_s10 + $0x80] sm:$0xff] %v553_v16  ;;  %556 = vst [vmem:[%s4918_s10 + $0x88] sm:$0xff] %v555_v17  ;;  %v559_v19 = vld [vmem:[%s4913_s14 + $0x118] sm:$0xff]  ;;  %v561_v20 = vld [vmem:[%s4913_s14 + $0x120] sm:$0xff] }
  0x2d   : > { %558 = vst [vmem:[%s4918_s10 + $0x90] sm:$0xff] %v557_v18  ;;  %560 = vst [vmem:[%s4918_s10 + $0x98] sm:$0xff] %v559_v19  ;;  %v563_v21 = vld [vmem:[%s4913_s14 + $0x128] sm:$0xff]  ;;  %v565_v22 = vld [vmem:[%s4913_s14 + $0x130] sm:$0xff] }
  0x2e   : > { %562 = vst [vmem:[%s4918_s10 + $0xa0] sm:$0xff] %v561_v20  ;;  %v567_v23 = vld [vmem:[%s4913_s14 + $0x138] sm:$0xff]  ;;  %564 = vst [vmem:[%s4918_s10 + $0xa8] sm:$0xff] %v563_v21  ;;  %v569_v24 = vld [vmem:[%s4913_s14 + $0x140] sm:$0xff] }
  0x2f   : > { %566 = vst [vmem:[%s4918_s10 + $0xb0] sm:$0xff] %v565_v22  ;;  %568 = vst [vmem:[%s4918_s10 + $0xb8] sm:$0xff] %v567_v23  ;;  %v571_v25 = vld [vmem:[%s4913_s14 + $0x148] sm:$0xff]  ;;  %v573_v26 = vld [vmem:[%s4913_s14 + $0x150] sm:$0xff] }
  0x30   : > { %570 = vst [vmem:[%s4918_s10 + $0xc0] sm:$0xff] %v569_v24  ;;  %572 = vst [vmem:[%s4918_s10 + $0xc8] sm:$0xff] %v571_v25  ;;  %v575_v27 = vld [vmem:[%s4913_s14 + $0x158] sm:$0xff]  ;;  %v577_v28 = vld [vmem:[%s4913_s14 + $0x160] sm:$0xff] }
  0x31   : > { %574 = vst [vmem:[%s4918_s10 + $0xd0] sm:$0xff] %v573_v26  ;;  %v579_v29 = vld [vmem:[%s4913_s14 + $0x168] sm:$0xff]  ;;  %576 = vst [vmem:[%s4918_s10 + $0xd8] sm:$0xff] %v575_v27  ;;  %v581_v30 = vld [vmem:[%s4913_s14 + $0x170] sm:$0xff] }
  0x32   : > { %578 = vst [vmem:[%s4918_s10 + $0xe0] sm:$0xff] %v577_v28  ;;  %580 = vst [vmem:[%s4918_s10 + $0xe8] sm:$0xff] %v579_v29  ;;  %v583_v31 = vld [vmem:[%s4913_s14 + $0x178] sm:$0xff]  ;;  %v585_v32 = vld [vmem:[%s4913_s14 + $0x200] sm:$0xff] }
  0x33   : > { %582 = vst [vmem:[%s4918_s10 + $0xf0] sm:$0xff] %v581_v30  ;;  %584 = vst [vmem:[%s4918_s10 + $0xf8] sm:$0xff] %v583_v31  ;;  %v587_v33 = vld [vmem:[%s4913_s14 + $0x208] sm:$0xff]  ;;  %v589_v34 = vld [vmem:[%s4913_s14 + $0x210] sm:$0xff] }
  0x34   : > { %586 = vst [vmem:[%s4918_s10 + $0x100] sm:$0xff] %v585_v32  ;;  %v591_v35 = vld [vmem:[%s4913_s14 + $0x218] sm:$0xff]  ;;  %588 = vst [vmem:[%s4918_s10 + $0x108] sm:$0xff] %v587_v33  ;;  %v593_v36 = vld [vmem:[%s4913_s14 + $0x220] sm:$0xff] }
  0x35   : > { %590 = vst [vmem:[%s4918_s10 + $0x110] sm:$0xff] %v589_v34  ;;  %592 = vst [vmem:[%s4918_s10 + $0x118] sm:$0xff] %v591_v35  ;;  %v595_v37 = vld [vmem:[%s4913_s14 + $0x228] sm:$0xff]  ;;  %v597_v38 = vld [vmem:[%s4913_s14 + $0x230] sm:$0xff] }
  0x36   : > { %594 = vst [vmem:[%s4918_s10 + $0x120] sm:$0xff] %v593_v36  ;;  %596 = vst [vmem:[%s4918_s10 + $0x128] sm:$0xff] %v595_v37  ;;  %v599_v39 = vld [vmem:[%s4913_s14 + $0x238] sm:$0xff]  ;;  %v601_v40 = vld [vmem:[%s4913_s14 + $0x240] sm:$0xff] }
  0x37   : > { %598 = vst [vmem:[%s4918_s10 + $0x130] sm:$0xff] %v597_v38  ;;  %v603_v41 = vld [vmem:[%s4913_s14 + $0x248] sm:$0xff]  ;;  %600 = vst [vmem:[%s4918_s10 + $0x138] sm:$0xff] %v599_v39  ;;  %v605_v42 = vld [vmem:[%s4913_s14 + $0x250] sm:$0xff] }
  0x38   : > { %602 = vst [vmem:[%s4918_s10 + $0x140] sm:$0xff] %v601_v40  ;;  %604 = vst [vmem:[%s4918_s10 + $0x148] sm:$0xff] %v603_v41  ;;  %v607_v43 = vld [vmem:[%s4913_s14 + $0x258] sm:$0xff]  ;;  %v609_v44 = vld [vmem:[%s4913_s14 + $0x260] sm:$0xff] }
  0x39   : > { %606 = vst [vmem:[%s4918_s10 + $0x150] sm:$0xff] %v605_v42  ;;  %608 = vst [vmem:[%s4918_s10 + $0x158] sm:$0xff] %v607_v43  ;;  %v611_v45 = vld [vmem:[%s4913_s14 + $0x268] sm:$0xff]  ;;  %v613_v46 = vld [vmem:[%s4913_s14 + $0x270] sm:$0xff] }
  0x3a   : > { %610 = vst [vmem:[%s4918_s10 + $0x160] sm:$0xff] %v609_v44  ;;  %v615_v47 = vld [vmem:[%s4913_s14 + $0x278] sm:$0xff]  ;;  %612 = vst [vmem:[%s4918_s10 + $0x168] sm:$0xff] %v611_v45  ;;  %v617_v48 = vld [vmem:[%s4913_s14 + $0x300] sm:$0xff] }
  0x3b   : > { %614 = vst [vmem:[%s4918_s10 + $0x170] sm:$0xff] %v613_v46  ;;  %616 = vst [vmem:[%s4918_s10 + $0x178] sm:$0xff] %v615_v47  ;;  %v619_v49 = vld [vmem:[%s4913_s14 + $0x308] sm:$0xff]  ;;  %v621_v50 = vld [vmem:[%s4913_s14 + $0x310] sm:$0xff] }
  0x3c   : > { %618 = vst [vmem:[%s4918_s10 + $0x180] sm:$0xff] %v617_v48  ;;  %620 = vst [vmem:[%s4918_s10 + $0x188] sm:$0xff] %v619_v49  ;;  %v623_v51 = vld [vmem:[%s4913_s14 + $0x318] sm:$0xff]  ;;  %v625_v52 = vld [vmem:[%s4913_s14 + $0x320] sm:$0xff] }
  0x3d   : > { %622 = vst [vmem:[%s4918_s10 + $0x190] sm:$0xff] %v621_v50  ;;  %v627_v53 = vld [vmem:[%s4913_s14 + $0x328] sm:$0xff]  ;;  %624 = vst [vmem:[%s4918_s10 + $0x198] sm:$0xff] %v623_v51  ;;  %v629_v54 = vld [vmem:[%s4913_s14 + $0x330] sm:$0xff] }
  0x3e   : > { %626 = vst [vmem:[%s4918_s10 + $0x1a0] sm:$0xff] %v625_v52  ;;  %628 = vst [vmem:[%s4918_s10 + $0x1a8] sm:$0xff] %v627_v53  ;;  %v631_v55 = vld [vmem:[%s4913_s14 + $0x338] sm:$0xff]  ;;  %v633_v56 = vld [vmem:[%s4913_s14 + $0x340] sm:$0xff] }
  0x3f   : > { %630 = vst [vmem:[%s4918_s10 + $0x1b0] sm:$0xff] %v629_v54  ;;  %632 = vst [vmem:[%s4918_s10 + $0x1b8] sm:$0xff] %v631_v55  ;;  %v635_v57 = vld [vmem:[%s4913_s14 + $0x348] sm:$0xff]  ;;  %v637_v58 = vld [vmem:[%s4913_s14 + $0x350] sm:$0xff] }
  0x40   : > { %634 = vst [vmem:[%s4918_s10 + $0x1c0] sm:$0xff] %v633_v56  ;;  %v639_v59 = vld [vmem:[%s4913_s14 + $0x358] sm:$0xff]  ;;  %636 = vst [vmem:[%s4918_s10 + $0x1c8] sm:$0xff] %v635_v57  ;;  %v641_v60 = vld [vmem:[%s4913_s14 + $0x360] sm:$0xff] }
  0x41   : > { %638 = vst [vmem:[%s4918_s10 + $0x1d0] sm:$0xff] %v637_v58  ;;  %640 = vst [vmem:[%s4918_s10 + $0x1d8] sm:$0xff] %v639_v59  ;;  %v643_v61 = vld [vmem:[%s4913_s14 + $0x368] sm:$0xff]  ;;  %v645_v62 = vld [vmem:[%s4913_s14 + $0x370] sm:$0xff] }
  0x42   : > { %642 = vst [vmem:[%s4918_s10 + $0x1e0] sm:$0xff] %v641_v60  ;;  %644 = vst [vmem:[%s4918_s10 + $0x1e8] sm:$0xff] %v643_v61  ;;  %v647_v63 = vld [vmem:[%s4913_s14 + $0x378] sm:$0xff]  ;;  %v649_v0 = vld [vmem:[%s4913_s14 + $0x400] sm:$0xff] }
  0x43   : > { %646 = vst [vmem:[%s4918_s10 + $0x1f0] sm:$0xff] %v645_v62  ;;  %v651_v1 = vld [vmem:[%s4913_s14 + $0x408] sm:$0xff]  ;;  %648 = vst [vmem:[%s4918_s10 + $0x1f8] sm:$0xff] %v647_v63  ;;  %v653_v2 = vld [vmem:[%s4913_s14 + $0x410] sm:$0xff] }
  0x44   : > { %650 = vst [vmem:[%s4918_s10 + $0x200] sm:$0xff] %v649_v0  ;;  %652 = vst [vmem:[%s4918_s10 + $0x208] sm:$0xff] %v651_v1  ;;  %v655_v3 = vld [vmem:[%s4913_s14 + $0x418] sm:$0xff]  ;;  %v657_v4 = vld [vmem:[%s4913_s14 + $0x420] sm:$0xff] }
  0x45   : > { %654 = vst [vmem:[%s4918_s10 + $0x210] sm:$0xff] %v653_v2  ;;  %656 = vst [vmem:[%s4918_s10 + $0x218] sm:$0xff] %v655_v3  ;;  %v659_v5 = vld [vmem:[%s4913_s14 + $0x428] sm:$0xff]  ;;  %v661_v6 = vld [vmem:[%s4913_s14 + $0x430] sm:$0xff] }
  0x46   : > { %658 = vst [vmem:[%s4918_s10 + $0x220] sm:$0xff] %v657_v4  ;;  %v663_v7 = vld [vmem:[%s4913_s14 + $0x438] sm:$0xff]  ;;  %660 = vst [vmem:[%s4918_s10 + $0x228] sm:$0xff] %v659_v5  ;;  %v665_v8 = vld [vmem:[%s4913_s14 + $0x440] sm:$0xff] }
  0x47   : > { %662 = vst [vmem:[%s4918_s10 + $0x230] sm:$0xff] %v661_v6  ;;  %664 = vst [vmem:[%s4918_s10 + $0x238] sm:$0xff] %v663_v7  ;;  %v667_v9 = vld [vmem:[%s4913_s14 + $0x448] sm:$0xff]  ;;  %v669_v10 = vld [vmem:[%s4913_s14 + $0x450] sm:$0xff] }
  0x48   : > { %666 = vst [vmem:[%s4918_s10 + $0x240] sm:$0xff] %v665_v8  ;;  %668 = vst [vmem:[%s4918_s10 + $0x248] sm:$0xff] %v667_v9  ;;  %v671_v11 = vld [vmem:[%s4913_s14 + $0x458] sm:$0xff]  ;;  %v673_v12 = vld [vmem:[%s4913_s14 + $0x460] sm:$0xff] }
  0x49   : > { %670 = vst [vmem:[%s4918_s10 + $0x250] sm:$0xff] %v669_v10  ;;  %v675_v13 = vld [vmem:[%s4913_s14 + $0x468] sm:$0xff]  ;;  %672 = vst [vmem:[%s4918_s10 + $0x258] sm:$0xff] %v671_v11  ;;  %v677_v14 = vld [vmem:[%s4913_s14 + $0x470] sm:$0xff] }
  0x4a   : > { %674 = vst [vmem:[%s4918_s10 + $0x260] sm:$0xff] %v673_v12  ;;  %676 = vst [vmem:[%s4918_s10 + $0x268] sm:$0xff] %v675_v13  ;;  %v679_v15 = vld [vmem:[%s4913_s14 + $0x478] sm:$0xff]  ;;  %v681_v16 = vld [vmem:[%s4913_s14 + $0x500] sm:$0xff] }
  0x4b   : > { %678 = vst [vmem:[%s4918_s10 + $0x270] sm:$0xff] %v677_v14  ;;  %680 = vst [vmem:[%s4918_s10 + $0x278] sm:$0xff] %v679_v15  ;;  %v683_v17 = vld [vmem:[%s4913_s14 + $0x508] sm:$0xff]  ;;  %v685_v18 = vld [vmem:[%s4913_s14 + $0x510] sm:$0xff] }
  0x4c   : > { %682 = vst [vmem:[%s4918_s10 + $0x280] sm:$0xff] %v681_v16  ;;  %v687_v19 = vld [vmem:[%s4913_s14 + $0x518] sm:$0xff]  ;;  %684 = vst [vmem:[%s4918_s10 + $0x288] sm:$0xff] %v683_v17  ;;  %v689_v20 = vld [vmem:[%s4913_s14 + $0x520] sm:$0xff] }
  0x4d   : > { %686 = vst [vmem:[%s4918_s10 + $0x290] sm:$0xff] %v685_v18  ;;  %688 = vst [vmem:[%s4918_s10 + $0x298] sm:$0xff] %v687_v19  ;;  %v691_v21 = vld [vmem:[%s4913_s14 + $0x528] sm:$0xff]  ;;  %v693_v22 = vld [vmem:[%s4913_s14 + $0x530] sm:$0xff] }
  0x4e   : > { %690 = vst [vmem:[%s4918_s10 + $0x2a0] sm:$0xff] %v689_v20  ;;  %692 = vst [vmem:[%s4918_s10 + $0x2a8] sm:$0xff] %v691_v21  ;;  %v695_v23 = vld [vmem:[%s4913_s14 + $0x538] sm:$0xff]  ;;  %v697_v24 = vld [vmem:[%s4913_s14 + $0x540] sm:$0xff] }
  0x4f   : > { %694 = vst [vmem:[%s4918_s10 + $0x2b0] sm:$0xff] %v693_v22  ;;  %v699_v25 = vld [vmem:[%s4913_s14 + $0x548] sm:$0xff]  ;;  %696 = vst [vmem:[%s4918_s10 + $0x2b8] sm:$0xff] %v695_v23  ;;  %v701_v26 = vld [vmem:[%s4913_s14 + $0x550] sm:$0xff] }
  0x50   : > { %698 = vst [vmem:[%s4918_s10 + $0x2c0] sm:$0xff] %v697_v24  ;;  %700 = vst [vmem:[%s4918_s10 + $0x2c8] sm:$0xff] %v699_v25  ;;  %v703_v27 = vld [vmem:[%s4913_s14 + $0x558] sm:$0xff]  ;;  %v705_v28 = vld [vmem:[%s4913_s14 + $0x560] sm:$0xff] }
  0x51   : > { %702 = vst [vmem:[%s4918_s10 + $0x2d0] sm:$0xff] %v701_v26  ;;  %704 = vst [vmem:[%s4918_s10 + $0x2d8] sm:$0xff] %v703_v27  ;;  %v707_v29 = vld [vmem:[%s4913_s14 + $0x568] sm:$0xff]  ;;  %v709_v30 = vld [vmem:[%s4913_s14 + $0x570] sm:$0xff] }
  0x52   : > { %706 = vst [vmem:[%s4918_s10 + $0x2e0] sm:$0xff] %v705_v28  ;;  %v711_v31 = vld [vmem:[%s4913_s14 + $0x578] sm:$0xff]  ;;  %708 = vst [vmem:[%s4918_s10 + $0x2e8] sm:$0xff] %v707_v29  ;;  %v713_v32 = vld [vmem:[%s4913_s14 + $0x600] sm:$0xff] }
  0x53   : > { %710 = vst [vmem:[%s4918_s10 + $0x2f0] sm:$0xff] %v709_v30  ;;  %712 = vst [vmem:[%s4918_s10 + $0x2f8] sm:$0xff] %v711_v31  ;;  %v715_v33 = vld [vmem:[%s4913_s14 + $0x608] sm:$0xff]  ;;  %v717_v34 = vld [vmem:[%s4913_s14 + $0x610] sm:$0xff] }
  0x54   : > { %714 = vst [vmem:[%s4918_s10 + $0x300] sm:$0xff] %v713_v32  ;;  %716 = vst [vmem:[%s4918_s10 + $0x308] sm:$0xff] %v715_v33  ;;  %v719_v35 = vld [vmem:[%s4913_s14 + $0x618] sm:$0xff]  ;;  %v721_v36 = vld [vmem:[%s4913_s14 + $0x620] sm:$0xff] }
  0x55   : > { %718 = vst [vmem:[%s4918_s10 + $0x310] sm:$0xff] %v717_v34  ;;  %v723_v37 = vld [vmem:[%s4913_s14 + $0x628] sm:$0xff]  ;;  %720 = vst [vmem:[%s4918_s10 + $0x318] sm:$0xff] %v719_v35  ;;  %v725_v38 = vld [vmem:[%s4913_s14 + $0x630] sm:$0xff] }
  0x56   : > { %722 = vst [vmem:[%s4918_s10 + $0x320] sm:$0xff] %v721_v36  ;;  %724 = vst [vmem:[%s4918_s10 + $0x328] sm:$0xff] %v723_v37  ;;  %v727_v39 = vld [vmem:[%s4913_s14 + $0x638] sm:$0xff]  ;;  %v729_v40 = vld [vmem:[%s4913_s14 + $0x640] sm:$0xff] }
  0x57   : > { %726 = vst [vmem:[%s4918_s10 + $0x330] sm:$0xff] %v725_v38  ;;  %728 = vst [vmem:[%s4918_s10 + $0x338] sm:$0xff] %v727_v39  ;;  %v731_v41 = vld [vmem:[%s4913_s14 + $0x648] sm:$0xff]  ;;  %v733_v42 = vld [vmem:[%s4913_s14 + $0x650] sm:$0xff] }
  0x58   : > { %730 = vst [vmem:[%s4918_s10 + $0x340] sm:$0xff] %v729_v40  ;;  %v735_v43 = vld [vmem:[%s4913_s14 + $0x658] sm:$0xff]  ;;  %732 = vst [vmem:[%s4918_s10 + $0x348] sm:$0xff] %v731_v41  ;;  %v737_v44 = vld [vmem:[%s4913_s14 + $0x660] sm:$0xff] }
  0x59   : > { %734 = vst [vmem:[%s4918_s10 + $0x350] sm:$0xff] %v733_v42  ;;  %736 = vst [vmem:[%s4918_s10 + $0x358] sm:$0xff] %v735_v43  ;;  %v739_v45 = vld [vmem:[%s4913_s14 + $0x668] sm:$0xff]  ;;  %v741_v46 = vld [vmem:[%s4913_s14 + $0x670] sm:$0xff] }
  0x5a   : > { %738 = vst [vmem:[%s4918_s10 + $0x360] sm:$0xff] %v737_v44  ;;  %740 = vst [vmem:[%s4918_s10 + $0x368] sm:$0xff] %v739_v45  ;;  %v743_v47 = vld [vmem:[%s4913_s14 + $0x678] sm:$0xff]  ;;  %v745_v48 = vld [vmem:[%s4913_s14 + $0x700] sm:$0xff] }
  0x5b   : > { %742 = vst [vmem:[%s4918_s10 + $0x370] sm:$0xff] %v741_v46  ;;  %v747_v49 = vld [vmem:[%s4913_s14 + $0x708] sm:$0xff]  ;;  %744 = vst [vmem:[%s4918_s10 + $0x378] sm:$0xff] %v743_v47  ;;  %v749_v50 = vld [vmem:[%s4913_s14 + $0x710] sm:$0xff] }
  0x5c   : > { %746 = vst [vmem:[%s4918_s10 + $0x380] sm:$0xff] %v745_v48  ;;  %748 = vst [vmem:[%s4918_s10 + $0x388] sm:$0xff] %v747_v49  ;;  %v751_v51 = vld [vmem:[%s4913_s14 + $0x718] sm:$0xff]  ;;  %v753_v52 = vld [vmem:[%s4913_s14 + $0x720] sm:$0xff] }
  0x5d   : > { %750 = vst [vmem:[%s4918_s10 + $0x390] sm:$0xff] %v749_v50  ;;  %752 = vst [vmem:[%s4918_s10 + $0x398] sm:$0xff] %v751_v51  ;;  %v755_v53 = vld [vmem:[%s4913_s14 + $0x728] sm:$0xff]  ;;  %v757_v54 = vld [vmem:[%s4913_s14 + $0x730] sm:$0xff] }
  0x5e   : > { %754 = vst [vmem:[%s4918_s10 + $0x3a0] sm:$0xff] %v753_v52  ;;  %v759_v55 = vld [vmem:[%s4913_s14 + $0x738] sm:$0xff]  ;;  %756 = vst [vmem:[%s4918_s10 + $0x3a8] sm:$0xff] %v755_v53  ;;  %v761_v56 = vld [vmem:[%s4913_s14 + $0x740] sm:$0xff] }
  0x5f   : > { %758 = vst [vmem:[%s4918_s10 + $0x3b0] sm:$0xff] %v757_v54  ;;  %760 = vst [vmem:[%s4918_s10 + $0x3b8] sm:$0xff] %v759_v55  ;;  %v763_v57 = vld [vmem:[%s4913_s14 + $0x748] sm:$0xff]  ;;  %v765_v58 = vld [vmem:[%s4913_s14 + $0x750] sm:$0xff] }
  0x60   : > { %762 = vst [vmem:[%s4918_s10 + $0x3c0] sm:$0xff] %v761_v56  ;;  %764 = vst [vmem:[%s4918_s10 + $0x3c8] sm:$0xff] %v763_v57  ;;  %v767_v59 = vld [vmem:[%s4913_s14 + $0x758] sm:$0xff]  ;;  %v769_v60 = vld [vmem:[%s4913_s14 + $0x760] sm:$0xff] }
  0x61   : > { %766 = vst [vmem:[%s4918_s10 + $0x3d0] sm:$0xff] %v765_v58  ;;  %v771_v61 = vld [vmem:[%s4913_s14 + $0x768] sm:$0xff]  ;;  %768 = vst [vmem:[%s4918_s10 + $0x3d8] sm:$0xff] %v767_v59  ;;  %v773_v62 = vld [vmem:[%s4913_s14 + $0x770] sm:$0xff] }
  0x62   : > { %770 = vst [vmem:[%s4918_s10 + $0x3e0] sm:$0xff] %v769_v60  ;;  %772 = vst [vmem:[%s4918_s10 + $0x3e8] sm:$0xff] %v771_v61  ;;  %v775_v63 = vld [vmem:[%s4913_s14 + $0x778] sm:$0xff] }
  0x63   : > { %774 = vst [vmem:[%s4918_s10 + $0x3f0] sm:$0xff] %v773_v62  ;;  %776 = vst [vmem:[%s4918_s10 + $0x3f8] sm:$0xff] %v775_v63 }
  0x64 PF: > { %p3925_p12 = scmp.ge.s32.totalorder %s4719_s28, 1  ;;  %p790_p13 = scmp.lt.s32.totalorder %s4719_s28, 5 }
  0x66   : > { %p791_p0 = pnand %p3925_p12, %p790_p13 }
  0x68   : > { %794 = sbr.rel (%p791_p0) target bundleno = 1579 (0x62b), region = 74 }
  0x6f   : > { %s5176_s15 = sand.u32 1, %s4695_s22   ;;  %s3928_s17 = sshll.u32 %s4707_s25, 4 }
  0x70   : > { %s3926_s18 = sshll.u32 %s5176_s15, 10  ;;  %s3927_s19 = sshll.u32 %s5176_s15, 3 }
  0x71   : > { %p839_p1 = scmp.lt.s32.totalorder %s3928_s17, 31  ;;  %s5191_s0 = scalar_lea.vmem [#allocation3], %s3926_s18 }
  0x72   : > { %s5193_s8 = scalar_lea.vmem [#allocation4], %s3927_s19  ;;  %p3932_p2 = scmp.ne.s32.totalorder %s4703_s24, 0 }
  0x73   : > { %s7523_s17 = smov (!%p839_p1, %s3928_s17), 31  ;;  %vm870_vm0 = vcmask (!%p3932_p2), 261120  }
  0x74   : > { %s3929_s20 = sshll.u32 %s7523_s17, 3  ;;  %853 = sbr.rel (%p3932_p2) target bundleno = 127 (0x7f), region = 82 }
  0x75   : > { %s5184_s9 = scalar_lea.vmem %s7275_s1, %s3929_s20  ;;  %s5189_s10 = scalar_lea.vmem %s7280_s6, %s3929_s20 }
  0x76   : > { %v854_v0 = vld [vmem:[%s5184_s9] sm:$0xff] (!%p3932_p2)  ;;  %v855_v1 = vld [vmem:[%s5184_s9 + $0x8] sm:$0xff] (!%p3932_p2)  ;;  %v856_v2 = vld [vmem:[%s5184_s9 + $0x10] sm:$0xff] (!%p3932_p2) }
  0x77   : > { %871 = vst.msk [vmem:[%s5189_s10] sm:$0xff] (!%p3932_p2), %vm870_vm0, %v854_v0  ;;  %872 = vst.msk [vmem:[%s5189_s10 + $0x8] sm:$0xff] (!%p3932_p2), %vm870_vm0, %v855_v1  ;;  %v857_v3 = vld [vmem:[%s5184_s9 + $0x18] sm:$0xff] (!%p3932_p2)  ;;  %v858_v4 = vld [vmem:[%s5184_s9 + $0x20] sm:$0xff] (!%p3932_p2) }
  0x78   : > { %873 = vst.msk [vmem:[%s5189_s10 + $0x10] sm:$0xff] (!%p3932_p2), %vm870_vm0, %v856_v2  ;;  %v859_v5 = vld [vmem:[%s5184_s9 + $0x28] sm:$0xff] (!%p3932_p2)  ;;  %874 = vst.msk [vmem:[%s5189_s10 + $0x18] sm:$0xff] (!%p3932_p2), %vm870_vm0, %v857_v3  ;;  %v860_v6 = vld [vmem:[%s5184_s9 + $0x30] sm:$0xff] (!%p3932_p2) }
  0x79   : > { %875 = vst.msk [vmem:[%s5189_s10 + $0x20] sm:$0xff] (!%p3932_p2), %vm870_vm0, %v858_v4  ;;  %876 = vst.msk [vmem:[%s5189_s10 + $0x28] sm:$0xff] (!%p3932_p2), %vm870_vm0, %v859_v5  ;;  %v861_v7 = vld [vmem:[%s5184_s9 + $0x38] sm:$0xff] (!%p3932_p2)  ;;  %v862_v8 = vld [vmem:[%s5184_s9 + $0x40] sm:$0xff] (!%p3932_p2) }
  0x7a   : > { %877 = vst.msk [vmem:[%s5189_s10 + $0x30] sm:$0xff] (!%p3932_p2), %vm870_vm0, %v860_v6  ;;  %878 = vst.msk [vmem:[%s5189_s10 + $0x38] sm:$0xff] (!%p3932_p2), %vm870_vm0, %v861_v7  ;;  %v863_v9 = vld [vmem:[%s5184_s9 + $0x48] sm:$0xff] (!%p3932_p2)  ;;  %v864_v10 = vld [vmem:[%s5184_s9 + $0x50] sm:$0xff] (!%p3932_p2) }
  0x7b   : > { %879 = vst.msk [vmem:[%s5189_s10 + $0x40] sm:$0xff] %vm870_vm0, %v862_v8  ;;  %v865_v11 = vld [vmem:[%s5184_s9 + $0x58] sm:$0xff]  ;;  %880 = vst.msk [vmem:[%s5189_s10 + $0x48] sm:$0xff] %vm870_vm0, %v863_v9  ;;  %v866_v12 = vld [vmem:[%s5184_s9 + $0x60] sm:$0xff] }
  0x7c   : > { %881 = vst.msk [vmem:[%s5189_s10 + $0x50] sm:$0xff] %vm870_vm0, %v864_v10  ;;  %882 = vst.msk [vmem:[%s5189_s10 + $0x58] sm:$0xff] %vm870_vm0, %v865_v11  ;;  %v867_v13 = vld [vmem:[%s5184_s9 + $0x68] sm:$0xff]  ;;  %v868_v14 = vld [vmem:[%s5184_s9 + $0x70] sm:$0xff] }
  0x7d   : > { %883 = vst.msk [vmem:[%s5189_s10 + $0x60] sm:$0xff] %vm870_vm0, %v866_v12  ;;  %884 = vst.msk [vmem:[%s5189_s10 + $0x68] sm:$0xff] %vm870_vm0, %v867_v13  ;;  %v869_v15 = vld [vmem:[%s5184_s9 + $0x78] sm:$0xff] }
  0x7e   : > { %885 = vst.msk [vmem:[%s5189_s10 + $0x70] sm:$0xff] %vm870_vm0, %v868_v14  ;;  %886 = vst.msk [vmem:[%s5189_s10 + $0x78] sm:$0xff] %vm870_vm0, %v869_v15 }
  0x7f PF: > { %v5247_v16 = vld [vmem:[%s7276_s2] sm:$0xff]  ;;  %v5252_v17 = vld [vmem:[%s7276_s2 + $0x8] sm:$0xff]  ;;  %v5257_v18 = vld [vmem:[%s7276_s2 + $0x10] sm:$0xff]  ;;  %s5372_s30 = smov 0  }
  0x80   : > { %7295 = vst [vmem:[#allocation8_spill] sm:$0xff] %v5247_v16  ;;  %7296 = vst [vmem:[#allocation9_spill] sm:$0xff] %v5252_v17  ;;  %v5262_v19 = vld [vmem:[%s7276_s2 + $0x18] sm:$0xff]  ;;  %v5267_v20 = vld [vmem:[%s7276_s2 + $0x20] sm:$0xff] }
  0x81   : > { %7297 = vst [vmem:[#allocation10_spill] sm:$0xff] %v5257_v18  ;;  %7298 = vst [vmem:[#allocation11_spill] sm:$0xff] %v5262_v19  ;;  %v5272_v21 = vld [vmem:[%s7276_s2 + $0x28] sm:$0xff]  ;;  %v5277_v22 = vld [vmem:[%s7277_s3] sm:$0xff] }
  0x82   : > { %7299 = vst [vmem:[#allocation12_spill] sm:$0xff] %v5267_v20  ;;  %7300 = vst [vmem:[#allocation13_spill] sm:$0xff] %v5272_v21  ;;  %v5282_v23 = vld [vmem:[%s7277_s3 + $0x8] sm:$0xff]  ;;  %v5287_v24 = vld [vmem:[%s7277_s3 + $0x10] sm:$0xff] }
  0x83   : > { %7301 = vst [vmem:[#allocation14_spill] sm:$0xff] %v5277_v22  ;;  %7302 = vst [vmem:[#allocation15_spill] sm:$0xff] %v5282_v23  ;;  %v5292_v25 = vld [vmem:[%s7277_s3 + $0x18] sm:$0xff]  ;;  %v5297_v26 = vld [vmem:[%s7277_s3 + $0x20] sm:$0xff] }
  0x84   : > { %7303 = vst [vmem:[#allocation16_spill] sm:$0xff] %v5287_v24  ;;  %7304 = vst [vmem:[#allocation17_spill] sm:$0xff] %v5292_v25  ;;  %v5302_v27 = vld [vmem:[%s7277_s3 + $0x28] sm:$0xff]  ;;  %v5307_v28 = vld [vmem:[%s7277_s3 + $0x30] sm:$0xff] }
  0x85   : > { %v5312_v29 = vld [vmem:[%s7277_s3 + $0x38] sm:$0xff]  ;;  %v5317_v30 = vld [vmem:[%s7278_s4] ss:$0 sm:$0xff]  ;;  %v5322_v31 = vld [vmem:[%s7278_s4 + $0x1] sm:$0x1] }
  0x86   : > { %v903_v32 = vld [vmem:[%s5189_s10] sm:$0xff]   ;;  %v904_v33 = vld [vmem:[%s5189_s10 + $0x8] sm:$0xff]   ;;  %v905_v34 = vld [vmem:[%s5189_s10 + $0x10] sm:$0xff]  }
  0x87   : > { %v906_v35 = vld [vmem:[%s5189_s10 + $0x18] sm:$0xff]   ;;  %v907_v36 = vld [vmem:[%s5189_s10 + $0x20] sm:$0xff]   ;;  %v908_v37 = vld [vmem:[%s5189_s10 + $0x28] sm:$0xff]  }
  0x88   : > { %v909_v38 = vld [vmem:[%s5189_s10 + $0x30] sm:$0xff]   ;;  %v910_v39 = vld [vmem:[%s5189_s10 + $0x38] sm:$0xff]   ;;  %v911_v40 = vld [vmem:[%s5189_s10 + $0x40] sm:$0xff]  }
  0x89   : > { %v912_v41 = vld [vmem:[%s5189_s10 + $0x48] sm:$0xff]   ;;  %v913_v42 = vld [vmem:[%s5189_s10 + $0x50] sm:$0xff]   ;;  %v914_v43 = vld [vmem:[%s5189_s10 + $0x58] sm:$0xff]  }
  0x8a   : > { %v915_v44 = vld [vmem:[%s5189_s10 + $0x60] sm:$0xff]   ;;  %v916_v45 = vld [vmem:[%s5189_s10 + $0x68] sm:$0xff]   ;;  %v917_v46 = vld [vmem:[%s5189_s10 + $0x70] sm:$0xff]  }
  0x8b   : > { %v918_v47 = vld [vmem:[%s5189_s10 + $0x78] sm:$0xff]  }
  0x8c LB: >> { %v7305_v16 = vld [vmem:[#allocation8_spill] sm:$0xff]  ;;  %v7306_v17 = vld [vmem:[#allocation9_spill] sm:$0xff]  ;;  %v7307_v18 = vld [vmem:[#allocation10_spill] sm:$0xff]  ;;  %v4179_v50 = vpack.c.bf16 %v5302_v27, %v5297_v26  ;;  %v4183_v51 = vpack.c.bf16 %v5312_v29, %v5307_v28  ;;  %s3933_s9 = sshll.u32 %s4787_s30, 7  ;;  %vm963_vm1 = vcmask 392192   ;;  %vm1173_vm2 = vcmask 261120   ;;  %s4787_s30 = sphi %s5372_s30, %s924_s30   ;;  %v4783_v32 = vphi %v903_v32, %v7331_v32   ;;  %v4779_v33 = vphi %v904_v33, %v7330_v33   ;;  %v4775_v34 = vphi %v905_v34, %v7329_v34   ;;  %v4771_v35 = vphi %v906_v35, %v7328_v35   ;;  %v4767_v36 = vphi %v907_v36, %v7327_v36   ;;  %v4763_v37 = vphi %v908_v37, %v7326_v37   ;;  %v4759_v38 = vphi %v909_v38, %v7325_v38   ;;  %v4755_v39 = vphi %v910_v39, %v7324_v39   ;;  %v4751_v40 = vphi %v911_v40, %v7323_v40   ;;  %v4747_v41 = vphi %v912_v41, %v7322_v41   ;;  %v4743_v42 = vphi %v913_v42, %v7321_v42   ;;  %v4739_v43 = vphi %v914_v43, %v7320_v43   ;;  %v4735_v44 = vphi %v915_v44, %v7319_v44   ;;  %v4731_v45 = vphi %v916_v45, %v7318_v45   ;;  %v4727_v46 = vphi %v917_v46, %v7317_v46   ;;  %v4723_v47 = vphi %v918_v47, %v7316_v47  }
  0x8d   : >> { %v4167_v48 = vpack.c.bf16 %v7306_v17, %v7305_v16  ;;  %v7308_v19 = vld [vmem:[#allocation11_spill] sm:$0xff]  ;;  %s5437_s13 = scalar_lea.vmem %s5191_s0, %s3933_s9 [#allocation3]  ;;  %v7309_v20 = vld [vmem:[#allocation12_spill] sm:$0xff]  ;;  %v7310_v21 = vld [vmem:[#allocation13_spill] sm:$0xff]  ;;  %4120 = vmatprep.mubr.msk.f32.mxu1 %vm1173_vm2, %v4759_v38  ;;  %v7282_v7 = vlaneseq  ;;  %s4789_s14 = smov 32  }
  0x8e   : >> { %v4171_v49 = vpack.c.bf16 %v7308_v19, %v7307_v18  ;;  %4195 = vmatprep.subr.bf16.mxu1 %v4179_v50  ;;  %v4175_v52 = vpack.c.bf16 %v7310_v21, %v7309_v20  ;;  %v943_v53 = vld [vmem:[%s5437_s13] sm:$0xff]  ;;  %v7312_v23 = vld [vmem:[#allocation15_spill] sm:$0xff]  ;;  %v945_v56 = vld [vmem:[%s5437_s13 + $0x10] sm:$0xff]  ;;  %s4790_s17 = smov 64   ;;  %s4791_s18 = smov 96  }
  0x8f   : >> { %4168 = vmatprep.subr.bf16.mxu0 %v4167_v48  ;;  %4197 = vmatpush3.bf16.msra.mxu1 %v4179_v50  ;;  %v7311_v22 = vld [vmem:[#allocation14_spill] sm:$0xff]  ;;  %v944_v55 = vld [vmem:[%s5437_s13 + $0x8] sm:$0xff]  ;;  %v946_v57 = vld [vmem:[%s5437_s13 + $0x18] sm:$0xff]  ;;  %v5510_v8 = vshrl.u32 %v7282_v7, 7  ;;  %s5834_s19 = scalar_lea.vmem [#allocation2], %s3933_s9  ;;  %s924_s30 = sadd.s32 1, %s4787_s30  }
  0x90   : >> { %4170 = vmatpush3.bf16.msra.mxu0 %v4167_v48  ;;  %4079 = vmatprep.mubr.msk.f32.mxu0 %vm963_vm1, %v943_v53  ;;  %v4187_v54 = vpack.c.bf16 %v7312_v23, %v7311_v22  ;;  %v947_v58 = vld [vmem:[%s5437_s13 + $0x20] sm:$0xff]  ;;  %v948_v59 = vld [vmem:[%s5437_s13 + $0x28] sm:$0xff]  ;;  %v949_v60 = vld [vmem:[%s5437_s13 + $0x30] sm:$0xff]  ;;  %p5869_p3 = scmp.ge.s32.totalorder %s924_s30, 8  }
  0x91   : >> { %4172 = vmatprep.subr.bf16.mxu0 %v4171_v49  ;;  %4196 = vmatprep.subr.bf16.mxu1 %v4183_v51  ;;  %v950_v61 = vld [vmem:[%s5437_s13 + $0x38] sm:$0xff]  ;;  %v951_v62 = vld [vmem:[%s5437_s13 + $0x40] sm:$0xff]  ;;  %v952_v63 = vld [vmem:[%s5437_s13 + $0x48] sm:$0xff]  ;;  %v961_v9 = vsub.s32 0, %v5510_v8  ;;  %s4792_s0 = smov (%p5869_p3), 96   ;;  %vm3047_vm3 = vcmask (%p5869_p3), 130112  }
  0x92   : >> { %v953_v0 = vld [vmem:[%s5437_s13 + $0x50] sm:$0xff]  ;;  %v954_v1 = vld [vmem:[%s5437_s13 + $0x58] sm:$0xff]  ;;  %v955_v2 = vld [vmem:[%s5437_s13 + $0x60] sm:$0xff]  ;;  %vm3054_vm4 = vcmask (%p5869_p3), 195712   ;;  %vm3061_vm5 = vcmask (%p5869_p3), 261312   ;;  %vm3068_vm6 = vcmask (%p5869_p3), 326912  }
  0x93   : >> { %4198 = vmatpush3.bf16.msra.mxu1 %v4183_v51  ;;  %v956_v3 = vld [vmem:[%s5437_s13 + $0x68] sm:$0xff]  ;;  %v957_v4 = vld [vmem:[%s5437_s13 + $0x70] sm:$0xff]  ;;  %v958_v5 = vld [vmem:[%s5437_s13 + $0x78] sm:$0xff]  ;;  %v5514_v10 = vrot.slane %v5322_v31, %v961_v9  ;;  %vm3075_vm7 = vcmask (%p5869_p3), 392512   ;;  %vm3082_vm8 = vcmask (%p5869_p3), 458112   ;;  %vm3089_vm9 = vcmask (%p5869_p3), 523712  }
  0x94   : >> { %4174 = vmatpush3.bf16.msra.mxu0 %v4171_v49  ;;  %4188 = vmatprep.subr.bf16.mxu1 %v4187_v54  ;;  %v7313_v24 = vld [vmem:[#allocation16_spill] sm:$0xff]  ;;  %v7314_v25 = vld [vmem:[#allocation17_spill] sm:$0xff]  ;;  %vm3096_vm10 = vcmask (%p5869_p3), 589312   ;;  %vm3103_vm11 = vcmask (%p5869_p3), 654912   ;;  %vm3110_vm12 = vcmask (%p5869_p3), 720512   ;;  %vm3117_vm13 = vcmask (%p5869_p3), 786112  }
  0x95   : >> { %4176 = vmatprep.subr.bf16.mxu0 %v4175_v52  ;;  %v4191_v6 = vpack.c.bf16 %v7314_v25, %v7313_v24  ;;  %vm3124_vm14 = vcmask (%p5869_p3), 851712   ;;  %vm3131_vm15 = vcmask (%p5869_p3), 917312   ;;  %vm3138_vm0 = vcmask (%p5869_p3), 982912   ;;  %s4000_s30 = sshll.u32 (%p5869_p3), %s4703_s24, 1  ;;  %s3737_s13 = sshll.u32 (%p5869_p3), %s5193_s8, 4  ;;  %s7221_s13 = int_to_ptr.vmem [resolvable:$true] %s3737_s13 }
  0x96   : >> { %4121 = vmatmul.mubr.msk.f32.vlgmr.msra.gmra.mrb[0].mxu1 %vm1173_vm2, %v4755_v39  ;;  %s3733_s24 = sadd.s32 (%p5869_p3), %s4707_s25, %s4000_s30  ;;  %s4794_s20 = smov (%p5869_p3), [#allocation4]  }
  0x97   : >> { %4190 = vmatpush3.bf16.msra.mxu1 %v4187_v54  ;;  %4123 = vmatprep.mubr.msk.f32.mxu1 %vm1173_vm2, %v4751_v40  ;;  %s4001_s9 = sshll.u32 (%p5869_p3), %s3733_s24, 7 }
  0x98   : >> { %4178 = vmatpush3.bf16.msra.mxu0 %v4175_v52  ;;  %4192 = vmatprep.subr.bf16.mxu1 %v4191_v6 }
  0x99   : >> { %4180 = vmatprep.subr.bf16.mxu0 %v4179_v50 }
  0x9a   : >> { %4124 = vmatmul.mubr.msk.f32.gmra.mrb[2].mxu1 %vm1173_vm2, %v4747_v41 }
  0x9b   : >> { %4080 = vmatmul.mubr.msk.f32.vlgmr.msra.gmra.mrb[0].mxu0 %vm963_vm1, %v944_v55  ;;  %4126 = vmatprep.mubr.msk.f32.mxu1 %vm1173_vm2, %v4743_v42 }
  0x9c   : >> { %4082 = vmatprep.mubr.msk.f32.mxu0 %vm963_vm1, %v945_v56  ;;  %4182 = vmatpush3.bf16.msra.mxu0 %v4179_v50 }
  0x9d   : >> { %4184 = vmatprep.subr.bf16.mxu0 %v4183_v51  ;;  %4194 = vmatpush3.bf16.msra.mxu1 %v4191_v6 }
  0x9e   : >> { %4127 = vmatmul.mubr.msk.f32.gmra.mrb[4].mxu1 %vm1173_vm2, %v4739_v43 }
  0x9f   : >> { %4083 = vmatmul.mubr.msk.f32.gmra.mrb[2].mxu0 %vm963_vm1, %v946_v57  ;;  %4129 = vmatprep.mubr.msk.f32.mxu1 %vm1173_vm2, %v4735_v44 }
  0xa0   : >> { %4085 = vmatprep.mubr.msk.f32.mxu0 %vm963_vm1, %v947_v58  ;;  %4186 = vmatpush3.bf16.msra.mxu0 %v4183_v51 }
  0xa2   : >> { %4130 = vmatmul.mubr.msk.f32.gmra.mrb[6].mxu1 %vm1173_vm2, %v4731_v45 }
  0xa3   : >> { %4086 = vmatmul.mubr.msk.f32.gmra.mrb[4].mxu0 %vm963_vm1, %v948_v59  ;;  %4132 = vmatprep.mubr.msk.f32.mxu1 %vm1173_vm2, %v4727_v46 }
  0xa4   : >> { %4088 = vmatprep.mubr.msk.f32.mxu0 %vm963_vm1, %v949_v60 }
  0xa6   : >> { %4133 = vmatmul.mubr.msk.f32.gmra.mrb[8].mxu1 %vm1173_vm2, %v4723_v47 }
  0xa7   : >> { %4089 = vmatmul.mubr.msk.f32.gmra.mrb[6].mxu0 %vm963_vm1, %v950_v61 }
  0xa8   : >> { %4091 = vmatprep.mubr.msk.f32.mxu0 %vm963_vm1, %v951_v62 }
  0xab   : >> { %4092 = vmatmul.mubr.msk.f32.gmra.mrb[8].mxu0 %vm963_vm1, %v952_v63 }
  0xac   : >> { %4094 = vmatprep.mubr.msk.f32.mxu0 %vm963_vm1, %v953_v0 }
  0xaf   : >> { %4095 = vmatmul.mubr.msk.f32.gmra.mrb[10].mxu0 %vm963_vm1, %v954_v1 }
  0xb0   : >> { %4097 = vmatprep.mubr.msk.f32.mxu0 %vm963_vm1, %v955_v2 }
  0xb3   : >> { %4098 = vmatmul.mubr.msk.f32.gmra.mrb[12].mxu0 %vm963_vm1, %v956_v3 }
  0xb4   : >> { %4100 = vmatprep.mubr.msk.f32.mxu0 %vm963_vm1, %v957_v4 }
  0xb7   : >> { %4101 = vmatmul.mubr.msk.f32.gmra.mrb[14].mxu0 %vm963_vm1, %v958_v5  ;;  %vm3145_vm1 = vcmask (%p5869_p3), 1048512  }
  0xb8   : >> { %4111 = vmatprep.mubr.msk.f32.mxu0 %vm1173_vm2, %v4783_v32 }
  0xbb   : >> { %4112 = vmatmul.mubr.msk.f32.vlgmr.msra.gmra.mrb[16].mxu0 %vm1173_vm2, %v4779_v33 }
  0xbc   : >> { %4114 = vmatprep.mubr.msk.f32.mxu0 %vm1173_vm2, %v4775_v34 }
  0xbf   : >> { %4115 = vmatmul.mubr.msk.f32.gmra.mrb[18].mxu0 %vm1173_vm2, %v4771_v35 }
  0xc0   : >> { %4117 = vmatprep.mubr.msk.f32.mxu0 %vm1173_vm2, %v4767_v36 }
  0xc3   : >> { %4118 = vmatmul.mubr.msk.f32.gmra.mrb[20].mxu0 %vm1173_vm2, %v4763_v37 }
 0x16e   : >> { %v4081_v11 = vpop.f32.mrb[0].mxu0 }
 0x16f   : >> { %v1084_v12 = vadd.f32 %v4081_v11, %v5514_v10  ;;  %v1078_v13 = vpop.f32.mrb[1].mxu0 }
 0x170   : >> { %v1079_v14 = vadd.f32 %v1078_v13, %v5514_v10 }
 0x172   : >> { %4429 = vtanh.f32 %v1079_v14  ;;  %v4084_v15 = vpop.f32.mrb[2].mxu0 }
 0x173   : >> { %4431 = vtanh.f32 %v1084_v12  ;;  %v1094_v48 = vadd.f32 %v4084_v15, %v5514_v10  ;;  %v1088_v49 = vpop.f32.mrb[3].mxu0 }
 0x174   : >> { %v1089_v50 = vadd.f32 %v1088_v49, %v5514_v10 }
 0x176   : >> { %4433 = vtanh.f32 %v1089_v50  ;;  %v4087_v51 = vpop.f32.mrb[4].mxu0 }
 0x177   : >> { %4435 = vtanh.f32 %v1094_v48  ;;  %v1104_v52 = vadd.f32 %v4087_v51, %v5514_v10  ;;  %v1098_v53 = vpop.f32.mrb[5].mxu0 }
 0x178   : >> { %v1099_v54 = vadd.f32 %v1098_v53, %v5514_v10 }
 0x179   : >> { %4437 = vtanh.f32 %v1104_v52 }
 0x17a   : >> { %4439 = vtanh.f32 %v1099_v54  ;;  %v4090_v55 = vpop.f32.mrb[6].mxu0 }
 0x17b   : >> { %v1114_v56 = vadd.f32 %v4090_v55, %v5514_v10  ;;  %v1108_v57 = vpop.f32.mrb[7].mxu0 }
 0x17c   : >> { %v4430_v58 = vpop.eup %4429  ;;  %v1109_v59 = vadd.f32 %v1108_v57, %v5514_v10 }
 0x17d   : >> { %v4432_v60 = vpop.eup %4431  ;;  %4441 = vtanh.f32 %v1114_v56  ;;  %4143 = vmatprep.mubr.msk.f32.mxu1 %vm1173_vm2, %v4430_v58 }
 0x17e   : >> { %4443 = vtanh.f32 %v1109_v59  ;;  %v4093_v61 = vpop.f32.mrb[8].mxu0  ;;  %4144 = vmatmul.mubr.msk.f32.vlgmr.msra.gmra.mrb[10].mxu1 %vm1173_vm2, %v4432_v60 }
 0x17f   : >> { %v1124_v62 = vadd.f32 %v4093_v61, %v5514_v10  ;;  %v1118_v63 = vpop.f32.mrb[9].mxu0 }
 0x180   : >> { %v4434_v0 = vpop.eup %4433  ;;  %v1119_v1 = vadd.f32 %v1118_v63, %v5514_v10 }
 0x181   : >> { %v4436_v2 = vpop.eup %4435  ;;  %4445 = vtanh.f32 %v1124_v62  ;;  %4146 = vmatprep.mubr.msk.f32.mxu1 %vm1173_vm2, %v4434_v0 }
 0x182   : >> { %4447 = vtanh.f32 %v1119_v1  ;;  %v4096_v3 = vpop.f32.mrb[10].mxu0  ;;  %4147 = vmatmul.mubr.msk.f32.gmra.mrb[12].mxu1 %vm1173_vm2, %v4436_v2 }
 0x183   : >> { %v4438_v4 = vpop.eup %4437  ;;  %v1134_v5 = vadd.f32 %v4096_v3, %v5514_v10  ;;  %v1128_v6 = vpop.f32.mrb[11].mxu0 }
 0x184   : >> { %v4440_v9 = vpop.eup %4439  ;;  %v1129_v11 = vadd.f32 %v1128_v6, %v5514_v10 }
 0x185   : >> { %4449 = vtanh.f32 %v1134_v5  ;;  %4149 = vmatprep.mubr.msk.f32.mxu1 %vm1173_vm2, %v4440_v9 }
 0x186   : >> { %4451 = vtanh.f32 %v1129_v11  ;;  %v4099_v12 = vpop.f32.mrb[12].mxu0  ;;  %4150 = vmatmul.mubr.msk.f32.gmra.mrb[14].mxu1 %vm1173_vm2, %v4438_v4 }
 0x187   : >> { %v4442_v13 = vpop.eup %4441  ;;  %v1144_v14 = vadd.f32 %v4099_v12, %v5514_v10  ;;  %v1138_v15 = vpop.f32.mrb[13].mxu0 }
 0x188   : >> { %v4444_v48 = vpop.eup %4443  ;;  %v1139_v49 = vadd.f32 %v1138_v15, %v5514_v10 }
 0x189   : >> { %4453 = vtanh.f32 %v1144_v14  ;;  %4152 = vmatprep.mubr.msk.f32.mxu1 %vm1173_vm2, %v4444_v48 }
 0x18a   : >> { %4455 = vtanh.f32 %v1139_v49  ;;  %v4102_v50 = vpop.f32.mrb[14].mxu0  ;;  %4153 = vmatmul.mubr.msk.f32.gmra.mrb[0].mxu1 %vm1173_vm2, %v4442_v13 }
 0x18b   : >> { %v4446_v51 = vpop.eup %4445  ;;  %v1154_v52 = vadd.f32 %v4102_v50, %v5514_v10  ;;  %v1148_v53 = vpop.f32.mrb[15].mxu0 }
 0x18c   : >> { %v4448_v54 = vpop.eup %4447  ;;  %v1149_v55 = vadd.f32 %v1148_v53, %v5514_v10 }
 0x18d   : >> { %4457 = vtanh.f32 %v1154_v52  ;;  %4155 = vmatprep.mubr.msk.f32.mxu1 %vm1173_vm2, %v4448_v54 }
 0x18e   : >> { %4459 = vtanh.f32 %v1149_v55  ;;  %4156 = vmatmul.mubr.msk.f32.gmra.mrb[2].mxu1 %vm1173_vm2, %v4446_v51  ;;  %v4113_v62 = vpop.f32.mrb[16].mxu0 }
 0x18f   : >> { %v4450_v56 = vpop.eup %4449  ;;  %v1288_v63 = vpop.f32.mrb[17].mxu0 }
 0x190   : >> { %v4452_v57 = vpop.eup %4451 }
 0x191   : >> { %4158 = vmatprep.mubr.msk.f32.mxu1 %vm1173_vm2, %v4452_v57 }
 0x192   : >> { %4159 = vmatmul.mubr.msk.f32.gmra.mrb[4].mxu1 %vm1173_vm2, %v4450_v56  ;;  %v4116_v0 = vpop.f32.mrb[18].mxu0 }
 0x193   : >> { %v4454_v58 = vpop.eup %4453  ;;  %v1298_v1 = vpop.f32.mrb[19].mxu0 }
 0x194   : >> { %v4456_v59 = vpop.eup %4455 }
 0x195   : >> { %4161 = vmatprep.mubr.msk.f32.mxu1 %vm1173_vm2, %v4456_v59 }
 0x196   : >> { %4162 = vmatmul.mubr.msk.f32.gmra.mrb[6].mxu1 %vm1173_vm2, %v4454_v58  ;;  %v4119_v2 = vpop.f32.mrb[20].mxu0 }
 0x197   : >> { %v4458_v60 = vpop.eup %4457  ;;  %v1308_v3 = vpop.f32.mrb[21].mxu0 }
 0x198   : >> { %v4460_v61 = vpop.eup %4459 }
 0x199   : >> { %4164 = vmatprep.mubr.msk.f32.mxu1 %vm1173_vm2, %v4460_v61 }
 0x19a   : >> { %4165 = vmatmul.mubr.msk.f32.gmra.mrb[8].mxu1 %vm1173_vm2, %v4458_v60 }
 0x251   : >> { %v4145_v4 = vpop.f32.mrb[10].mxu1 }
 0x252   : >> { %v1487_v5 = vadd.f32 %v4145_v4, %v4113_v62  ;;  %v1481_v6 = vpop.f32.mrb[11].mxu1 }
 0x253   : >> { %v1482_v9 = vadd.f32 %v1481_v6, %v1288_v63 }
 0x254   : >> { %v5549_v11 = vadd.f32 %v5317_v30, %v1487_v5 }
 0x255   : >> { %v4148_v12 = vpop.f32.mrb[12].mxu1  ;;  %v5554_v48 = vadd.f32 %v5317_v30, %v1482_v9 }
 0x256   : >> { %v1497_v13 = vadd.f32 %v4148_v12, %v4116_v0  ;;  %1694 = vrot.lane.b32.xlu0 %v5549_v11, %s4789_s14  ;;  %v1491_v14 = vpop.f32.mrb[13].mxu1 }
 0x257   : >> { %v1492_v15 = vadd.f32 %v1491_v14, %v1298_v1 }
 0x258   : >> { %v5557_v49 = vadd.f32 %v5317_v30, %v1497_v13 }
 0x259   : >> { %v4151_v50 = vpop.f32.mrb[14].mxu1  ;;  %v5564_v54 = vadd.f32 %v5317_v30, %v1492_v15 }
 0x25a   : >> { %v1507_v51 = vadd.f32 %v4151_v50, %v4119_v2  ;;  %1698 = vrot.lane.b32.xlu1 %v5557_v49, %s4789_s14  ;;  %v1501_v52 = vpop.f32.mrb[15].mxu1  ;;  %1692 = vrot.lane.b32.xlu0 %v5554_v48, %s4789_s14 }
 0x25b   : >> { %v1502_v53 = vadd.f32 %v1501_v52, %v1308_v3  ;;  %v3983_v52 = vmul.f32 -1.442695, %v5554_v48 }
 0x25c   : >> { %v5574_v58 = vadd.f32 %v5317_v30, %v1507_v51  ;;  %v3984_v51 = vmul.f32 -1.442695, %v5549_v11 }
 0x25d   : >> { %v5567_v55 = vadd.f32 %v5317_v30, %v1502_v53  ;;  %v4154_v56 = vpop.f32.mrb[0].mxu1  ;;  %v3986_v53 = vmul.f32 -1.442695, %v5557_v49 }
 0x25e   : >> { %v1511_v57 = vpop.f32.mrb[1].mxu1  ;;  %1696 = vrot.lane.b32.xlu1 %v5564_v54, %s4789_s14  ;;  %v5584_v62 = vadd.f32 %v4154_v56, %v5317_v30  ;;  %4461 = vpow2.f32 %v3984_v51  ;;  %v3985_v56 = vmul.f32 -1.442695, %v5564_v54 }
 0x25f   : >> { %1700 = vrot.lane.b32.xlu0 %v5567_v55, %s4789_s14  ;;  %v5577_v59 = vadd.f32 %v5317_v30, %v1511_v57  ;;  %4463 = vpow2.f32 %v3983_v52  ;;  %v3988_v57 = vmul.f32 -1.442695, %v5574_v58 }
 0x260   : >> { %4465 = vpow2.f32 %v3986_v53 }
 0x261   : >> { %v4157_v60 = vpop.f32.mrb[2].mxu1  ;;  %4467 = vpow2.f32 %v3985_v56 }
 0x262   : >> { %v1521_v61 = vpop.f32.mrb[3].mxu1  ;;  %1702 = vrot.lane.b32.xlu1 %v5574_v58, %s4789_s14  ;;  %v5594_v2 = vadd.f32 %v4157_v60, %v5317_v30  ;;  %v3987_v60 = vmul.f32 -1.442695, %v5567_v55  ;;  %4469 = vpow2.f32 %v3988_v57 }
 0x263   : >> { %1704 = vrot.lane.b32.xlu0 %v5577_v59, %s4789_s14  ;;  %v5587_v63 = vadd.f32 %v5317_v30, %v1521_v61  ;;  %v3990_v61 = vmul.f32 -1.442695, %v5584_v62 }
 0x264   : >> { %4471 = vpow2.f32 %v3987_v60  ;;  %v3992_v51 = vmul.f32 -1.442695, %v5594_v2 }
 0x265   : >> { %v4160_v0 = vpop.f32.mrb[4].mxu1  ;;  %4473 = vpow2.f32 %v3990_v61  ;;  %v3991_v52 = vmul.f32 -1.442695, %v5587_v63 }
 0x266   : >> { %v1531_v1 = vpop.f32.mrb[5].mxu1  ;;  %1706 = vrot.lane.b32.xlu1 %v5584_v62, %s4789_s14  ;;  %v5604_v6 = vadd.f32 %v4160_v0, %v5317_v30 }
 0x267   : >> { %1708 = vrot.lane.b32.xlu0 %v5587_v63, %s4789_s14  ;;  %v5597_v3 = vadd.f32 %v5317_v30, %v1531_v1 }
 0x268   : >> { %v4462_v0 = vpop.eup %4461  ;;  %v3994_v7 = vmul.f32 -1.442695, %v5604_v6 }
 0x269   : >> { %v4163_v4 = vpop.f32.mrb[6].mxu1  ;;  %v4464_v1 = vpop.eup %4463  ;;  %v3993_v60 = vmul.f32 -1.442695, %v5597_v3 }
 0x26a   : >> { %v1541_v5 = vpop.f32.mrb[7].mxu1  ;;  %1710 = vrot.lane.b32.xlu1 %v5594_v2, %s4789_s14  ;;  %v5614_v14 = vadd.f32 %v4163_v4, %v5317_v30  ;;  %v3989_v4 = vmul.f32 -1.442695, %v5577_v59 }
 0x26b   : >> { %1712 = vrot.lane.b32.xlu0 %v5597_v3, %s4789_s14  ;;  %v5607_v9 = vadd.f32 %v5317_v30, %v1541_v5  ;;  %v1629_v5 = vadd.f32 1.0, %v4462_v0 }
 0x26c   : >> { %4475 = vpow2.f32 %v3989_v4  ;;  %v3996_v4 = vmul.f32 -1.442695, %v5614_v14 }
 0x26d   : >> { %v4166_v12 = vpop.f32.mrb[8].mxu1  ;;  %4477 = vrcp.f32 %v1629_v5  ;;  %v3995_v5 = vmul.f32 -1.442695, %v5607_v9 }
 0x26e   : >> { %v1551_v13 = vpop.f32.mrb[9].mxu1  ;;  %1714 = vrot.lane.b32.xlu1 %v5604_v6, %s4789_s14  ;;  %v5624_v50 = vadd.f32 %v4166_v12, %v5317_v30  ;;  %v4466_v12 = vpop.eup %4465 }
 0x26f   : >> { %1716 = vrot.lane.b32.xlu0 %v5607_v9, %s4789_s14  ;;  %v5617_v15 = vadd.f32 %v5317_v30, %v1551_v13  ;;  %v1628_v13 = vadd.f32 1.0, %v4464_v1  ;;  %v1631_v53 = vadd.f32 1.0, %v4466_v12  ;;  %v4468_v56 = vpop.eup %4467 }
 0x270   : >> { %v4470_v57 = vpop.eup %4469  ;;  %v1630_v61 = vadd.f32 1.0, %v4468_v56 }
 0x271   : >> { %4479 = vrcp.f32 %v1628_v13  ;;  %v4472_v0 = vpop.eup %4471  ;;  %v1633_v1 = vadd.f32 1.0, %v4470_v57 }
 0x272   : >> { %1718 = vrot.lane.b32.xlu1 %v5614_v14, %s4789_s14  ;;  %4481 = vpow2.f32 %v3992_v51  ;;  %v4474_v16 = vpop.eup %4473  ;;  %v1632_v12 = vadd.f32 1.0, %v4472_v0 }
 0x273   : >> { %1720 = vrot.lane.b32.xlu0 %v5617_v15, %s4789_s14  ;;  %4483 = vpow2.f32 %v3991_v52  ;;  %v1635_v51 = vadd.f32 1.0, %v4474_v16  ;;  %v3998_v52 = vmul.f32 -1.442695, %v5624_v50 }
 0x274   : >> { %4485 = vrcp.f32 %v1631_v53 }
 0x275   : >> { %4487 = vpow2.f32 %v3994_v7  ;;  %v3997_v7 = vmul.f32 -1.442695, %v5617_v15 }
 0x276   : >> { %1722 = vrot.lane.b32.xlu1 %v5624_v50, %s4789_s14  ;;  %4489 = vpow2.f32 %v3993_v60  ;;  %v4476_v13 = vpop.eup %4475 }
 0x277   : >> { %4491 = vrcp.f32 %v1630_v61  ;;  %v5642_v17 = vpop.eup %4477  ;;  %v1634_v61 = vadd.f32 1.0, %v4476_v13 }
 0x278   : >> { %4493 = vrcp.f32 %v1633_v1 }
 0x279   : >> { %4495 = vpow2.f32 %v3996_v4 }
 0x27a   : >> { %4497 = vpow2.f32 %v3995_v5 }
 0x27b   : >> { %v5645_v56 = vpop.eup %4479  ;;  %4499 = vrcp.f32 %v1632_v12 }
 0x27c   : >> { %v4482_v60 = vpop.eup %4481  ;;  %4501 = vrcp.f32 %v1635_v51 }
 0x27d   : >> { %v4484_v0 = vpop.eup %4483  ;;  %4503 = vpow2.f32 %v3998_v52  ;;  %v1637_v18 = vadd.f32 1.0, %v4482_v60 }
 0x27e   : >> { %v5650_v16 = vpop.eup %4485  ;;  %4505 = vpow2.f32 %v3997_v7  ;;  %v1636_v12 = vadd.f32 1.0, %v4484_v0 }
 0x27f   : >> { %4507 = vrcp.f32 %v1634_v61 }
 0x280   : >> { %4509 = vrcp.f32 %v1637_v18 }
 0x281   : >> { %4511 = vrcp.f32 %v1636_v12 }
 0x2c8   : >> { %v1695_v53 = vpop.permute.xlu0 %1694 }
 0x2c9   : >> { %v1741_v57 = vmul.f32 %v5642_v17, %v1695_v53  ;;  %v4488_v53 = vpop.eup %4487 }
 0x2ca   : >> { %v4490_v13 = vpop.eup %4489  ;;  %v1639_v60 = vadd.f32 1.0, %v4488_v53 }
 0x2cb   : >> { %1774 = vrot.lane.b32.xlu1 %v1741_v57, %s4790_s17  ;;  %v5656_v51 = vpop.eup %4491 }
 0x2cc   : >> { %v1699_v1 = vpop.permute.xlu1 %1698  ;;  %v1693_v4 = vpop.permute.xlu0 %1692  ;;  %4513 = vrcp.f32 %v1639_v60 }
 0x2cd   : >> { %v1743_v5 = vmul.f32 %v5650_v16, %v1699_v1  ;;  %v1740_v19 = vmul.f32 %v5645_v56, %v1693_v4  ;;  %v5658_v52 = vpop.eup %4493  ;;  %v1638_v4 = vadd.f32 1.0, %v4490_v13 }
 0x2ce   : >> { %v4496_v20 = vpop.eup %4495 }
 0x2cf   : >> { %1778 = vrot.lane.b32.xlu1 %v1743_v5, %s4790_s17  ;;  %1772 = vrot.lane.b32.xlu0 %v1740_v19, %s4790_s17  ;;  %v4498_v61 = vpop.eup %4497  ;;  %v1641_v21 = vadd.f32 1.0, %v4496_v20  ;;  %4515 = vrcp.f32 %v1638_v4 }
 0x2d0   : >> { %v1697_v57 = vpop.permute.xlu1 %1696  ;;  %v5662_v0 = vpop.eup %4499  ;;  %v1640_v23 = vadd.f32 1.0, %v4498_v61 }
 0x2d1   : >> { %v1742_v7 = vmul.f32 %v5656_v51, %v1697_v57  ;;  %v1701_v1 = vpop.permute.xlu0 %1700  ;;  %v5664_v19 = vpop.eup %4501  ;;  %4517 = vrcp.f32 %v1641_v21 }
 0x2d2   : >> { %v1744_v22 = vmul.f32 %v5662_v0, %v1701_v1  ;;  %v4504_v57 = vpop.eup %4503  ;;  %4519 = vrcp.f32 %v1640_v23 }
 0x2d3   : >> { %1776 = vrot.lane.b32.xlu0 %v1742_v7, %s4790_s17  ;;  %v4506_v12 = vpop.eup %4505  ;;  %v1643_v24 = vadd.f32 1.0, %v4504_v57 }
 0x2d4   : >> { %v1703_v5 = vpop.permute.xlu1 %1702  ;;  %v5670_v13 = vpop.eup %4507 }
 0x2d5   : >> { %v1745_v18 = vmul.f32 %v5658_v52, %v1703_v5  ;;  %v1705_v53 = vpop.permute.xlu0 %1704  ;;  %v1642_v5 = vadd.f32 1.0, %v4506_v12  ;;  %v5674_v25 = vpop.eup %4509  ;;  %4521 = vrcp.f32 %v1643_v24 }
 0x2d6   : >> { %v1746_v20 = vmul.f32 %v5670_v13, %v1705_v53  ;;  %v5678_v4 = vpop.eup %4511 }
 0x2d7   : >> { %1782 = vrot.lane.b32.xlu1 %v1745_v18, %s4790_s17  ;;  %1780 = vrot.lane.b32.xlu0 %v1744_v22, %s4790_s17  ;;  %4523 = vrcp.f32 %v1642_v5  ;;  %v5682_v53 = vpop.eup %4513 }
 0x2d8   : >> { %v1707_v7 = vpop.permute.xlu1 %1706 }
 0x2d9   : >> { %v1747_v60 = vmul.f32 %v5664_v19, %v1707_v7  ;;  %v1709_v1 = vpop.permute.xlu0 %1708  ;;  %v5686_v23 = vpop.eup %4515 }
 0x2da   : >> { %v1748_v21 = vmul.f32 %v5678_v4, %v1709_v1 }
 0x2db   : >> { %1786 = vrot.lane.b32.xlu1 %v1747_v60, %s4790_s17  ;;  %1784 = vrot.lane.b32.xlu0 %v1746_v20, %s4790_s17  ;;  %v5690_v20 = vpop.eup %4517 }
 0x2dc   : >> { %v1711_v22 = vpop.permute.xlu1 %1710  ;;  %v5694_v60 = vpop.eup %4519 }
 0x2dd   : >> { %v1749_v61 = vmul.f32 %v5674_v25, %v1711_v22  ;;  %v1713_v18 = vpop.permute.xlu0 %1712 }
 0x2de   : >> { %v1750_v12 = vmul.f32 %v5686_v23, %v1713_v18 }
 0x2df   : >> { %1790 = vrot.lane.b32.xlu1 %v1749_v61, %s4790_s17  ;;  %1788 = vrot.lane.b32.xlu0 %v1748_v21, %s4790_s17  ;;  %v5698_v61 = vpop.eup %4521 }
 0x2e0   : >> { %v1715_v57 = vpop.permute.xlu1 %1714 }
 0x2e1   : >> { %v1751_v7 = vmul.f32 %v5682_v53, %v1715_v57  ;;  %v1717_v24 = vpop.permute.xlu0 %1716  ;;  %v5702_v18 = vpop.eup %4523 }
 0x2e2   : >> { %v1752_v5 = vmul.f32 %v5694_v60, %v1717_v24 }
 0x2e3   : >> { %1794 = vrot.lane.b32.xlu1 %v1751_v7, %s4790_s17  ;;  %1792 = vrot.lane.b32.xlu0 %v1750_v12, %s4790_s17 }
 0x2e4   : >> { %v1719_v1 = vpop.permute.xlu1 %1718 }
 0x2e5   : >> { %v1753_v22 = vmul.f32 %v5690_v20, %v1719_v1  ;;  %v1721_v21 = vpop.permute.xlu0 %1720 }
 0x2e6   : >> { %v1754_v7 = vmul.f32 %v5702_v18, %v1721_v21 }
 0x2e7   : >> { %1798 = vrot.lane.b32.xlu1 %v1753_v22, %s4790_s17  ;;  %1796 = vrot.lane.b32.xlu0 %v1752_v5, %s4790_s17 }
 0x2e8   : >> { %v1723_v57 = vpop.permute.xlu1 %1722 }
 0x2e9   : >> { %v1755_v12 = vmul.f32 %v5698_v61, %v1723_v57 }
 0x2eb   : >> { %1802 = vrot.lane.b32.xlu1 %v1755_v12, %s4790_s17  ;;  %1800 = vrot.lane.b32.xlu0 %v1754_v7, %s4790_s17  ;;  %s7219_s17 = scalar_lea.hbm (%p5869_p3), %s7279_s5, %s4001_s9 }
 0x2ef   : >> { %1950 = vrot.lane.b32.xlu1 %v4779_v33, %s4789_s14  ;;  %1948 = vrot.lane.b32.xlu0 %v4783_v32, %s4789_s14 }
 0x2f3   : >> { %1954 = vrot.lane.b32.xlu1 %v4771_v35, %s4789_s14  ;;  %1952 = vrot.lane.b32.xlu0 %v4775_v34, %s4789_s14 }
 0x2f7   : >> { %1958 = vrot.lane.b32.xlu1 %v4763_v37, %s4789_s14  ;;  %1956 = vrot.lane.b32.xlu0 %v4767_v36, %s4789_s14 }
 0x2fb   : >> { %1962 = vrot.lane.b32.xlu1 %v4755_v39, %s4789_s14  ;;  %1960 = vrot.lane.b32.xlu0 %v4759_v38, %s4789_s14 }
 0x2ff   : >> { %1966 = vrot.lane.b32.xlu1 %v4747_v41, %s4789_s14  ;;  %1964 = vrot.lane.b32.xlu0 %v4751_v40, %s4789_s14 }
 0x303   : >> { %1970 = vrot.lane.b32.xlu1 %v4739_v43, %s4789_s14  ;;  %1968 = vrot.lane.b32.xlu0 %v4743_v42, %s4789_s14 }
 0x307   : >> { %1974 = vrot.lane.b32.xlu1 %v4731_v45, %s4789_s14  ;;  %1972 = vrot.lane.b32.xlu0 %v4735_v44, %s4789_s14 }
 0x33d   : >> { %v1775_v32 = vpop.permute.xlu1 %1774 }
 0x33e   : >> { %v1821_v33 = vadd.f32 %v1775_v32, %v5549_v11 }
 0x340   : >> { %4525 = vtanh.f32 %v1821_v33 }
 0x341   : >> { %v1779_v34 = vpop.permute.xlu1 %1778  ;;  %v1773_v35 = vpop.permute.xlu0 %1772 }
 0x342   : >> { %v1823_v36 = vadd.f32 %v1779_v34, %v5557_v49  ;;  %v1820_v37 = vadd.f32 %v1773_v35, %v5554_v48 }
 0x344   : >> { %4527 = vtanh.f32 %v1823_v36 }
 0x345   : >> { %4529 = vtanh.f32 %v1820_v37  ;;  %v1777_v38 = vpop.permute.xlu0 %1776 }
 0x346   : >> { %v1822_v39 = vadd.f32 %v1777_v38, %v5564_v54 }
 0x348   : >> { %4531 = vtanh.f32 %v1822_v39 }
 0x349   : >> { %v1783_v40 = vpop.permute.xlu1 %1782  ;;  %v1781_v41 = vpop.permute.xlu0 %1780 }
 0x34a   : >> { %v4526_v42 = vpop.eup %4525  ;;  %v1825_v43 = vadd.f32 %v1783_v40, %v5574_v58  ;;  %v1824_v44 = vadd.f32 %v1781_v41, %v5567_v55 }
 0x34b   : >> { %1886 = vrot.lane.b32.xlu1 %v4526_v42, %s4791_s18 }
 0x34c   : >> { %4533 = vtanh.f32 %v1825_v43 }
 0x34d   : >> { %4535 = vtanh.f32 %v1824_v44  ;;  %v1787_v45 = vpop.permute.xlu1 %1786  ;;  %v1785_v11 = vpop.permute.xlu0 %1784 }
 0x34e   : >> { %v4528_v48 = vpop.eup %4527  ;;  %v1827_v49 = vadd.f32 %v1787_v45, %v5584_v62  ;;  %v1826_v54 = vadd.f32 %v1785_v11, %v5577_v59 }
 0x34f   : >> { %v4530_v24 = vpop.eup %4529  ;;  %1890 = vrot.lane.b32.xlu1 %v4528_v48, %s4791_s18 }
 0x350   : >> { %4537 = vtanh.f32 %v1827_v49  ;;  %1884 = vrot.lane.b32.xlu0 %v4530_v24, %s4791_s18 }
 0x351   : >> { %4539 = vtanh.f32 %v1826_v54  ;;  %v1791_v55 = vpop.permute.xlu1 %1790  ;;  %v1789_v58 = vpop.permute.xlu0 %1788 }
 0x352   : >> { %v4532_v1 = vpop.eup %4531  ;;  %v1829_v5 = vadd.f32 %v1791_v55, %v5594_v2  ;;  %v1828_v22 = vadd.f32 %v1789_v58, %v5587_v63 }
 0x354   : >> { %4541 = vtanh.f32 %v1829_v5  ;;  %1888 = vrot.lane.b32.xlu0 %v4532_v1, %s4791_s18 }
 0x355   : >> { %4543 = vtanh.f32 %v1828_v22  ;;  %v1795_v62 = vpop.permute.xlu1 %1794  ;;  %v1793_v59 = vpop.permute.xlu0 %1792 }
 0x356   : >> { %v4534_v21 = vpop.eup %4533  ;;  %v1831_v57 = vadd.f32 %v1795_v62, %v5604_v6  ;;  %v1830_v7 = vadd.f32 %v1793_v59, %v5597_v3 }
 0x357   : >> { %v4536_v12 = vpop.eup %4535  ;;  %1894 = vrot.lane.b32.xlu1 %v4534_v21, %s4791_s18 }
 0x358   : >> { %4545 = vtanh.f32 %v1831_v57  ;;  %1892 = vrot.lane.b32.xlu0 %v4536_v12, %s4791_s18  ;;  %v1855_v57 = vsub.f32 1.0, %v5650_v16  ;;  %v1852_v12 = vsub.f32 1.0, %v5645_v56 }
 0x359   : >> { %4547 = vtanh.f32 %v1830_v7  ;;  %v1799_v2 = vpop.permute.xlu1 %1798  ;;  %v1797_v63 = vpop.permute.xlu0 %1796 }
 0x35a   : >> { %v4538_v32 = vpop.eup %4537  ;;  %v1833_v33 = vadd.f32 %v1799_v2, %v5614_v14  ;;  %v1832_v34 = vadd.f32 %v1797_v63, %v5607_v9 }
 0x35b   : >> { %v4540_v35 = vpop.eup %4539  ;;  %1898 = vrot.lane.b32.xlu1 %v4538_v32, %s4791_s18 }
 0x35c   : >> { %4549 = vtanh.f32 %v1833_v33  ;;  %1896 = vrot.lane.b32.xlu0 %v4540_v35, %s4791_s18 }
 0x35d   : >> { %4551 = vtanh.f32 %v1832_v34  ;;  %v1803_v3 = vpop.permute.xlu1 %1802  ;;  %v1801_v6 = vpop.permute.xlu0 %1800 }
 0x35e   : >> { %v4542_v36 = vpop.eup %4541  ;;  %v1835_v37 = vadd.f32 %v1803_v3, %v5624_v50  ;;  %v1834_v38 = vadd.f32 %v1801_v6, %v5617_v15  ;;  %v1854_v3 = vsub.f32 1.0, %v5656_v51 }
 0x35f   : >> { %v4544_v39 = vpop.eup %4543  ;;  %1902 = vrot.lane.b32.xlu1 %v4542_v36, %s4791_s18 }
 0x360   : >> { %4553 = vtanh.f32 %v1835_v37  ;;  %1900 = vrot.lane.b32.xlu0 %v4544_v39, %s4791_s18 }
 0x361   : >> { %4555 = vtanh.f32 %v1834_v38  ;;  %v1951_v42 = vpop.permute.xlu1 %1950  ;;  %v1949_v43 = vpop.permute.xlu0 %1948 }
 0x362   : >> { %v4546_v9 = vpop.eup %4545  ;;  %v1996_v33 = vmul.f32 %v5645_v56, %v1949_v43 }
 0x363   : >> { %v4548_v14 = vpop.eup %4547  ;;  %1906 = vrot.lane.b32.xlu1 %v4546_v9, %s4791_s18  ;;  %v1856_v9 = vsub.f32 1.0, %v5662_v0 }
 0x364   : >> { %1904 = vrot.lane.b32.xlu0 %v4548_v14, %s4791_s18 }
 0x365   : >> { %v1955_v44 = vpop.permute.xlu1 %1954  ;;  %v1953_v45 = vpop.permute.xlu0 %1952 }
 0x366   : >> { %v4550_v40 = vpop.eup %4549  ;;  %v1999_v2 = vmul.f32 %v5650_v16, %v1955_v44  ;;  %v1998_v36 = vmul.f32 %v5656_v51, %v1953_v45  ;;  %v1857_v16 = vsub.f32 1.0, %v5658_v52  ;;  %v1859_v51 = vsub.f32 1.0, %v5664_v19 }
 0x367   : >> { %v4552_v41 = vpop.eup %4551  ;;  %1910 = vrot.lane.b32.xlu1 %v4550_v40, %s4791_s18  ;;  %v1858_v44 = vsub.f32 1.0, %v5670_v13 }
 0x368   : >> { %1908 = vrot.lane.b32.xlu0 %v4552_v41, %s4791_s18 }
 0x369   : >> { %v1959_v11 = vpop.permute.xlu1 %1958  ;;  %v1957_v48 = vpop.permute.xlu0 %1956 }
 0x36a   : >> { %v4554_v15 = vpop.eup %4553  ;;  %v2001_v56 = vmul.f32 %v5658_v52, %v1959_v11  ;;  %v2000_v41 = vmul.f32 %v5662_v0, %v1957_v48  ;;  %v1861_v48 = vsub.f32 1.0, %v5674_v25 }
 0x36b   : >> { %v4556_v50 = vpop.eup %4555  ;;  %1914 = vrot.lane.b32.xlu1 %v4554_v15, %s4791_s18 }
 0x36c   : >> { %1912 = vrot.lane.b32.xlu0 %v4556_v50, %s4791_s18 }
 0x36d   : >> { %v1963_v49 = vpop.permute.xlu1 %1962  ;;  %v1961_v54 = vpop.permute.xlu0 %1960 }
 0x36e   : >> { %v2003_v45 = vmul.f32 %v5664_v19, %v1963_v49  ;;  %v2002_v52 = vmul.f32 %v5670_v13, %v1961_v54  ;;  %v1863_v54 = vsub.f32 1.0, %v5682_v53 }
 0x36f   : >> { %1978 = vrot.lane.b32.xlu1 %v4723_v47, %s4789_s14  ;;  %v1853_v47 = vsub.f32 1.0, %v5642_v17 }
 0x370   : >> { %1976 = vrot.lane.b32.xlu0 %v4727_v46, %s4789_s14  ;;  %v1997_v46 = vmul.f32 %v5642_v17, %v1951_v42 }
 0x371   : >> { %v1967_v24 = vpop.permute.xlu1 %1966  ;;  %v1965_v55 = vpop.permute.xlu0 %1964 }
 0x372   : >> { %v2004_v49 = vmul.f32 %v5678_v4, %v1965_v55 }
 0x375   : >> { %v5772_v58 = vpop.permute.xlu1 %1970  ;;  %v5774_v1 = vpop.permute.xlu0 %1968 }
 0x379   : >> { %v5776_v5 = vpop.permute.xlu1 %1974  ;;  %v5780_v62 = vpop.permute.xlu0 %1972 }
 0x3bd   : >> { %v1887_v22 = vpop.permute.xlu1 %1886 }
 0x3be   : >> { %v1933_v59 = vmul.f32 %v1887_v22, %v1853_v47 }
 0x3c0   : >> { %v2013_v21 = vadd.f32 %v1997_v46, %v1933_v59 }
 0x3c1   : >> { %v1891_v7 = vpop.permute.xlu1 %1890 }
 0x3c2   : >> { %v1935_v63 = vmul.f32 %v1891_v7, %v1855_v57  ;;  %v1885_v32 = vpop.permute.xlu0 %1884  ;;  %2046 = vrot.lane.b32.xlu1 %v2013_v21, %s4791_s18  ;;  %v1860_v21 = vsub.f32 1.0, %v5678_v4  ;;  %v2005_v57 = vmul.f32 %v5674_v25, %v1967_v24  ;;  %v2006_v4 = vmul.f32 %v5686_v23, %v5774_v1 }
 0x3c3   : >> { %v1932_v34 = vmul.f32 %v1885_v32, %v1852_v12  ;;  %v1862_v32 = vsub.f32 1.0, %v5686_v23  ;;  %v2008_v23 = vmul.f32 %v5694_v60, %v5780_v62 }
 0x3c4   : >> { %v2015_v35 = vadd.f32 %v1999_v2, %v1935_v63 }
 0x3c5   : >> { %v2012_v17 = vadd.f32 %v1996_v33, %v1932_v34  ;;  %v2007_v33 = vmul.f32 %v5682_v53, %v5772_v58  ;;  %v2009_v53 = vmul.f32 %v5690_v20, %v5776_v5  ;;  %v1866_v5 = vsub.f32 1.0, %v5702_v18 }
 0x3c6   : >> { %v1889_v6 = vpop.permute.xlu0 %1888  ;;  %2050 = vrot.lane.b32.xlu1 %v2015_v35, %s4791_s18  ;;  %v1865_v35 = vsub.f32 1.0, %v5690_v20  ;;  %v1867_v20 = vsub.f32 1.0, %v5698_v61 }
 0x3c7   : >> { %v1934_v37 = vmul.f32 %v1889_v6, %v1854_v3  ;;  %2044 = vrot.lane.b32.xlu0 %v2012_v17, %s4791_s18  ;;  %v1864_v6 = vsub.f32 1.0, %v5694_v60 }
 0x3c9   : >> { %v2014_v38 = vadd.f32 %v1998_v36, %v1934_v37  ;;  %v1895_v39 = vpop.permute.xlu1 %1894 }
 0x3ca   : >> { %v1937_v14 = vmul.f32 %v1895_v39, %v1857_v16  ;;  %v1893_v40 = vpop.permute.xlu0 %1892 }
 0x3cb   : >> { %v1936_v15 = vmul.f32 %v1893_v40, %v1856_v9  ;;  %2048 = vrot.lane.b32.xlu0 %v2014_v38, %s4791_s18 }
 0x3cc   : >> { %v2017_v50 = vadd.f32 %v2001_v56, %v1937_v14 }
 0x3cd   : >> { %v2016_v42 = vadd.f32 %v2000_v41, %v1936_v15  ;;  %v1899_v43 = vpop.permute.xlu1 %1898 }
 0x3ce   : >> { %v1939_v47 = vmul.f32 %v1899_v43, %v1859_v51  ;;  %v1897_v22 = vpop.permute.xlu0 %1896  ;;  %2054 = vrot.lane.b32.xlu1 %v2017_v50, %s4791_s18 }
 0x3cf   : >> { %v1938_v11 = vmul.f32 %v1897_v22, %v1858_v44  ;;  %2052 = vrot.lane.b32.xlu0 %v2016_v42, %s4791_s18 }
 0x3d0   : >> { %v2019_v0 = vadd.f32 %v2003_v45, %v1939_v47 }
 0x3d1   : >> { %v2018_v46 = vadd.f32 %v2002_v52, %v1938_v11  ;;  %v1903_v59 = vpop.permute.xlu1 %1902 }
 0x3d2   : >> { %v1941_v7 = vmul.f32 %v1903_v59, %v1861_v48  ;;  %v1901_v19 = vpop.permute.xlu0 %1900  ;;  %2058 = vrot.lane.b32.xlu1 %v2019_v0, %s4791_s18 }
 0x3d3   : >> { %v1940_v12 = vmul.f32 %v1901_v19, %v1860_v21  ;;  %2056 = vrot.lane.b32.xlu0 %v2018_v46, %s4791_s18 }
 0x3d4   : >> { %v2021_v13 = vadd.f32 %v2005_v57, %v1941_v7 }
 0x3d5   : >> { %v2020_v2 = vadd.f32 %v2004_v49, %v1940_v12  ;;  %v1907_v63 = vpop.permute.xlu1 %1906 }
 0x3d6   : >> { %v1943_v25 = vmul.f32 %v1907_v63, %v1863_v54  ;;  %v1905_v24 = vpop.permute.xlu0 %1904  ;;  %2062 = vrot.lane.b32.xlu1 %v2021_v13, %s4791_s18 }
 0x3d7   : >> { %v1942_v55 = vmul.f32 %v1905_v24, %v1862_v32  ;;  %2060 = vrot.lane.b32.xlu0 %v2020_v2, %s4791_s18 }
 0x3d8   : >> { %v2023_v34 = vadd.f32 %v2007_v33, %v1943_v25 }
 0x3d9   : >> { %v2022_v17 = vadd.f32 %v2006_v4, %v1942_v55  ;;  %v1911_v3 = vpop.permute.xlu1 %1910 }
 0x3da   : >> { %v1945_v58 = vmul.f32 %v1911_v3, %v1865_v35  ;;  %v1909_v36 = vpop.permute.xlu0 %1908  ;;  %2066 = vrot.lane.b32.xlu1 %v2023_v34, %s4791_s18 }
 0x3db   : >> { %v1944_v1 = vmul.f32 %v1909_v36, %v1864_v6  ;;  %2064 = vrot.lane.b32.xlu0 %v2022_v17, %s4791_s18 }
 0x3dc   : >> { %v2025_v37 = vadd.f32 %v2009_v53, %v1945_v58 }
 0x3dd   : >> { %v2024_v16 = vadd.f32 %v2008_v23, %v1944_v1  ;;  %v1915_v38 = vpop.permute.xlu1 %1914 }
 0x3de   : >> { %v1913_v39 = vpop.permute.xlu0 %1912  ;;  %2070 = vrot.lane.b32.xlu1 %v2025_v37, %s4791_s18  ;;  %v1947_v56 = vmul.f32 %v1915_v38, %v1867_v20 }
 0x3df   : >> { %2068 = vrot.lane.b32.xlu0 %v2024_v16, %s4791_s18  ;;  %v1946_v14 = vmul.f32 %v1913_v39, %v1866_v5 }
 0x3e1   : >> { %v1979_v9 = vpop.permute.xlu1 %1978 }
 0x3e2   : >> { %v2011_v60 = vmul.f32 %v5698_v61, %v1979_v9  ;;  %v1977_v62 = vpop.permute.xlu0 %1976 }
 0x3e3   : >> { %v2010_v40 = vmul.f32 %v5702_v18, %v1977_v62 }
 0x3e4   : >> { %v2027_v41 = vadd.f32 %v2011_v60, %v1947_v56 }
 0x3e5   : >> { %v2026_v15 = vadd.f32 %v2010_v40, %v1946_v14 }
 0x3e6   : >> { %2074 = vrot.lane.b32.xlu1 %v2027_v41, %s4791_s18 }
 0x3e7   : >> { %2072 = vrot.lane.b32.xlu0 %v2026_v15, %s4791_s18  ;;  %s3717_s18 = scalar_lea.sflag (%p5869_p3), [#allocation5], %s5176_s15 }
 0x3eb   : > { %2259 = vrot.lane.b32.xlu0 (%p5869_p3), %v5514_v10, %s4792_s0  ;;  %s4561_s0 = sshll.u32 (%p5869_p3), %s4794_s20, 4  ;;  %s4562_s0 = int_to_ptr.vmem [resolvable:$false] %s4561_s0 }
 0x3ec   : > { %p4564_p7 = scmp.lt.s32.totalorder (%p5869_p3), %s7221_s13, %s4562_s0 }
 0x434   : >> { %v2047_v50 = vpop.permute.xlu1 %2046  }
 0x435   : >> { %2094 = vst.msk [vmem:[%s5834_s19 + $0x8] sm:$0xff] %vm1173_vm2, %v2047_v50  ;;  %v7330_v33 = vmov %v2047_v50  ;;  %2111 = vst.msk [vmem:[%s5189_s10 + $0x8] sm:$0xff] (%p5869_p3), %vm1173_vm2, %v2047_v50 }
 0x438   : >> { %v2051_v61 = vpop.permute.xlu1 %2050  }
 0x439   : >> { %2096 = vst.msk [vmem:[%s5834_s19 + $0x18] sm:$0xff] %vm1173_vm2, %v2051_v61  ;;  %v2045_v18 = vpop.permute.xlu0 %2044   ;;  %v7328_v35 = vmov %v2051_v61  ;;  %2113 = vst.msk [vmem:[%s5189_s10 + $0x18] sm:$0xff] (%p5869_p3), %vm1173_vm2, %v2051_v61 }
 0x43a   : >> { %2093 = vst.msk [vmem:[%s5834_s19] sm:$0xff] %vm1173_vm2, %v2045_v18  ;;  %v7331_v32 = vmov %v2045_v18  ;;  %2110 = vst.msk [vmem:[%s5189_s10] sm:$0xff] (%p5869_p3), %vm1173_vm2, %v2045_v18 }
 0x43d   : >> { %v2049_v51 = vpop.permute.xlu0 %2048  }
 0x43e   : >> { %2095 = vst.msk [vmem:[%s5834_s19 + $0x10] sm:$0xff] %vm1173_vm2, %v2049_v51  ;;  %v7329_v34 = vmov %v2049_v51  ;;  %2112 = vst.msk [vmem:[%s5189_s10 + $0x10] sm:$0xff] (%p5869_p3), %vm1173_vm2, %v2049_v51 }
 0x440   : >> { %v2055_v22 = vpop.permute.xlu1 %2054  }
 0x441   : >> { %2098 = vst.msk [vmem:[%s5834_s19 + $0x28] sm:$0xff] %vm1173_vm2, %v2055_v22  ;;  %v2053_v52 = vpop.permute.xlu0 %2052   ;;  %v7326_v37 = vmov %v2055_v22  ;;  %2115 = vst.msk [vmem:[%s5189_s10 + $0x28] sm:$0xff] (%p5869_p3), %vm1173_vm2, %v2055_v22 }
 0x442   : >> { %2097 = vst.msk [vmem:[%s5834_s19 + $0x20] sm:$0xff] %vm1173_vm2, %v2053_v52  ;;  %v7327_v36 = vmov %v2053_v52  ;;  %2114 = vst.msk [vmem:[%s5189_s10 + $0x20] sm:$0xff] (%p5869_p3), %vm1173_vm2, %v2053_v52 }
 0x444   : >> { %v2059_v11 = vpop.permute.xlu1 %2058  }
 0x445   : >> { %2100 = vst.msk [vmem:[%s5834_s19 + $0x38] sm:$0xff] %vm1173_vm2, %v2059_v11  ;;  %v2057_v0 = vpop.permute.xlu0 %2056   ;;  %v7324_v39 = vmov %v2059_v11  ;;  %2117 = vst.msk [vmem:[%s5189_s10 + $0x38] sm:$0xff] (%p5869_p3), %vm1173_vm2, %v2059_v11 }
 0x446   : >> { %2099 = vst.msk [vmem:[%s5834_s19 + $0x30] sm:$0xff] %vm1173_vm2, %v2057_v0  ;;  %v7325_v38 = vmov %v2057_v0  ;;  %2116 = vst.msk [vmem:[%s5189_s10 + $0x30] sm:$0xff] (%p5869_p3), %vm1173_vm2, %v2057_v0 }
 0x448   : >> { %v2063_v48 = vpop.permute.xlu1 %2062  }
 0x449   : >> { %2102 = vst.msk [vmem:[%s5834_s19 + $0x48] sm:$0xff] %vm1173_vm2, %v2063_v48  ;;  %v2061_v59 = vpop.permute.xlu0 %2060   ;;  %v7322_v41 = vmov %v2063_v48  ;;  %2119 = vst.msk [vmem:[%s5189_s10 + $0x48] sm:$0xff] (%p5869_p3), %vm1173_vm2, %v2063_v48 }
 0x44a   : >> { %2101 = vst.msk [vmem:[%s5834_s19 + $0x40] sm:$0xff] %vm1173_vm2, %v2061_v59  ;;  %v7323_v40 = vmov %v2061_v59  ;;  %2118 = vst.msk [vmem:[%s5189_s10 + $0x40] sm:$0xff] (%p5869_p3), %vm1173_vm2, %v2061_v59 }
 0x44c   : >> { %v2067_v21 = vpop.permute.xlu1 %2066  }
 0x44d   : >> { %2104 = vst.msk [vmem:[%s5834_s19 + $0x58] sm:$0xff] %vm1173_vm2, %v2067_v21  ;;  %v2065_v57 = vpop.permute.xlu0 %2064   ;;  %v7320_v43 = vmov %v2067_v21  ;;  %2121 = vst.msk [vmem:[%s5189_s10 + $0x58] sm:$0xff] (%p5869_p3), %vm1173_vm2, %v2067_v21 }
 0x44e   : >> { %2103 = vst.msk [vmem:[%s5834_s19 + $0x50] sm:$0xff] %vm1173_vm2, %v2065_v57  ;;  %v7321_v42 = vmov %v2065_v57  ;;  %2120 = vst.msk [vmem:[%s5189_s10 + $0x50] sm:$0xff] (%p5869_p3), %vm1173_vm2, %v2065_v57 }
 0x450   : >> { %v2071_v7 = vpop.permute.xlu1 %2070  }
 0x451   : >> { %2106 = vst.msk [vmem:[%s5834_s19 + $0x68] sm:$0xff] %vm1173_vm2, %v2071_v7  ;;  %v2069_v19 = vpop.permute.xlu0 %2068   ;;  %v7318_v45 = vmov %v2071_v7  ;;  %2123 = vst.msk [vmem:[%s5189_s10 + $0x68] sm:$0xff] (%p5869_p3), %vm1173_vm2, %v2071_v7 }
 0x452   : >> { %2105 = vst.msk [vmem:[%s5834_s19 + $0x60] sm:$0xff] %vm1173_vm2, %v2069_v19  ;;  %v7319_v44 = vmov %v2069_v19  ;;  %2122 = vst.msk [vmem:[%s5189_s10 + $0x60] sm:$0xff] (%p5869_p3), %vm1173_vm2, %v2069_v19 }
 0x454   : > { %923 = sbr.rel (!%p5869_p3) target bundleno = 140 (0x8c), region = 146 }
 0x458   : >> { %v2075_v49 = vpop.permute.xlu1 %2074  }
 0x459   : >> { %2108 = vst.msk [vmem:[%s5834_s19 + $0x78] sm:$0xff] %vm1173_vm2, %v2075_v49  ;;  %v2073_v12 = vpop.permute.xlu0 %2072   ;;  %v7316_v47 = vmov %v2075_v49  ;;  %2125 = vst.msk [vmem:[%s5189_s10 + $0x78] sm:$0xff] (%p5869_p3), %vm1173_vm2, %v2075_v49 }
 0x45a   : >> { %2107 = vst.msk [vmem:[%s5834_s19 + $0x70] sm:$0xff] %vm1173_vm2, %v2073_v12  ;;  %v7317_v46 = vmov %v2073_v12  ;;  %2124 = vst.msk [vmem:[%s5189_s10 + $0x70] sm:$0xff] (%p5869_p3), %vm1173_vm2, %v2073_v12  ;;  %s4793_s10 = smov (%p5869_p3), 64   ;;  %s4557_s19 = scalar_lea.vmem (%p5869_p3), %s7221_s13, 128 }
 0x45b   : > { %p4558_p4 = scmp.ne.s32.totalorder %s7221_s13, %s4557_s19 }
 0x45d   : > { %v5942_v28 = vpop.permute.xlu0 %2259  ;;  %p4559_p5 = pnand %p4558_p4, %p4890_p8 }
 0x45f   : > { %p4560_p6 = pneg %p4559_p5 }
 0x461   : > { %v2127_v26 = vld [vmem:[#allocation2 + $0x8] sm:$0xff]  ;;  %v2126_v27 = vld [vmem:[#allocation2] sm:$0xff]  ;;  %v2128_v29 = vld [vmem:[#allocation2 + $0x10] sm:$0xff] }
 0x462   : > { %v2136_v30 = vld [vmem:[#allocation2 + $0x50] sm:$0xff]  ;;  %v2263_v42 = vmul.f32 %v5942_v28, %v2127_v26  ;;  %v2262_v43 = vmul.f32 %v5942_v28, %v2126_v27  ;;  %v2264_v47 = vmul.f32 %v5942_v28, %v2128_v29  ;;  %v2129_v10 = vld [vmem:[#allocation2 + $0x18] sm:$0xff]  ;;  %v2138_v13 = vld [vmem:[#allocation2 + $0x60] sm:$0xff] }
 0x463   : > { %v2272_v46 = vmul.f32 %v5942_v28, %v2136_v30  ;;  %v2265_v63 = vmul.f32 %v5942_v28, %v2129_v10  ;;  %v2274_v32 = vmul.f32 %v5942_v28, %v2138_v13  ;;  %v2130_v33 = vld [vmem:[#allocation2 + $0x20] sm:$0xff]  ;;  %v2140_v25 = vld [vmem:[#allocation2 + $0x70] sm:$0xff]  ;;  %v2131_v35 = vld [vmem:[#allocation2 + $0x28] sm:$0xff] }
 0x464   : > { %v2393_v44 = vsel %vm1173_vm2, %v2263_v42, 0.0  ;;  %v2390_v45 = vsel %vm1173_vm2, %v2262_v43, 0.0  ;;  %v2396_v54 = vsel %vm1173_vm2, %v2264_v47, 0.0  ;;  %v2266_v55 = vmul.f32 %v5942_v28, %v2130_v33  ;;  %v2142_v17 = vld [vmem:[#allocation2 + $0x80] sm:$0xff]  ;;  %v2132_v36 = vld [vmem:[#allocation2 + $0x30] sm:$0xff]  ;;  %v2133_v39 = vld [vmem:[#allocation2 + $0x38] sm:$0xff] }
 0x465   : > { %2394 = vadd.xlane.f32.xlu1 %v2393_v44  ;;  %2391 = vadd.xlane.f32.xlu0 %v2390_v45  ;;  %v2420_v2 = vsel %vm1173_vm2, %v2272_v46, 0.0  ;;  %v2399_v24 = vsel %vm1173_vm2, %v2265_v63, 0.0  ;;  %v2426_v4 = vsel %vm1173_vm2, %v2274_v32, 0.0  ;;  %v2276_v34 = vmul.f32 %v5942_v28, %v2140_v25  ;;  %v2144_v23 = vld [vmem:[#allocation2 + $0x90] sm:$0xff]  ;;  %v2146_v20 = vld [vmem:[#allocation2 + $0xa0] sm:$0xff]  ;;  %v2135_v61 = vld [vmem:[#allocation2 + $0x48] sm:$0xff] }
 0x466   : > { %v2402_v3 = vsel %vm1173_vm2, %v2266_v55, 0.0  ;;  %v2267_v53 = vmul.f32 %v5942_v28, %v2131_v35  ;;  %v2278_v58 = vmul.f32 %v5942_v28, %v2142_v17  ;;  %v2268_v16 = vmul.f32 %v5942_v28, %v2132_v36  ;;  %v2134_v62 = vld [vmem:[#allocation2 + $0x40] sm:$0xff]  ;;  %v2148_v14 = vld [vmem:[#allocation2 + $0xb0] sm:$0xff]  ;;  %v2137_v0 = vld [vmem:[#allocation2 + $0x58] sm:$0xff] }
 0x467   : > { %v2432_v6 = vsel %vm1173_vm2, %v2276_v34, 0.0  ;;  %v2280_v38 = vmul.f32 %v5942_v28, %v2144_v23  ;;  %v2269_v56 = vmul.f32 %v5942_v28, %v2133_v39  ;;  %v2282_v60 = vmul.f32 %v5942_v28, %v2146_v20  ;;  %v2150_v18 = vld [vmem:[#allocation2 + $0xc0] sm:$0xff]  ;;  %v2152_v48 = vld [vmem:[#allocation2 + $0xd0] sm:$0xff]  ;;  %v2139_v19 = vld [vmem:[#allocation2 + $0x68] sm:$0xff] }
 0x468   : > { %v2405_v1 = vsel %vm1173_vm2, %v2267_v53, 0.0  ;;  %v2438_v37 = vsel %vm1173_vm2, %v2278_v58, 0.0  ;;  %v2408_v5 = vsel %vm1173_vm2, %v2268_v16, 0.0  ;;  %v2270_v15 = vmul.f32 %v5942_v28, %v2134_v62  ;;  %v2154_v49 = vld [vmem:[#allocation2 + $0xe0] sm:$0xff]  ;;  %v2141_v30 = vld [vmem:[#allocation2 + $0x78] sm:$0xff]  ;;  %v2156_v42 = vld [vmem:[#allocation2 + $0xf0] sm:$0xff] }
 0x469   : > { %2397 = vadd.xlane.f32.xlu1 %v2396_v54  ;;  %2421 = vadd.xlane.f32.xlu0 %v2420_v2  ;;  %v2444_v9 = vsel %vm1173_vm2, %v2280_v38, 0.0  ;;  %v2411_v40 = vsel %vm1173_vm2, %v2269_v56, 0.0  ;;  %v2450_v41 = vsel %vm1173_vm2, %v2282_v60, 0.0  ;;  %v2284_v50 = vmul.f32 %v5942_v28, %v2148_v14  ;;  %v2143_v46 = vld [vmem:[#allocation2 + $0x88] sm:$0xff]  ;;  %v2158_v10 = vld [vmem:[#allocation2 + $0x100] sm:$0xff]  ;;  %v2145_v32 = vld [vmem:[#allocation2 + $0x98] sm:$0xff] }
 0x46a   : > { %v2414_v51 = vsel %vm1173_vm2, %v2270_v15, 0.0  ;;  %v2271_v52 = vmul.f32 %v5942_v28, %v2135_v61  ;;  %v2286_v11 = vmul.f32 %v5942_v28, %v2150_v18  ;;  %v2273_v57 = vmul.f32 %v5942_v28, %v2137_v0  ;;  %v2160_v33 = vld [vmem:[#allocation2 + $0x110] sm:$0xff]  ;;  %v2147_v34 = vld [vmem:[#allocation2 + $0xa8] sm:$0xff]  ;;  %v2162_v35 = vld [vmem:[#allocation2 + $0x120] sm:$0xff] }
 0x46b   : > { %v2456_v22 = vsel %vm1173_vm2, %v2284_v50, 0.0  ;;  %v2288_v7 = vmul.f32 %v5942_v28, %v2152_v48  ;;  %v2275_v27 = vmul.f32 %v5942_v28, %v2139_v19  ;;  %v2290_v29 = vmul.f32 %v5942_v28, %v2154_v49  ;;  %v2149_v58 = vld [vmem:[#allocation2 + $0xb8] sm:$0xff]  ;;  %v2164_v36 = vld [vmem:[#allocation2 + $0x130] sm:$0xff]  ;;  %v2151_v38 = vld [vmem:[#allocation2 + $0xc8] sm:$0xff] }
 0x46c   : > { %v2417_v59 = vsel %vm1173_vm2, %v2271_v52, 0.0  ;;  %v2462_v21 = vsel %vm1173_vm2, %v2286_v11, 0.0  ;;  %v2423_v12 = vsel %vm1173_vm2, %v2273_v57, 0.0  ;;  %v2277_v45 = vmul.f32 %v5942_v28, %v2141_v30  ;;  %v2166_v39 = vld [vmem:[#allocation2 + $0x140] sm:$0xff]  ;;  %v2153_v60 = vld [vmem:[#allocation2 + $0xd8] sm:$0xff]  ;;  %v2168_v62 = vld [vmem:[#allocation2 + $0x150] sm:$0xff] }
 0x46d   : > { %2400 = vadd.xlane.f32.xlu1 %v2399_v24  ;;  %2427 = vadd.xlane.f32.xlu0 %v2426_v4  ;;  %v2468_v26 = vsel %vm1173_vm2, %v2288_v7, 0.0  ;;  %v2429_v43 = vsel %vm1173_vm2, %v2275_v27, 0.0  ;;  %v2474_v44 = vsel %vm1173_vm2, %v2290_v29, 0.0  ;;  %v2292_v47 = vmul.f32 %v5942_v28, %v2156_v42  ;;  %v2155_v50 = vld [vmem:[#allocation2 + $0xe8] sm:$0xff]  ;;  %v2170_v61 = vld [vmem:[#allocation2 + $0x160] sm:$0xff]  ;;  %v2157_v11 = vld [vmem:[#allocation2 + $0xf8] sm:$0xff] }
 0x46e   : > { %v2435_v13 = vsel %vm1173_vm2, %v2277_v45, 0.0  ;;  %v2279_v2 = vmul.f32 %v5942_v28, %v2143_v46  ;;  %v2294_v63 = vmul.f32 %v5942_v28, %v2158_v10  ;;  %v2281_v4 = vmul.f32 %v5942_v28, %v2145_v32  ;;  %v2172_v0 = vld [vmem:[#allocation2 + $0x170] sm:$0xff]  ;;  %v2159_v7 = vld [vmem:[#allocation2 + $0x108] sm:$0xff]  ;;  %v2174_v19 = vld [vmem:[#allocation2 + $0x180] sm:$0xff] }
 0x46f   : > { %v2480_v54 = vsel %vm1173_vm2, %v2292_v47, 0.0  ;;  %v2296_v55 = vmul.f32 %v5942_v28, %v2160_v33  ;;  %v2298_v53 = vmul.f32 %v5942_v28, %v2162_v35  ;;  %v2300_v16 = vmul.f32 %v5942_v28, %v2164_v36  ;;  %v2161_v29 = vld [vmem:[#allocation2 + $0x118] sm:$0xff]  ;;  %v2176_v30 = vld [vmem:[#allocation2 + $0x190] sm:$0xff]  ;;  %v2163_v47 = vld [vmem:[#allocation2 + $0x128] sm:$0xff] }
 0x470   : > { %v2441_v25 = vsel %vm1173_vm2, %v2279_v2, 0.0  ;;  %v2486_v24 = vsel %vm1173_vm2, %v2294_v63, 0.0  ;;  %v2447_v17 = vsel %vm1173_vm2, %v2281_v4, 0.0  ;;  %v2302_v56 = vmul.f32 %v5942_v28, %v2166_v39  ;;  %v2178_v46 = vld [vmem:[#allocation2 + $0x1a0] sm:$0xff]  ;;  %v2165_v63 = vld [vmem:[#allocation2 + $0x138] sm:$0xff]  ;;  %v2180_v32 = vld [vmem:[#allocation2 + $0x1b0] sm:$0xff] }
 0x471   : > { %2403 = vadd.xlane.f32.xlu1 %v2402_v3  ;;  %2433 = vadd.xlane.f32.xlu0 %v2432_v6  ;;  %v2492_v3 = vsel %vm1173_vm2, %v2296_v55, 0.0  ;;  %v2283_v6 = vmul.f32 %v5942_v28, %v2147_v34  ;;  %v2304_v15 = vmul.f32 %v5942_v28, %v2168_v62  ;;  %v2306_v52 = vmul.f32 %v5942_v28, %v2170_v61  ;;  %v2167_v55 = vld [vmem:[#allocation2 + $0x148] sm:$0xff]  ;;  %v2182_v34 = vld [vmem:[#allocation2 + $0x1c0] sm:$0xff] }
 0x472   : > { %v2308_v57 = vmul.f32 %v5942_v28, %v2172_v0  ;;  %v2310_v27 = vmul.f32 %v5942_v28, %v2174_v19  ;;  %v2312_v45 = vmul.f32 %v5942_v28, %v2176_v30  ;;  %v2314_v2 = vmul.f32 %v5942_v28, %v2178_v46 }
 0x473   : > { %v2453_v23 = vsel %vm1173_vm2, %v2283_v6, 0.0  ;;  %v2316_v4 = vmul.f32 %v5942_v28, %v2180_v32  ;;  %v2318_v6 = vmul.f32 %v5942_v28, %v2182_v34 }
 0x475   : > { %2406 = vadd.xlane.f32.xlu1 %v2405_v1  ;;  %2439 = vadd.xlane.f32.xlu0 %v2438_v37  ;;  %v2498_v1 = vsel %vm1173_vm2, %v2298_v53, 0.0  ;;  %v2285_v37 = vmul.f32 %v5942_v28, %v2149_v58  ;;  %v2169_v53 = vld [vmem:[#allocation2 + $0x158] sm:$0xff]  ;;  %v2184_v58 = vld [vmem:[#allocation2 + $0x1d0] sm:$0xff] }
 0x477   : > { %v2459_v20 = vsel %vm1173_vm2, %v2285_v37, 0.0  ;;  %v2320_v37 = vmul.f32 %v5942_v28, %v2184_v58 }
 0x479   : > { %2409 = vadd.xlane.f32.xlu1 %v2408_v5  ;;  %2445 = vadd.xlane.f32.xlu0 %v2444_v9  ;;  %v2504_v5 = vsel %vm1173_vm2, %v2300_v16, 0.0  ;;  %v2287_v9 = vmul.f32 %v5942_v28, %v2151_v38  ;;  %v2171_v16 = vld [vmem:[#allocation2 + $0x168] sm:$0xff]  ;;  %v2186_v38 = vld [vmem:[#allocation2 + $0x1e0] sm:$0xff] }
 0x47b   : > { %v2465_v14 = vsel %vm1173_vm2, %v2287_v9, 0.0  ;;  %v2322_v9 = vmul.f32 %v5942_v28, %v2186_v38  ;;  %v2196_v38 = vld [vmem:[#allocation2 + $0x230] sm:$0xff] }
 0x47d   : > { %2412 = vadd.xlane.f32.xlu1 %v2411_v40  ;;  %2451 = vadd.xlane.f32.xlu0 %v2450_v41  ;;  %v2510_v40 = vsel %vm1173_vm2, %v2302_v56, 0.0  ;;  %v2289_v41 = vmul.f32 %v5942_v28, %v2153_v60  ;;  %v2173_v56 = vld [vmem:[#allocation2 + $0x178] sm:$0xff]  ;;  %v2188_v60 = vld [vmem:[#allocation2 + $0x1f0] sm:$0xff] }
 0x47f   : > { %v2471_v18 = vsel %vm1173_vm2, %v2289_v41, 0.0  ;;  %v2324_v41 = vmul.f32 %v5942_v28, %v2188_v60 }
 0x481   : > { %2415 = vadd.xlane.f32.xlu1 %v2414_v51  ;;  %2457 = vadd.xlane.f32.xlu0 %v2456_v22  ;;  %v2516_v51 = vsel %vm1173_vm2, %v2304_v15, 0.0  ;;  %v2291_v22 = vmul.f32 %v5942_v28, %v2155_v50  ;;  %v2175_v15 = vld [vmem:[#allocation2 + $0x188] sm:$0xff]  ;;  %v2190_v50 = vld [vmem:[#allocation2 + $0x200] sm:$0xff] }
 0x483   : > { %v2477_v48 = vsel %vm1173_vm2, %v2291_v22, 0.0  ;;  %v2326_v22 = vmul.f32 %v5942_v28, %v2190_v50 }
 0x485   : > { %2418 = vadd.xlane.f32.xlu1 %v2417_v59  ;;  %2463 = vadd.xlane.f32.xlu0 %v2462_v21  ;;  %v2522_v59 = vsel %vm1173_vm2, %v2306_v52, 0.0  ;;  %v2293_v21 = vmul.f32 %v5942_v28, %v2157_v11  ;;  %v2177_v52 = vld [vmem:[#allocation2 + $0x198] sm:$0xff]  ;;  %v2582_v0 = vsel %vm1173_vm2, %v2326_v22, 0.0 }
 0x487   : > { %v2483_v49 = vsel %vm1173_vm2, %v2293_v21, 0.0 }
 0x489   : > { %2424 = vadd.xlane.f32.xlu1 %v2423_v12  ;;  %2469 = vadd.xlane.f32.xlu0 %v2468_v26  ;;  %v2528_v12 = vsel %vm1173_vm2, %v2308_v57, 0.0  ;;  %v2295_v26 = vmul.f32 %v5942_v28, %v2159_v7  ;;  %v2181_v7 = vld [vmem:[#allocation2 + $0x1b8] sm:$0xff] }
 0x48b   : > { %v2489_v42 = vsel %vm1173_vm2, %v2295_v26, 0.0 }
 0x48d   : > { %2430 = vadd.xlane.f32.xlu1 %v2429_v43  ;;  %2475 = vadd.xlane.f32.xlu0 %v2474_v44  ;;  %v2534_v43 = vsel %vm1173_vm2, %v2310_v27, 0.0  ;;  %v2297_v44 = vmul.f32 %v5942_v28, %v2161_v29  ;;  %v2185_v29 = vld [vmem:[#allocation2 + $0x1d8] sm:$0xff] }
 0x48f   : > { %v2495_v10 = vsel %vm1173_vm2, %v2297_v44, 0.0 }
 0x491   : > { %2436 = vadd.xlane.f32.xlu1 %v2435_v13  ;;  %2481 = vadd.xlane.f32.xlu0 %v2480_v54  ;;  %v2540_v13 = vsel %vm1173_vm2, %v2312_v45, 0.0  ;;  %v2299_v54 = vmul.f32 %v5942_v28, %v2163_v47  ;;  %v2189_v47 = vld [vmem:[#allocation2 + $0x1f8] sm:$0xff] }
 0x493   : > { %v2501_v33 = vsel %vm1173_vm2, %v2299_v54, 0.0 }
 0x495   : > { %2442 = vadd.xlane.f32.xlu1 %v2441_v25  ;;  %2487 = vadd.xlane.f32.xlu0 %v2486_v24  ;;  %v2546_v25 = vsel %vm1173_vm2, %v2314_v2, 0.0  ;;  %v2301_v24 = vmul.f32 %v5942_v28, %v2165_v63  ;;  %v2192_v63 = vld [vmem:[#allocation2 + $0x210] sm:$0xff] }
 0x497   : > { %v2507_v35 = vsel %vm1173_vm2, %v2301_v24, 0.0  ;;  %v2193_v24 = vld [vmem:[#allocation2 + $0x218] sm:$0xff] }
 0x499   : > { %2448 = vadd.xlane.f32.xlu1 %v2447_v17  ;;  %2493 = vadd.xlane.f32.xlu0 %v2492_v3  ;;  %v2552_v17 = vsel %vm1173_vm2, %v2316_v4, 0.0  ;;  %v2303_v3 = vmul.f32 %v5942_v28, %v2167_v55 }
 0x49b   : > { %v2513_v36 = vsel %vm1173_vm2, %v2303_v3, 0.0 }
 0x49d   : > { %2454 = vadd.xlane.f32.xlu1 %v2453_v23  ;;  %2499 = vadd.xlane.f32.xlu0 %v2498_v1  ;;  %v2558_v23 = vsel %vm1173_vm2, %v2318_v6, 0.0  ;;  %v2305_v1 = vmul.f32 %v5942_v28, %v2169_v53 }
 0x49f   : > { %v2519_v39 = vsel %vm1173_vm2, %v2305_v1, 0.0 }
 0x4a1   : > { %2460 = vadd.xlane.f32.xlu1 %v2459_v20  ;;  %2505 = vadd.xlane.f32.xlu0 %v2504_v5  ;;  %v2564_v20 = vsel %vm1173_vm2, %v2320_v37, 0.0  ;;  %v2307_v5 = vmul.f32 %v5942_v28, %v2171_v16 }
 0x4a3   : > { %v2525_v62 = vsel %vm1173_vm2, %v2307_v5, 0.0  ;;  %v2198_v5 = vld [vmem:[#allocation2 + $0x240] sm:$0xff] }
 0x4a4   : > { %v2334_v60 = vmul.f32 %v5942_v28, %v2198_v5  ;;  %v2223_v5 = vld [vmem:[#allocation2 + $0x308] sm:$0xff] }
 0x4a5   : > { %2466 = vadd.xlane.f32.xlu1 %v2465_v14  ;;  %2511 = vadd.xlane.f32.xlu0 %v2510_v40  ;;  %v2570_v14 = vsel %vm1173_vm2, %v2322_v9, 0.0  ;;  %v2309_v40 = vmul.f32 %v5942_v28, %v2173_v56  ;;  %v2332_v56 = vmul.f32 %v5942_v28, %v2196_v38 }
 0x4a7   : > { %v2531_v61 = vsel %vm1173_vm2, %v2309_v40, 0.0 }
 0x4a9   : > { %2472 = vadd.xlane.f32.xlu1 %v2471_v18  ;;  %2517 = vadd.xlane.f32.xlu0 %v2516_v51  ;;  %v2576_v18 = vsel %vm1173_vm2, %v2324_v41, 0.0  ;;  %v2311_v51 = vmul.f32 %v5942_v28, %v2175_v15  ;;  %v2224_v41 = vld [vmem:[#allocation2 + $0x310] sm:$0xff]  ;;  %v2600_v15 = vsel %vm1173_vm2, %v2332_v56, 0.0 }
 0x4ab   : > { %v2537_v11 = vsel %vm1173_vm2, %v2311_v51, 0.0  ;;  %v2199_v51 = vld [vmem:[#allocation2 + $0x248] sm:$0xff] }
 0x4ad   : > { %2478 = vadd.xlane.f32.xlu1 %v2477_v48  ;;  %2523 = vadd.xlane.f32.xlu0 %v2522_v59  ;;  %v2313_v48 = vmul.f32 %v5942_v28, %v2177_v52  ;;  %v2179_v59 = vld [vmem:[#allocation2 + $0x1a8] sm:$0xff] }
 0x4ae   : > { %v2315_v57 = vmul.f32 %v5942_v28, %v2179_v59 }
 0x4af   : > { %v2543_v21 = vsel %vm1173_vm2, %v2313_v48, 0.0  ;;  %v2335_v48 = vmul.f32 %v5942_v28, %v2199_v51 }
 0x4b0   : > { %v2549_v19 = vsel %vm1173_vm2, %v2315_v57, 0.0  ;;  %v2206_v57 = vld [vmem:[#allocation2 + $0x280] sm:$0xff] }
 0x4b1   : > { %2484 = vadd.xlane.f32.xlu1 %v2483_v49  ;;  %2529 = vadd.xlane.f32.xlu0 %v2528_v12  ;;  %v2317_v49 = vmul.f32 %v5942_v28, %v2181_v7  ;;  %v2183_v12 = vld [vmem:[#allocation2 + $0x1c8] sm:$0xff] }
 0x4b2   : > { %v2319_v27 = vmul.f32 %v5942_v28, %v2183_v12  ;;  %v2609_v12 = vsel %vm1173_vm2, %v2335_v48, 0.0 }
 0x4b3   : > { %v2555_v26 = vsel %vm1173_vm2, %v2317_v49, 0.0  ;;  %v2225_v49 = vld [vmem:[#allocation2 + $0x318] sm:$0xff] }
 0x4b4   : > { %v2561_v30 = vsel %vm1173_vm2, %v2319_v27, 0.0 }
 0x4b5   : > { %2490 = vadd.xlane.f32.xlu1 %v2489_v42  ;;  %2535 = vadd.xlane.f32.xlu0 %v2534_v43  ;;  %v2321_v42 = vmul.f32 %v5942_v28, %v2185_v29  ;;  %v2187_v43 = vld [vmem:[#allocation2 + $0x1e8] sm:$0xff]  ;;  %v2361_v29 = vmul.f32 %v5942_v28, %v2225_v49 }
 0x4b6   : > { %v2323_v45 = vmul.f32 %v5942_v28, %v2187_v43 }
 0x4b7   : > { %v2567_v44 = vsel %vm1173_vm2, %v2321_v42, 0.0 }
 0x4b8   : > { %v2573_v46 = vsel %vm1173_vm2, %v2323_v45, 0.0 }
 0x4b9   : > { %2496 = vadd.xlane.f32.xlu1 %v2495_v10  ;;  %2541 = vadd.xlane.f32.xlu0 %v2540_v13  ;;  %v2325_v10 = vmul.f32 %v5942_v28, %v2189_v47  ;;  %v2191_v13 = vld [vmem:[#allocation2 + $0x208] sm:$0xff] }
 0x4ba   : > { %v2327_v2 = vmul.f32 %v5942_v28, %v2191_v13  ;;  %v2208_v13 = vld [vmem:[#allocation2 + $0x290] sm:$0xff] }
 0x4bb   : > { %v2579_v54 = vsel %vm1173_vm2, %v2325_v10, 0.0 }
 0x4bd   : > { %2502 = vadd.xlane.f32.xlu1 %v2501_v33  ;;  %2547 = vadd.xlane.f32.xlu0 %v2546_v25  ;;  %v2585_v25 = vsel %vm1173_vm2, %v2327_v2, 0.0 }
 0x4c1   : > { %2508 = vadd.xlane.f32.xlu1 %v2507_v35  ;;  %2553 = vadd.xlane.f32.xlu0 %v2552_v17  ;;  %v2329_v35 = vmul.f32 %v5942_v28, %v2193_v24  ;;  %v2194_v17 = vld [vmem:[#allocation2 + $0x220] sm:$0xff] }
 0x4c2   : > { %v2330_v58 = vmul.f32 %v5942_v28, %v2194_v17 }
 0x4c3   : > { %v2591_v53 = vsel %vm1173_vm2, %v2329_v35, 0.0  ;;  %v2222_v35 = vld [vmem:[#allocation2 + $0x300] sm:$0xff] }
 0x4c4   : > { %v2594_v37 = vsel %vm1173_vm2, %v2330_v58, 0.0  ;;  %v2227_v58 = vld [vmem:[#allocation2 + $0x328] sm:$0xff] }
 0x4c5   : > { %2514 = vadd.xlane.f32.xlu1 %v2513_v36  ;;  %2559 = vadd.xlane.f32.xlu0 %v2558_v23  ;;  %v2195_v36 = vld [vmem:[#allocation2 + $0x228] sm:$0xff]  ;;  %v2363_v38 = vmul.f32 %v5942_v28, %v2227_v58  ;;  %v2230_v58 = vld [vmem:[#allocation2 + $0x340] sm:$0xff] }
 0x4c6   : > { %v2331_v16 = vmul.f32 %v5942_v28, %v2195_v36 }
 0x4c8   : > { %v2597_v9 = vsel %vm1173_vm2, %v2331_v16, 0.0 }
 0x4c9   : > { %2520 = vadd.xlane.f32.xlu1 %v2519_v39  ;;  %2565 = vadd.xlane.f32.xlu0 %v2564_v20 }
 0x4cd   : > { %2526 = vadd.xlane.f32.xlu1 %v2525_v62  ;;  %2571 = vadd.xlane.f32.xlu0 %v2570_v14  ;;  %v2197_v62 = vld [vmem:[#allocation2 + $0x238] sm:$0xff] }
 0x4ce   : > { %v2333_v50 = vmul.f32 %v5942_v28, %v2197_v62 }
 0x4d1   : > { %2532 = vadd.xlane.f32.xlu1 %v2531_v61  ;;  %2577 = vadd.xlane.f32.xlu0 %v2576_v18  ;;  %v2606_v61 = vsel %vm1173_vm2, %v2334_v60, 0.0  ;;  %v2360_v18 = vmul.f32 %v5942_v28, %v2224_v41  ;;  %v2213_v60 = vld [vmem:[#allocation2 + $0x2b8] sm:$0xff]  ;;  %v2359_v41 = vmul.f32 %v5942_v28, %v2223_v5  ;;  %v2226_v5 = vld [vmem:[#allocation2 + $0x320] sm:$0xff] }
 0x4d3   : > { %v2684_v59 = vsel %vm1173_vm2, %v2360_v18, 0.0 }
 0x4d5   : > { %2538 = vadd.xlane.f32.xlu1 %v2537_v11  ;;  %2583 = vadd.xlane.f32.xlu0 %v2582_v0  ;;  %v2239_v11 = vld [vmem:[#allocation2 + $0x388] sm:$0xff]  ;;  %v2603_v0 = vsel %vm1173_vm2, %v2333_v50, 0.0  ;;  %v2349_v50 = vmul.f32 %v5942_v28, %v2213_v60 }
 0x4d9   : > { %2544 = vadd.xlane.f32.xlu1 %v2543_v21  ;;  %v2375_v21 = vmul.f32 %v5942_v28, %v2239_v11  ;;  %v2243_v11 = vld [vmem:[#allocation2 + $0x3a8] sm:$0xff] }
 0x4db   : > { %v2729_v27 = vsel %vm1173_vm2, %v2375_v21, 0.0  ;;  %v2379_v21 = vmul.f32 %v5942_v28, %v2243_v11 }
 0x4dd   : > { %2550 = vadd.xlane.f32.xlu1 %v2549_v19 }
 0x4e1   : > { %2556 = vadd.xlane.f32.xlu1 %v2555_v26  ;;  %v2342_v26 = vmul.f32 %v5942_v28, %v2206_v57  ;;  %v2238_v57 = vld [vmem:[#allocation2 + $0x380] sm:$0xff] }
 0x4e3   : > { %v2630_v45 = vsel %vm1173_vm2, %v2342_v26, 0.0  ;;  %v2229_v26 = vld [vmem:[#allocation2 + $0x338] sm:$0xff] }
 0x4e5   : > { %2562 = vadd.xlane.f32.xlu1 %v2561_v30  ;;  %v2207_v30 = vld [vmem:[#allocation2 + $0x288] sm:$0xff] }
 0x4e6   : > { %v2343_v47 = vmul.f32 %v5942_v28, %v2207_v30  ;;  %v2741_v30 = vsel %vm1173_vm2, %v2379_v21, 0.0  ;;  %v2231_v21 = vld [vmem:[#allocation2 + $0x348] sm:$0xff] }
 0x4e9   : > { %2568 = vadd.xlane.f32.xlu1 %v2567_v44  ;;  %v2211_v44 = vld [vmem:[#allocation2 + $0x2a8] sm:$0xff] }
 0x4ea   : > { %v2347_v10 = vmul.f32 %v5942_v28, %v2211_v44  ;;  %v2365_v44 = vmul.f32 %v5942_v28, %v2229_v26 }
 0x4eb   : > { %2775 = vrot.lane.b32.xlu0 %v5322_v31, %s4793_s10  ;;  %v2328_v31 = vmul.f32 %v5942_v28, %v2192_v63  ;;  %v2241_v63 = vld [vmem:[#allocation2 + $0x398] sm:$0xff]  ;;  %s4563_s10 = scalar_lea.vmem %s4562_s0, 256 }
 0x4ec   : > { %v2645_v24 = vsel %vm1173_vm2, %v2347_v10, 0.0  ;;  %v2200_v10 = vld [vmem:[#allocation2 + $0x250] sm:$0xff]  ;;  %p4565_p10 = scmp.lt.s32.totalorder %s4563_s10, %s4557_s19 }
 0x4ed   : > { %2574 = vadd.xlane.f32.xlu1 %v2573_v46  ;;  %v2588_v34 = vsel %vm1173_vm2, %v2328_v31, 0.0  ;;  %v2687_v46 = vsel %vm1173_vm2, %v2361_v29, 0.0  ;;  %v2344_v31 = vmul.f32 %v5942_v28, %v2208_v13  ;;  %v2374_v29 = vmul.f32 %v5942_v28, %v2238_v57 }
 0x4ee   : > { %p4566_p11 = por %p4565_p10, %p4564_p7 }
 0x4ef   : > { %v2636_v36 = vsel %vm1173_vm2, %v2344_v31, 0.0  ;;  %v2726_v13 = vsel %vm1173_vm2, %v2374_v29, 0.0  ;;  %v2336_v31 = vmul.f32 %v5942_v28, %v2200_v10  ;;  %v2367_v29 = vmul.f32 %v5942_v28, %v2231_v21  ;;  %v2202_v10 = vld [vmem:[#allocation2 + $0x260] sm:$0xff] }
 0x4f0   : > { %p4567_p12 = pnand %p4566_p11, %p4560_p6 }
 0x4f1   : > { %2580 = vadd.xlane.f32.xlu1 %v2579_v54 }
 0x4f2   : > { %v6076_v32 = vpop.xlane.xlu1 %2394  ;;  %v6078_v33 = vpop.xlane.xlu0 %2391 }
 0x4f5   : > { %2586 = vadd.xlane.f32.xlu1 %v2585_v25  ;;  %v2633_v25 = vsel %vm1173_vm2, %v2343_v47, 0.0 }
 0x4f6   : > { %v6082_v4 = vpop.xlane.xlu1 %2397  ;;  %v6084_v55 = vpop.xlane.xlu0 %2421 }
 0x4f9   : > { %2589 = vadd.xlane.f32.xlu1 %v2588_v34  ;;  %v2377_v34 = vmul.f32 %v5942_v28, %v2241_v63 }
 0x4fa   : > { %v6088_v3 = vpop.xlane.xlu1 %2400  ;;  %v6090_v6 = vpop.xlane.xlu0 %2427 }
 0x4fb   : > { %v2735_v16 = vsel %vm1173_vm2, %v2377_v34, 0.0 }
 0x4fd   : > { %2592 = vadd.xlane.f32.xlu1 %v2591_v53 }
 0x4fe   : > { %v6094_v23 = vpop.xlane.xlu1 %2403  ;;  %v6096_v1 = vpop.xlane.xlu0 %2433 }
 0x501   : > { %2595 = vadd.xlane.f32.xlu1 %v2594_v37  ;;  %v2358_v37 = vmul.f32 %v5942_v28, %v2222_v35 }
 0x502   : > { %v6100_v39 = vpop.xlane.xlu1 %2406  ;;  %v6102_v20 = vpop.xlane.xlu0 %2439 }
 0x503   : > { %v2678_v62 = vsel %vm1173_vm2, %v2358_v37, 0.0 }
 0x505   : > { %2598 = vadd.xlane.f32.xlu1 %v2597_v9 }
 0x506   : > { %v6107_v14 = vpop.xlane.xlu1 %2409  ;;  %v6109_v40 = vpop.xlane.xlu0 %2445 }
 0x509   : > { %2601 = vadd.xlane.f32.xlu1 %v2600_v15  ;;  %v2693_v15 = vsel %vm1173_vm2, %v2363_v38, 0.0  ;;  %v2366_v38 = vmul.f32 %v5942_v28, %v2230_v58 }
 0x50a   : > { %v6115_v22 = vpop.xlane.xlu1 %2412  ;;  %2607 = vadd.xlane.f32.xlu0 %v2606_v61  ;;  %v6117_v52 = vpop.xlane.xlu0 %2451  ;;  %v2209_v61 = vld [vmem:[#allocation2 + $0x298] sm:$0xff] }
 0x50b   : > { %v2345_v48 = vmul.f32 %v5942_v28, %v2209_v61  ;;  %v2702_v61 = vsel %vm1173_vm2, %v2366_v38, 0.0 }
 0x50d   : > { %2604 = vadd.xlane.f32.xlu1 %v2603_v0  ;;  %v2681_v0 = vsel %vm1173_vm2, %v2359_v41, 0.0  ;;  %v2201_v41 = vld [vmem:[#allocation2 + $0x258] sm:$0xff] }
 0x50e   : > { %v6123_v7 = vpop.xlane.xlu1 %2415  ;;  %2685 = vadd.xlane.f32.xlu0 %v2684_v59  ;;  %v6125_v19 = vpop.xlane.xlu0 %2457  ;;  %v2651_v59 = vsel %vm1173_vm2, %v2349_v50, 0.0  ;;  %v2362_v50 = vmul.f32 %v5942_v28, %v2226_v5  ;;  %v2337_v11 = vmul.f32 %v5942_v28, %v2201_v41 }
 0x510   : > { %v2690_v57 = vsel %vm1173_vm2, %v2362_v50, 0.0 }
 0x511   : > { %2610 = vadd.xlane.f32.xlu1 %v2609_v12 }
 0x512   : > { %v6131_v42 = vpop.xlane.xlu1 %2418  ;;  %2730 = vadd.xlane.f32.xlu0 %v2729_v27  ;;  %v6133_v43 = vpop.xlane.xlu0 %2463  ;;  %v2639_v27 = vsel %vm1173_vm2, %v2345_v48, 0.0 }
 0x515   : > { %2631 = vadd.xlane.f32.xlu1 %v2630_v45  ;;  %v2210_v45 = vld [vmem:[#allocation2 + $0x2a0] sm:$0xff] }
 0x516   : > { %v6139_v54 = vpop.xlane.xlu1 %2424  ;;  %2688 = vadd.xlane.f32.xlu0 %v2687_v46  ;;  %v6141_v2 = vpop.xlane.xlu0 %2469  ;;  %v2346_v63 = vmul.f32 %v5942_v28, %v2210_v45 }
 0x519   : > { %2634 = vadd.xlane.f32.xlu1 %v2633_v25  ;;  %v2699_v25 = vsel %vm1173_vm2, %v2365_v44, 0.0 }
 0x51a   : > { %v6147_v17 = vpop.xlane.xlu1 %2430  ;;  %2646 = vadd.xlane.f32.xlu0 %v2645_v24  ;;  %v6149_v53 = vpop.xlane.xlu0 %2475  ;;  %v2240_v24 = vld [vmem:[#allocation2 + $0x390] sm:$0xff] }
 0x51b   : > { %v2376_v37 = vmul.f32 %v5942_v28, %v2240_v24  ;;  %v2228_v24 = vld [vmem:[#allocation2 + $0x330] sm:$0xff] }
 0x51c   : > { %v2364_v38 = vmul.f32 %v5942_v28, %v2228_v24  ;;  %v2215_v24 = vld [vmem:[#allocation2 + $0x2c8] sm:$0xff] }
 0x51d   : > { %2637 = vadd.xlane.f32.xlu1 %v2636_v36  ;;  %v2642_v36 = vsel %vm1173_vm2, %v2346_v63, 0.0 }
 0x51e   : > { %v6155_v9 = vpop.xlane.xlu1 %2436  ;;  %2736 = vadd.xlane.f32.xlu0 %v2735_v16  ;;  %v6157_v56 = vpop.xlane.xlu0 %2481  ;;  %v2612_v16 = vsel %vm1173_vm2, %v2336_v31, 0.0  ;;  %v2338_v31 = vmul.f32 %v5942_v28, %v2202_v10  ;;  %v2233_v10 = vld [vmem:[#allocation2 + $0x358] sm:$0xff] }
 0x520   : > { %v2618_v5 = vsel %vm1173_vm2, %v2338_v31, 0.0  ;;  %v2369_v31 = vmul.f32 %v5942_v28, %v2233_v10 }
 0x521   : > { %2679 = vadd.xlane.f32.xlu1 %v2678_v62 }
 0x522   : > { %v6163_v18 = vpop.xlane.xlu1 %2442  ;;  %2694 = vadd.xlane.f32.xlu0 %v2693_v15  ;;  %v6165_v51 = vpop.xlane.xlu0 %2487  ;;  %v2732_v15 = vsel %vm1173_vm2, %v2376_v37, 0.0  ;;  %v2232_v37 = vld [vmem:[#allocation2 + $0x350] sm:$0xff] }
 0x523   : > { %v2368_v41 = vmul.f32 %v5942_v28, %v2232_v37 }
 0x525   : > { %2682 = vadd.xlane.f32.xlu1 %v2681_v0  ;;  %v2212_v0 = vld [vmem:[#allocation2 + $0x2b0] sm:$0xff] }
 0x526   : > { %v6171_v49 = vpop.xlane.xlu1 %2448  ;;  %2652 = vadd.xlane.f32.xlu0 %v2651_v59  ;;  %v6173_v12 = vpop.xlane.xlu0 %2493  ;;  %v2348_v26 = vmul.f32 %v5942_v28, %v2212_v0  ;;  %v2696_v0 = vsel %vm1173_vm2, %v2364_v38, 0.0  ;;  %v2204_v38 = vld [vmem:[#allocation2 + $0x270] sm:$0xff] }
 0x527   : > { %7332 = vst [vmem:[#allocation8_spill] sm:$0xff] %v6173_v12 }
 0x529   : > { %2640 = vadd.xlane.f32.xlu1 %v2639_v27  ;;  %v2615_v27 = vsel %vm1173_vm2, %v2337_v11, 0.0  ;;  %v2203_v11 = vld [vmem:[#allocation2 + $0x268] sm:$0xff] }
 0x52a   : > { %v6179_v47 = vpop.xlane.xlu1 %2454  ;;  %2742 = vadd.xlane.f32.xlu0 %v2741_v30  ;;  %v6181_v46 = vpop.xlane.xlu0 %2499  ;;  %v2242_v30 = vld [vmem:[#allocation2 + $0x3a0] sm:$0xff] }
 0x52b   : > { %7333 = vst [vmem:[#allocation9_spill] sm:$0xff] %v6181_v46  ;;  %v2378_v63 = vmul.f32 %v5942_v28, %v2242_v30 }
 0x52d   : > { %2727 = vadd.xlane.f32.xlu1 %v2726_v13  ;;  %v2648_v13 = vsel %vm1173_vm2, %v2348_v26, 0.0  ;;  %v2339_v26 = vmul.f32 %v5942_v28, %v2203_v11  ;;  %v2340_v11 = vmul.f32 %v5942_v28, %v2204_v38  ;;  %v2205_v38 = vld [vmem:[#allocation2 + $0x278] sm:$0xff] }
 0x52e   : > { %v6187_v34 = vpop.xlane.xlu1 %2460  ;;  %2700 = vadd.xlane.f32.xlu0 %v2699_v25  ;;  %v6189_v35 = vpop.xlane.xlu0 %2505  ;;  %v2705_v25 = vsel %vm1173_vm2, %v2367_v29, 0.0 }
 0x52f   : > { %7334 = vst [vmem:[#allocation10_spill] sm:$0xff] %v6189_v35 }
 0x531   : > { %2643 = vadd.xlane.f32.xlu1 %v2642_v36 }
 0x532   : > { %v6195_v60 = vpop.xlane.xlu1 %2466  ;;  %2613 = vadd.xlane.f32.xlu0 %v2612_v16  ;;  %v6197_v62 = vpop.xlane.xlu0 %2511  ;;  %v2738_v16 = vsel %vm1173_vm2, %v2378_v63, 0.0 }
 0x533   : > { %7335 = vst [vmem:[#allocation11_spill] sm:$0xff] %v6197_v62 }
 0x535   : > { %2733 = vadd.xlane.f32.xlu1 %v2732_v15  ;;  %v2214_v15 = vld [vmem:[#allocation2 + $0x2c0] sm:$0xff] }
 0x536   : > { %v6203_v48 = vpop.xlane.xlu1 %2472  ;;  %2703 = vadd.xlane.f32.xlu0 %v2702_v61  ;;  %v6205_v59 = vpop.xlane.xlu0 %2517  ;;  %v2350_v21 = vmul.f32 %v5942_v28, %v2214_v15  ;;  %v2711_v15 = vsel %vm1173_vm2, %v2369_v31, 0.0 }
 0x537   : > { %7336 = vst [vmem:[#allocation12_spill] sm:$0xff] %v6205_v59 }
 0x539   : > { %2691 = vadd.xlane.f32.xlu1 %v2690_v57  ;;  %v2708_v57 = vsel %vm1173_vm2, %v2368_v41, 0.0  ;;  %v2351_v41 = vmul.f32 %v5942_v28, %v2215_v24 }
 0x53a   : > { %v6211_v44 = vpop.xlane.xlu1 %2478  ;;  %2616 = vadd.xlane.f32.xlu0 %v2615_v27  ;;  %v6213_v45 = vpop.xlane.xlu0 %2523  ;;  %v2244_v27 = vld [vmem:[#allocation2 + $0x3b0] sm:$0xff] }
 0x53b   : > { %7337 = vst [vmem:[#allocation13_spill] sm:$0xff] %v6213_v45  ;;  %v2380_v63 = vmul.f32 %v5942_v28, %v2244_v27  ;;  %v2657_v27 = vsel %vm1173_vm2, %v2351_v41, 0.0 }
 0x53d   : > { %2649 = vadd.xlane.f32.xlu1 %v2648_v13  ;;  %v2654_v13 = vsel %vm1173_vm2, %v2350_v21, 0.0 }
 0x53e   : > { %v6219_v58 = vpop.xlane.xlu1 %2484  ;;  %2706 = vadd.xlane.f32.xlu0 %v2705_v25  ;;  %v6221_v36 = vpop.xlane.xlu0 %2529  ;;  %v2621_v25 = vsel %vm1173_vm2, %v2339_v26, 0.0  ;;  %v2234_v26 = vld [vmem:[#allocation2 + $0x360] sm:$0xff] }
 0x53f   : > { %7338 = vst [vmem:[#allocation14_spill] sm:$0xff] %v6221_v36 }
 0x541   : > { %2739 = vadd.xlane.f32.xlu1 %v2738_v16 }
 0x542   : > { %v6227_v50 = vpop.xlane.xlu1 %2490  ;;  %2619 = vadd.xlane.f32.xlu0 %v2618_v5  ;;  %v6229_v61 = vpop.xlane.xlu0 %2535  ;;  %v2744_v5 = vsel %vm1173_vm2, %v2380_v63, 0.0  ;;  %v2370_v63 = vmul.f32 %v5942_v28, %v2234_v26 }
 0x543   : > { %7339 = vst [vmem:[#allocation15_spill] sm:$0xff] %v6227_v50  ;;  %7340 = vst [vmem:[#allocation16_spill] sm:$0xff] %v6229_v61  ;;  %v2219_v61 = vld [vmem:[#allocation2 + $0x2e8] sm:$0xff] }
 0x544   : > { %v2714_v41 = vsel %vm1173_vm2, %v2370_v63, 0.0 }
 0x545   : > { %2697 = vadd.xlane.f32.xlu1 %v2696_v0  ;;  %v2245_v0 = vld [vmem:[#allocation2 + $0x3b8] sm:$0xff] }
 0x546   : > { %v6235_v29 = vpop.xlane.xlu1 %2496  ;;  %2709 = vadd.xlane.f32.xlu0 %v2708_v57  ;;  %v6237_v30 = vpop.xlane.xlu0 %2541  ;;  %v2381_v10 = vmul.f32 %v5942_v28, %v2245_v0  ;;  %v2341_v0 = vmul.f32 %v5942_v28, %v2205_v38 }
 0x547   : > { %7341 = vst [vmem:[#allocation17_spill] sm:$0xff] %v6235_v29  ;;  %7342 = vst [vmem:[#allocation18_spill] sm:$0xff] %v6237_v30  ;;  %v2251_v30 = vld [vmem:[#allocation2 + $0x3e8] sm:$0xff] }
 0x549   : > { %2655 = vadd.xlane.f32.xlu1 %v2654_v13  ;;  %v2624_v13 = vsel %vm1173_vm2, %v2340_v11, 0.0 }
 0x54a   : > { %v6243_v37 = vpop.xlane.xlu1 %2502  ;;  %2622 = vadd.xlane.f32.xlu0 %v2621_v25  ;;  %v6245_v16 = vpop.xlane.xlu0 %2547  ;;  %v2216_v25 = vld [vmem:[#allocation2 + $0x2d0] sm:$0xff] }
 0x54b   : > { %7343 = vst [vmem:[#allocation19_spill] sm:$0xff] %v6243_v37  ;;  %7344 = vst [vmem:[#allocation20_spill] sm:$0xff] %v6245_v16  ;;  %v2221_v16 = vld [vmem:[#allocation2 + $0x2f8] sm:$0xff] }
 0x54d   : > { %2745 = vadd.xlane.f32.xlu1 %v2744_v5  ;;  %v2747_v5 = vsel %vm1173_vm2, %v2381_v10, 0.0  ;;  %v2627_v10 = vsel %vm1173_vm2, %v2341_v0, 0.0 }
 0x54e   : > { %v6251_v21 = vpop.xlane.xlu1 %2508  ;;  %2712 = vadd.xlane.f32.xlu0 %v2711_v15  ;;  %v6253_v57 = vpop.xlane.xlu0 %2553  ;;  %v2352_v15 = vmul.f32 %v5942_v28, %v2216_v25 }
 0x54f   : > { %7345 = vst [vmem:[#allocation21_spill] sm:$0xff] %v6251_v21  ;;  %7346 = vst [vmem:[#allocation22_spill] sm:$0xff] %v6253_v57  ;;  %v2235_v57 = vld [vmem:[#allocation2 + $0x368] sm:$0xff] }
 0x550   : > { %v2371_v25 = vmul.f32 %v5942_v28, %v2235_v57 }
 0x551   : > { %2658 = vadd.xlane.f32.xlu1 %v2657_v27  ;;  %v2246_v27 = vld [vmem:[#allocation2 + $0x3c0] sm:$0xff] }
 0x552   : > { %v6259_v31 = vpop.xlane.xlu1 %2514  ;;  %2625 = vadd.xlane.f32.xlu0 %v2624_v13  ;;  %v6261_v24 = vpop.xlane.xlu0 %2559  ;;  %v2660_v13 = vsel %vm1173_vm2, %v2352_v15, 0.0  ;;  %v2717_v15 = vsel %vm1173_vm2, %v2371_v25, 0.0 }
 0x553   : > { %7347 = vst [vmem:[#allocation23_spill] sm:$0xff] %v6259_v31  ;;  %7348 = vst [vmem:[#allocation24_spill] sm:$0xff] %v6261_v24  ;;  %v2382_v24 = vmul.f32 %v5942_v28, %v2246_v27  ;;  %v2357_v27 = vmul.f32 %v5942_v28, %v2221_v16 }
 0x555   : > { %2748 = vadd.xlane.f32.xlu1 %v2747_v5  ;;  %v2217_v5 = vld [vmem:[#allocation2 + $0x2d8] sm:$0xff] }
 0x556   : > { %v6267_v11 = vpop.xlane.xlu1 %2520  ;;  %2715 = vadd.xlane.f32.xlu0 %v2714_v41  ;;  %v6269_v26 = vpop.xlane.xlu0 %2565  ;;  %v2750_v41 = vsel %vm1173_vm2, %v2382_v24, 0.0  ;;  %v2675_v24 = vsel %vm1173_vm2, %v2357_v27, 0.0 }
 0x557   : > { %7349 = vst [vmem:[#allocation25_spill] sm:$0xff] %v6267_v11  ;;  %7350 = vst [vmem:[#allocation26_spill] sm:$0xff] %v6269_v26  ;;  %v2353_v26 = vmul.f32 %v5942_v28, %v2217_v5  ;;  %v2387_v5 = vmul.f32 %v5942_v28, %v2251_v30 }
 0x559   : > { %2661 = vadd.xlane.f32.xlu1 %v2660_v13  ;;  %v2247_v13 = vld [vmem:[#allocation2 + $0x3c8] sm:$0xff] }
 0x55a   : > { %v6275_v63 = vpop.xlane.xlu1 %2526  ;;  %2628 = vadd.xlane.f32.xlu0 %v2627_v10  ;;  %v6277_v38 = vpop.xlane.xlu0 %2571  ;;  %v2663_v10 = vsel %vm1173_vm2, %v2353_v26, 0.0  ;;  %v2765_v26 = vsel %vm1173_vm2, %v2387_v5, 0.0 }
 0x55b   : > { %7351 = vst [vmem:[#allocation27_spill] sm:$0xff] %v6275_v63  ;;  %7352 = vst [vmem:[#allocation28_spill] sm:$0xff] %v6277_v38  ;;  %v2383_v38 = vmul.f32 %v5942_v28, %v2247_v13 }
 0x55d   : > { %2751 = vadd.xlane.f32.xlu1 %v2750_v41  ;;  %v2218_v41 = vld [vmem:[#allocation2 + $0x2e0] sm:$0xff] }
 0x55e   : > { %v6283_v0 = vpop.xlane.xlu1 %2532  ;;  %2718 = vadd.xlane.f32.xlu0 %v2717_v15  ;;  %v6285_v57 = vpop.xlane.xlu0 %2577  ;;  %v2753_v15 = vsel %vm1173_vm2, %v2383_v38, 0.0 }
 0x55f   : > { %7353 = vst [vmem:[#allocation29_spill] sm:$0xff] %v6283_v0  ;;  %7354 = vst [vmem:[#allocation30_spill] sm:$0xff] %v6285_v57  ;;  %v2252_v0 = vld [vmem:[#allocation2 + $0x3f0] sm:$0xff]  ;;  %v2354_v57 = vmul.f32 %v5942_v28, %v2218_v41 }
 0x560   : > { %v2388_v13 = vmul.f32 %v5942_v28, %v2252_v0  ;;  %v2355_v0 = vmul.f32 %v5942_v28, %v2219_v61 }
 0x561   : > { %2664 = vadd.xlane.f32.xlu1 %v2663_v10  ;;  %v2248_v10 = vld [vmem:[#allocation2 + $0x3d0] sm:$0xff] }
 0x562   : > { %v6291_v25 = vpop.xlane.xlu1 %2538  ;;  %2676 = vadd.xlane.f32.xlu0 %v2675_v24  ;;  %v6293_v16 = vpop.xlane.xlu0 %2583  ;;  %v2666_v24 = vsel %vm1173_vm2, %v2354_v57, 0.0  ;;  %v2768_v38 = vsel %vm1173_vm2, %v2388_v13, 0.0 }
 0x563   : > { %7355 = vst [vmem:[#allocation31_spill] sm:$0xff] %v6291_v25  ;;  %v2384_v25 = vmul.f32 %v5942_v28, %v2248_v10  ;;  %v2220_v10 = vld [vmem:[#allocation2 + $0x2f0] sm:$0xff] }
 0x565   : > { %2754 = vadd.xlane.f32.xlu1 %v2753_v15  ;;  %v2756_v5 = vsel %vm1173_vm2, %v2384_v25, 0.0  ;;  %v2249_v15 = vld [vmem:[#allocation2 + $0x3d8] sm:$0xff]  ;;  %v2250_v25 = vld [vmem:[#allocation2 + $0x3e0] sm:$0xff] }
 0x566   : > { %v6299_v27 = vpop.xlane.xlu1 %2544  ;;  %2766 = vadd.xlane.f32.xlu0 %v2765_v26  ;;  %v2776_v30 = vpop.permute.xlu0 %2775  ;;  %v2385_v57 = vmul.f32 %v5942_v28, %v2249_v15 }
 0x567   : > { %7356 = vst [vmem:[#allocation32_spill] sm:$0xff] %v6299_v27  ;;  %4215 = vpush %v2776_v30  ;;  %v2669_v30 = vsel %vm1173_vm2, %v2355_v0, 0.0  ;;  %v2236_v0 = vld [vmem:[#allocation2 + $0x370] sm:$0xff] }
 0x568   : > { %v2759_v13 = vsel %vm1173_vm2, %v2385_v57, 0.0  ;;  %v2237_v57 = vld [vmem:[#allocation2 + $0x378] sm:$0xff] }
 0x569   : > { %2667 = vadd.xlane.f32.xlu1 %v2666_v24 }
 0x56a   : > { %v6304_v41 = vpop.xlane.xlu1 %2550  ;;  %2769 = vadd.xlane.f32.xlu0 %v2768_v38  ;;  %v2356_v38 = vmul.f32 %v5942_v28, %v2220_v10 }
 0x56b   : > { %7357 = vst [vmem:[#allocation33_spill] sm:$0xff] %v6304_v41 }
 0x56c   : > { %v2672_v61 = vsel %vm1173_vm2, %v2356_v38, 0.0  ;;  %v2253_v38 = vld [vmem:[#allocation2 + $0x3f8] sm:$0xff] }
 0x56d   : > { %2757 = vadd.xlane.f32.xlu1 %v2756_v5  ;;  %v2386_v5 = vmul.f32 %v5942_v28, %v2250_v25 }
 0x56e   : > { %v6308_v26 = vpop.xlane.xlu1 %2556 }
 0x56f   : > { %7358 = vst [vmem:[#allocation34_spill] sm:$0xff] %v6308_v26  ;;  %v2762_v15 = vsel %vm1173_vm2, %v2386_v5, 0.0 }
 0x571   : > { %2670 = vadd.xlane.f32.xlu1 %v2669_v30  ;;  %v2372_v30 = vmul.f32 %v5942_v28, %v2236_v0 }
 0x572   : > { %v6312_v24 = vpop.xlane.xlu1 %2562 }
 0x573   : > { %7359 = vst [vmem:[#allocation35_spill] sm:$0xff] %v6312_v24  ;;  %v2720_v10 = vsel %vm1173_vm2, %v2372_v30, 0.0 }
 0x575   : > { %2760 = vadd.xlane.f32.xlu1 %v2759_v13  ;;  %v2373_v13 = vmul.f32 %v5942_v28, %v2237_v57  ;;  %v7363_v57 = vlaneseq }
 0x576   : > { %v6316_v41 = vpop.xlane.xlu1 %2568 }
 0x577   : > { %7360 = vst [vmem:[#allocation36_spill] sm:$0xff] %v6316_v41  ;;  %v2723_v25 = vsel %vm1173_vm2, %v2373_v13, 0.0 }
 0x579   : > { %2673 = vadd.xlane.f32.xlu1 %v2672_v61  ;;  %v2389_v61 = vmul.f32 %v5942_v28, %v2253_v38 }
 0x57a   : > { %v6320_v26 = vpop.xlane.xlu1 %2574 }
 0x57b   : > { %7361 = vst [vmem:[#allocation37_spill] sm:$0xff] %v6320_v26  ;;  %v2771_v0 = vsel %vm1173_vm2, %v2389_v61, 0.0  ;;  %vm3700_vm2 = vcmask 1041409  }
 0x57d   : > { %2763 = vadd.xlane.f32.xlu1 %v2762_v15 }
 0x57e   : > { %v6324_v24 = vpop.xlane.xlu1 %2580 }
 0x57f   : > { %7362 = vst [vmem:[#allocation38_spill] sm:$0xff] %v6324_v24 }
 0x581   : > { %2721 = vadd.xlane.f32.xlu1 %v2720_v10  ;;  %v3037_v10 = vand.u32 127, %v7363_v57 }
 0x582   : > { %v6328_v41 = vpop.xlane.xlu1 %2586 }
 0x583   : > { %v3042_v13 = vadd.s32 4294967288, %v3037_v10  ;;  %v3049_v28 = vadd.s32 4294967280, %v3037_v10  ;;  %v3105_v61 = vadd.s32 4294967216, %v3037_v10  ;;  %v3119_v36 = vadd.s32 4294967200, %v3037_v10 }
 0x584   : > { %v3063_v45 = vadd.s32 4294967264, %v3037_v10  ;;  %v3133_v11 = vadd.s32 4294967184, %v3037_v10  ;;  %v3070_v59 = vadd.s32 4294967256, %v3037_v10  ;;  %v3077_v57 = vadd.s32 4294967248, %v3037_v10 }
 0x585   : > { %2724 = vadd.xlane.f32.xlu1 %v2723_v25  ;;  %v6349_v25 = vsub.s32 %v3037_v10, %v5510_v8  ;;  %v3084_v31 = vadd.s32 4294967240, %v3037_v10  ;;  %v3091_v62 = vadd.s32 4294967232, %v3037_v10  ;;  %v3112_v21 = vadd.s32 4294967208, %v3037_v10 }
 0x586   : > { %v6332_v5 = vpop.xlane.xlu1 %2589  ;;  %v6354_v35 = vsub.s32 %v3042_v13, %v5510_v8  ;;  %v6357_v37 = vsub.s32 %v3049_v28, %v5510_v8  ;;  %v3140_v46 = vadd.s32 4294967176, %v3037_v10  ;;  %v6368_v12 = vsub.s32 %v3119_v36, %v5510_v8 }
 0x587   : > { %v6375_v28 = vsub.s32 %v3063_v45, %v5510_v8  ;;  %v6390_v36 = vsub.s32 %v3091_v62, %v5510_v8  ;;  %v6396_v45 = vsub.s32 %v3112_v21, %v5510_v8 }
 0x589   : > { %2772 = vadd.xlane.f32.xlu1 %v2771_v0  ;;  %v3056_v0 = vadd.s32 4294967272, %v3037_v10 }
 0x58a   : > { %v6335_v15 = vpop.xlane.xlu1 %2592 }
 0x58b   : > { %v6365_v29 = vsub.s32 %v3056_v0, %v5510_v8  ;;  %v6387_v0 = vsub.s32 %v3084_v31, %v5510_v8 }
 0x58e   : > { %v6337_v24 = vpop.xlane.xlu1 %2595 }
 0x592   : > { %v6339_v30 = vpop.xlane.xlu1 %2598 }
 0x596   : > { %v6342_v26 = vpop.xlane.xlu1 %2601 }
 0x597   : > { %7364 = vst [vmem:[#allocation39_spill] sm:$0xff] %v6342_v26  ;;  %v6344_v27 = vpop.xlane.xlu0 %2607 }
 0x598   : > { %7365 = vst [vmem:[#allocation40_spill] sm:$0xff] %v6344_v27  ;;  %s4216_s29 = spop %4215  ;;  %v3098_v27 = vadd.s32 4294967224, %v3037_v10 }
 0x599   : > { %v6370_v50 = vstv %s4216_s29 }
 0x59a   : > { %v6346_v38 = vpop.xlane.xlu1 %2604  ;;  %v6410_v62 = vadd.f32 %v6370_v50, %v6076_v32  ;;  %v6416_v21 = vadd.f32 %v6370_v50, %v6082_v4  ;;  %v6438_v4 = vadd.f32 %v6370_v50, %v6115_v22  ;;  %v6458_v22 = vadd.f32 %v6370_v50, %v6090_v6 }
 0x59b   : > { %7366 = vst [vmem:[#allocation41_spill] sm:$0xff] %v6346_v38  ;;  %v6351_v63 = vpop.xlane.xlu0 %2685  ;;  %v3126_v38 = vadd.s32 4294967192, %v3037_v10  ;;  %v6378_v10 = vsub.s32 %v3133_v11, %v5510_v8  ;;  %v6478_v6 = vadd.f32 %v6370_v50, %v6163_v18 }
 0x59c   : > { %7367 = vst [vmem:[#allocation42_spill] sm:$0xff] %v6351_v63  ;;  %v6362_v63 = vsub.s32 %v3105_v61, %v5510_v8  ;;  %v6384_v61 = vsub.s32 %v3077_v57, %v5510_v8  ;;  %v6406_v57 = vadd.f32 %v6370_v50, %v6078_v33  ;;  %v6428_v33 = vadd.f32 %v6370_v50, %v6100_v39 }
 0x59d   : > { %7370 = vst [vmem:[#allocation45_spill] sm:$0xff] %v6378_v10  ;;  %v6399_v11 = vsub.s32 %v3126_v38, %v5510_v8  ;;  %v6450_v39 = vadd.f32 %v6370_v50, %v6084_v55  ;;  %7374 = vst [vmem:[#allocation49_spill] sm:$0xff] %v6458_v22  ;;  %v6470_v55 = vadd.f32 %v6370_v50, %v6155_v9 }
 0x59e   : > { %v6359_v26 = vpop.xlane.xlu1 %2610  ;;  %v6492_v9 = vadd.f32 %v6370_v50, %v6117_v52  ;;  %v6514_v52 = vadd.f32 %v6370_v50, %v6195_v60  ;;  %v2844_v60 = vadd.f32 %v6370_v50, %v6293_v16  ;;  %v6552_v16 = vadd.f32 %v6370_v50, %v6165_v51  ;;  %v7388_v51 = vld [vmem:[#allocation8_spill] sm:$0xff] }
 0x59f   : > { %7368 = vst [vmem:[#allocation43_spill] sm:$0xff] %v6359_v26  ;;  %v6372_v13 = vpop.xlane.xlu0 %2730  ;;  %v6381_v26 = vsub.s32 %v3070_v59, %v5510_v8  ;;  %v6402_v59 = vsub.s32 %v3140_v46, %v5510_v8  ;;  %v6434_v46 = vadd.f32 %v6370_v50, %v6107_v14  ;;  %v6454_v14 = vadd.f32 %v6370_v50, %v6139_v54 }
 0x5a0   : > { %7369 = vst [vmem:[#allocation44_spill] sm:$0xff] %v6372_v13  ;;  %v6393_v13 = vsub.s32 %v3098_v27, %v5510_v8  ;;  %v6420_v27 = vadd.f32 %v6370_v50, %v6088_v3  ;;  %v6424_v8 = vadd.f32 %v6370_v50, %v6094_v23  ;;  %v6442_v3 = vadd.f32 %v6370_v50, %v6123_v7 }
 0x5a1   : > { %7371 = vst [vmem:[#allocation46_spill] sm:$0xff] %v6402_v59  ;;  %v6446_v23 = vadd.f32 %v6370_v50, %v6131_v42  ;;  %v6462_v7 = vadd.f32 %v6370_v50, %v6147_v17  ;;  %v6466_v42 = vadd.f32 %v6370_v50, %v6096_v1  ;;  %7377 = vst [vmem:[#allocation52_spill] sm:$0xff] %v6470_v55  ;;  %v7390_v59 = vld [vmem:[#allocation39_spill] sm:$0xff] }
 0x5a2   : > { %v6412_v31 = vpop.xlane.xlu1 %2631  ;;  %v6474_v54 = vadd.f32 %v6370_v50, %v6102_v20  ;;  %v6484_v17 = vadd.f32 %v6370_v50, %v6109_v40  ;;  %v6488_v1 = vadd.f32 %v6370_v50, %v6171_v49  ;;  %v6496_v20 = vadd.f32 %v6370_v50, %v6179_v47 }
 0x5a3   : > { %7372 = vst [vmem:[#allocation47_spill] sm:$0xff] %v6412_v31  ;;  %v6430_v32 = vpop.xlane.xlu0 %2688  ;;  %7375 = vst [vmem:[#allocation50_spill] sm:$0xff] %v6462_v7  ;;  %v6502_v55 = vadd.f32 %v6370_v50, %v6125_v19  ;;  %v6506_v40 = vadd.f32 %v6370_v50, %v6187_v34  ;;  %v6510_v49 = vadd.f32 %v6370_v50, %v6133_v43 }
 0x5a4   : > { %7373 = vst [vmem:[#allocation48_spill] sm:$0xff] %v6430_v32  ;;  %7376 = vst [vmem:[#allocation51_spill] sm:$0xff] %v6466_v42  ;;  %v6518_v47 = vadd.f32 %v6370_v50, %v6141_v2  ;;  %v6522_v19 = vadd.f32 %v6370_v50, %v6203_v48  ;;  %v6526_v34 = vadd.f32 %v6370_v50, %v6149_v53 }
 0x5a5   : > { %v6530_v43 = vadd.f32 %v6370_v50, %v6211_v44  ;;  %v2845_v42 = vadd.f32 %v6370_v50, %v6328_v41  ;;  %v2846_v2 = vadd.f32 %v6370_v50, %v6332_v5  ;;  %v2847_v48 = vadd.f32 %v6370_v50, %v6335_v15 }
 0x5a6   : > { %v6480_v38 = vpop.xlane.xlu1 %2634  ;;  %7380 = vst [vmem:[#allocation55_spill] sm:$0xff] %v6522_v19  ;;  %7381 = vst [vmem:[#allocation56_spill] sm:$0xff] %v6526_v34  ;;  %v6544_v53 = vadd.f32 %v6370_v50, %v6157_v56  ;;  %v6548_v44 = vadd.f32 %v6370_v50, %v6219_v58  ;;  %v2848_v41 = vadd.f32 %v6370_v50, %v6337_v24  ;;  %v7387_v58 = vld [vmem:[#allocation15_spill] sm:$0xff]  ;;  %v7389_v24 = vld [vmem:[#allocation17_spill] sm:$0xff] }
 0x5a7   : > { %7378 = vst [vmem:[#allocation53_spill] sm:$0xff] %v6480_v38  ;;  %v6498_v18 = vpop.xlane.xlu0 %2646  ;;  %7382 = vst [vmem:[#allocation57_spill] sm:$0xff] %v6530_v43  ;;  %v2849_v15 = vadd.f32 %v6370_v50, %v6339_v30  ;;  %v3387_v43 = vrot.slane %v2844_v60, %v6349_v25  ;;  %v3391_v56 = vrot.slane %v2845_v42, %v6354_v35  ;;  %v7391_v60 = vld [vmem:[#allocation9_spill] sm:$0xff]  ;;  %v7394_v34 = vld [vmem:[#allocation19_spill] sm:$0xff] }
 0x5a8   : > { %7379 = vst [vmem:[#allocation54_spill] sm:$0xff] %v6498_v18  ;;  %7384 = vst [vmem:[#allocation59_spill] sm:$0xff] %v6544_v53  ;;  %v3396_v53 = vrot.slane %v2846_v2, %v6357_v37  ;;  %v6569_v32 = vadd.f32 %v6370_v50, %v7388_v51  ;;  %v2850_v30 = vadd.f32 %v6370_v50, %v7390_v59  ;;  %v7392_v2 = vld [vmem:[#allocation41_spill] sm:$0xff]  ;;  %v7395_v38 = vld [vmem:[#allocation10_spill] sm:$0xff] }
 0x5a9   : > { %7385 = vst [vmem:[#allocation60_spill] sm:$0xff] %v6548_v44  ;;  %v6565_v44 = vadd.f32 %v6370_v50, %v7387_v58  ;;  %v6579_v42 = vadd.f32 %v6370_v50, %v7391_v60  ;;  %v2851_v10 = vadd.f32 %v6370_v50, %v7392_v2  ;;  %v3392_v58 = vsel %vm3047_vm3, %v3391_v56, %v3387_v43  ;;  %v7398_v2 = vld [vmem:[#allocation21_spill] sm:$0xff] }
 0x5aa   : > { %v6540_v18 = vpop.xlane.xlu1 %2637  ;;  %v6593_v59 = vadd.f32 %v6370_v50, %v7395_v38  ;;  %v3397_v60 = vsel %vm3054_vm4, %v3396_v53, %v3392_v58  ;;  %v3406_v19 = vrot.slane %v2848_v41, %v6375_v28  ;;  %v6601_v43 = vadd.f32 %v6370_v50, %v7398_v2  ;;  %v7402_v38 = vld [vmem:[#allocation23_spill] sm:$0xff]  ;;  %v7404_v53 = vld [vmem:[#allocation12_spill] sm:$0xff] }
 0x5ab   : > { %7383 = vst [vmem:[#allocation58_spill] sm:$0xff] %v6540_v18  ;;  %v6556_v5 = vpop.xlane.xlu0 %2736  ;;  %v3401_v18 = vrot.slane %v2847_v48, %v6365_v29  ;;  %v7400_v48 = vld [vmem:[#allocation11_spill] sm:$0xff]  ;;  %v6615_v41 = vadd.f32 %v6370_v50, %v7404_v53  ;;  %v3416_v2 = vrot.slane %v2850_v30, %v6384_v61 }
 0x5ac   : > { %7386 = vst [vmem:[#allocation61_spill] sm:$0xff] %v6556_v5  ;;  %v6573_v5 = vadd.f32 %v6370_v50, %v7389_v24  ;;  %v6589_v24 = vadd.f32 %v6370_v50, %v7394_v34  ;;  %7396 = vst [vmem:[#allocation8_spill] sm:$0xff] %v6593_v59  ;;  %v6605_v56 = vadd.f32 %v6370_v50, %v7400_v48  ;;  %v7411_v53 = vld [vmem:[#allocation27_spill] sm:$0xff] }
 0x5ad   : > { %7399 = vst [vmem:[#allocation39_spill] sm:$0xff] %v6601_v43  ;;  %v3402_v34 = vsel %vm3061_vm5, %v3401_v18, %v3397_v60  ;;  %v6611_v59 = vadd.f32 %v6370_v50, %v7402_v38  ;;  %7405 = vst [vmem:[#allocation19_spill] sm:$0xff] %v6615_v41  ;;  %v3421_v60 = vrot.slane %v2851_v10, %v6387_v0  ;;  %v7432_v43 = vld [vmem:[#allocation36_spill] sm:$0xff] }
 0x5ae   : > { %v6585_v51 = vpop.xlane.xlu1 %2679  ;;  %7401 = vst [vmem:[#allocation9_spill] sm:$0xff] %v6605_v56  ;;  %v3407_v58 = vsel %vm3068_vm6, %v3406_v19, %v3402_v34  ;;  %v7408_v56 = vld [vmem:[#allocation13_spill] sm:$0xff]  ;;  %v6633_v41 = vadd.f32 %v6370_v50, %v7411_v53  ;;  %v7413_v19 = vld [vmem:[#allocation14_spill] sm:$0xff] }
 0x5af   : > { %7393 = vst [vmem:[#allocation15_spill] sm:$0xff] %v6585_v51  ;;  %v6597_v31 = vpop.xlane.xlu0 %2694  ;;  %v3411_v51 = vrot.slane %v2849_v15, %v6381_v26  ;;  %7403 = vst [vmem:[#allocation41_spill] sm:$0xff] %v6611_v59  ;;  %v6625_v18 = vadd.f32 %v6370_v50, %v7408_v56  ;;  %v6637_v30 = vadd.f32 %v6370_v50, %v7413_v19  ;;  %v7430_v59 = vld [vmem:[#allocation26_spill] sm:$0xff] }
 0x5b0   : > { %7397 = vst [vmem:[#allocation17_spill] sm:$0xff] %v6597_v31  ;;  %v7406_v31 = vld [vmem:[#allocation25_spill] sm:$0xff]  ;;  %7412 = vst [vmem:[#allocation23_spill] sm:$0xff] %v6633_v41  ;;  %v7419_v41 = vld [vmem:[#allocation32_spill] sm:$0xff] }
 0x5b1   : > { %v6621_v48 = vadd.f32 %v6370_v50, %v7406_v31  ;;  %7409 = vst [vmem:[#allocation21_spill] sm:$0xff] %v6625_v18  ;;  %v3412_v15 = vsel %vm3075_vm7, %v3411_v51, %v3407_v58  ;;  %7414 = vst [vmem:[#allocation12_spill] sm:$0xff] %v6637_v30  ;;  %v7415_v31 = vld [vmem:[#allocation16_spill] sm:$0xff]  ;;  %v7417_v51 = vld [vmem:[#allocation31_spill] sm:$0xff]  ;;  %v6656_v19 = vadd.f32 %v6370_v50, %v7419_v41 }
 0x5b2   : > { %v6629_v38 = vpop.xlane.xlu1 %2682  ;;  %v6641_v34 = vadd.f32 %v6370_v50, %v7415_v31  ;;  %v3417_v56 = vsel %vm3082_vm8, %v3416_v2, %v3412_v15  ;;  %v6648_v10 = vadd.f32 %v6370_v50, %v7417_v51  ;;  %v7418_v58 = vld [vmem:[#allocation18_spill] sm:$0xff]  ;;  %v7420_v31 = vld [vmem:[#allocation20_spill] sm:$0xff]  ;;  %v7421_v15 = vld [vmem:[#allocation33_spill] sm:$0xff] }
 0x5b3   : > { %7407 = vst [vmem:[#allocation10_spill] sm:$0xff] %v6621_v48  ;;  %7410 = vst [vmem:[#allocation11_spill] sm:$0xff] %v6629_v38  ;;  %v6644_v18 = vpop.xlane.xlu0 %2652  ;;  %v6652_v53 = vadd.f32 %v6370_v50, %v7418_v58  ;;  %v6659_v30 = vsel %vm3089_vm9, %v3421_v60, %v3417_v56  ;;  %v6663_v2 = vadd.f32 %v6370_v50, %v7420_v31  ;;  %v7422_v51 = vld [vmem:[#allocation22_spill] sm:$0xff]  ;;  %v7426_v41 = vld [vmem:[#allocation24_spill] sm:$0xff] }
 0x5b4   : > { %7416 = vst [vmem:[#allocation25_spill] sm:$0xff] %v6644_v18  ;;  %v6667_v18 = vadd.f32 %v6370_v50, %v7421_v15  ;;  %v6671_v48 = vadd.f32 %v6370_v50, %v7422_v51  ;;  %v7424_v58 = vld [vmem:[#allocation34_spill] sm:$0xff]  ;;  %v6679_v60 = vadd.f32 %v6370_v50, %v7426_v41  ;;  %v7428_v56 = vld [vmem:[#allocation35_spill] sm:$0xff]  ;;  %v6687_v15 = vadd.f32 %v6370_v50, %v7430_v59  ;;  %v7436_v41 = vld [vmem:[#allocation37_spill] sm:$0xff] }
 0x5b5   : > { %v6675_v38 = vadd.f32 %v6370_v50, %v7424_v58  ;;  %v6683_v31 = vadd.f32 %v6370_v50, %v7428_v56  ;;  %v6691_v51 = vadd.f32 %v6370_v50, %v7432_v43  ;;  %v7435_v58 = vld [vmem:[#allocation28_spill] sm:$0xff]  ;;  %v7438_v56 = vld [vmem:[#allocation30_spill] sm:$0xff] }
 0x5b6   : > { %7423 = vst [vmem:[#allocation13_spill] sm:$0xff] %v6671_v48  ;;  %7427 = vst [vmem:[#allocation14_spill] sm:$0xff] %v6679_v60  ;;  %v6693_v48 = vpop.xlane.xlu1 %2640  ;;  %v6701_v60 = vadd.f32 %v6370_v50, %v7436_v41  ;;  %v7439_v59 = vld [vmem:[#allocation38_spill] sm:$0xff]  ;;  %v3046_v41 = vrot.slane %v6410_v62, %v6354_v35  ;;  %v3150_v62 = vrot.slane %v6474_v54, %v6349_v25 }
 0x5b7   : > { %7425 = vst [vmem:[#allocation27_spill] sm:$0xff] %v6675_v38  ;;  %7429 = vst [vmem:[#allocation16_spill] sm:$0xff] %v6683_v31  ;;  %v6697_v38 = vadd.f32 %v6370_v50, %v7435_v58  ;;  %v6705_v31 = vadd.f32 %v6370_v50, %v7438_v56  ;;  %v6711_v43 = vpop.xlane.xlu0 %2742  ;;  %v3041_v58 = vrot.slane %v6406_v57, %v6349_v25 }
 0x5b8   : > { %7431 = vst [vmem:[#allocation31_spill] sm:$0xff] %v6687_v15  ;;  %7433 = vst [vmem:[#allocation18_spill] sm:$0xff] %v6691_v51  ;;  %v6709_v15 = vadd.f32 %v6370_v50, %v7439_v59  ;;  %v3060_v56 = vrot.slane %v6420_v27, %v6365_v29  ;;  %v3067_v59 = vrot.slane %v6424_v8, %v6375_v28 }
 0x5b9   : > { %7434 = vst [vmem:[#allocation32_spill] sm:$0xff] %v6693_v48  ;;  %7437 = vst [vmem:[#allocation20_spill] sm:$0xff] %v6701_v60  ;;  %v7442_v48 = vld [vmem:[#allocation40_spill] sm:$0xff]  ;;  %v3053_v60 = vrot.slane %v6416_v21, %v6357_v37  ;;  %v3154_v21 = vrot.slane %v6478_v6, %v6354_v35  ;;  %v3159_v27 = vrot.slane %v6484_v17, %v6357_v37 }
 0x5ba   : > { %7440 = vst [vmem:[#allocation33_spill] sm:$0xff] %v6709_v15  ;;  %7441 = vst [vmem:[#allocation22_spill] sm:$0xff] %v6711_v43  ;;  %v2852_v51 = vadd.f32 %v6370_v50, %v7442_v48  ;;  %v6737_v8 = vpop.xlane.xlu1 %2727  ;;  %v3164_v43 = vrot.slane %v6488_v1, %v6365_v29  ;;  %v3169_v48 = vrot.slane %v6492_v9, %v6375_v28 }
 0x5bb   : > { %7443 = vst [vmem:[#allocation34_spill] sm:$0xff] %v6737_v8  ;;  %v6747_v15 = vpop.xlane.xlu0 %2700  ;;  %v3229_v57 = vrot.slane %v6552_v16, %v6349_v25  ;;  %v3233_v54 = vrot.slane %v6565_v44, %v6354_v35  ;;  %v3312_v6 = vrot.slane %v6648_v10, %v6354_v35  ;;  %v3174_v17 = vrot.slane %v6496_v20, %v6381_v26  ;;  %v7447_v8 = vld [vmem:[#allocation43_spill] sm:$0xff] }
 0x5bc   : > { %7444 = vst [vmem:[#allocation24_spill] sm:$0xff] %v6747_v15  ;;  %v3308_v15 = vrot.slane %v6641_v34, %v6349_v25  ;;  %v3179_v1 = vrot.slane %v6502_v55, %v6384_v61  ;;  %v3238_v16 = vrot.slane %v6569_v32, %v6357_v37  ;;  %v3317_v55 = vrot.slane %v6652_v53, %v6357_v37 }
 0x5bd   : > { %v3243_v9 = vrot.slane %v6573_v5, %v6365_v29  ;;  %v3426_v32 = vrot.slane %v2852_v51, %v6390_v36  ;;  %v3048_v22 = vsel %vm3047_vm3, %v3046_v41, %v3041_v58  ;;  %v3155_v44 = vsel %vm3047_vm3, %v3154_v21, %v3150_v62 }
 0x5be   : > { %v6773_v7 = vpop.xlane.xlu1 %2643  ;;  %v3313_v34 = vsel %vm3047_vm3, %v3312_v6, %v3308_v15  ;;  %v2853_v20 = vadd.f32 %v6370_v50, %v7447_v8  ;;  %v3055_v53 = vsel %vm3054_vm4, %v3053_v60, %v3048_v22  ;;  %v3160_v51 = vsel %vm3054_vm4, %v3159_v27, %v3155_v44 }
 0x5bf   : > { %7445 = vst [vmem:[#allocation35_spill] sm:$0xff] %v6773_v7  ;;  %v6783_v10 = vpop.xlane.xlu0 %2613  ;;  %v3234_v7 = vsel %vm3047_vm3, %v3233_v54, %v3229_v57  ;;  %v3427_v5 = vsel %vm3096_vm10, %v3426_v32, %v6659_v30  ;;  %v3248_v15 = vrot.slane %v6579_v42, %v6375_v28  ;;  %v3318_v62 = vsel %vm3054_vm4, %v3317_v55, %v3313_v34  ;;  %v7448_v54 = vld [vmem:[#allocation47_spill] sm:$0xff] }
 0x5c0   : > { %7446 = vst [vmem:[#allocation26_spill] sm:$0xff] %v6783_v10  ;;  %v3322_v10 = vrot.slane %v6656_v19, %v6365_v29  ;;  %v3239_v58 = vsel %vm3054_vm4, %v3238_v16, %v3234_v7  ;;  %v3431_v57 = vrot.slane %v2853_v20, %v6393_v13  ;;  %v3062_v22 = vsel %vm3061_vm5, %v3060_v56, %v3055_v53  ;;  %v7451_v55 = vld [vmem:[#allocation55_spill] sm:$0xff] }
 0x5c1   : > { %v3327_v30 = vrot.slane %v6663_v2, %v6375_v28  ;;  %v3165_v19 = vsel %vm3061_vm5, %v3164_v43, %v3160_v51  ;;  %v3244_v7 = vsel %vm3061_vm5, %v3243_v9, %v3239_v58  ;;  %v3332_v42 = vrot.slane %v6667_v18, %v6381_v26  ;;  %v7449_v18 = vld [vmem:[#allocation13_spill] sm:$0xff]  ;;  %v7452_v32 = vld [vmem:[#allocation27_spill] sm:$0xff] }
 0x5c2   : > { %v6801_v41 = vpop.xlane.xlu1 %2733  ;;  %v3323_v21 = vsel %vm3061_vm5, %v3322_v10, %v3318_v62  ;;  %v6818_v27 = vsel %vm3103_vm11, %v3431_v57, %v3427_v5  ;;  %v3069_v56 = vsel %vm3068_vm6, %v3067_v59, %v3062_v22  ;;  %v3170_v8 = vsel %vm3068_vm6, %v3169_v48, %v3165_v19  ;;  %v7453_v51 = vld [vmem:[#allocation53_spill] sm:$0xff] }
 0x5c3   : > { %v6808_v60 = vpop.xlane.xlu0 %2703  ;;  %v3253_v2 = vrot.slane %v6589_v24, %v6381_v26  ;;  %v2860_v43 = vadd.f32 %v6370_v50, %v7448_v54  ;;  %v3249_v6 = vsel %vm3068_vm6, %v3248_v15, %v3244_v7  ;;  %v3328_v9 = vsel %vm3068_vm6, %v3327_v30, %v3323_v21 }
 0x5c4   : > { %v3337_v44 = vrot.slane %v7449_v18, %v6384_v61  ;;  %v7450_v59 = vrot.slane %v6428_v33, %v6381_v26  ;;  %v3175_v24 = vsel %vm3075_vm7, %v3174_v17, %v3170_v8  ;;  %v3333_v34 = vsel %vm3075_vm7, %v3332_v42, %v3328_v9  ;;  %v7454_v33 = vld [vmem:[#allocation8_spill] sm:$0xff]  ;;  %v7455_v17 = vld [vmem:[#allocation14_spill] sm:$0xff] }
 0x5c5   : > { %v3204_v10 = vrot.slane %v7451_v55, %v6396_v45  ;;  %v3342_v53 = vrot.slane %v7452_v32, %v6387_v0  ;;  %v3254_v5 = vsel %vm3075_vm7, %v3253_v2, %v3249_v6  ;;  %v2861_v58 = vadd.f32 %v6370_v50, %v7453_v51  ;;  %v7457_v8 = vld [vmem:[#allocation56_spill] sm:$0xff]  ;;  %v7459_v9 = vld [vmem:[#allocation58_spill] sm:$0xff]  ;;  %v7462_v32 = vld [vmem:[#allocation9_spill] sm:$0xff] }
 0x5c6   : > { %v6828_v16 = vpop.xlane.xlu1 %2691  ;;  %v3076_v48 = vsel %vm3075_vm7, %v7450_v59, %v3069_v56  ;;  %v3258_v15 = vrot.slane %v7454_v33, %v6384_v61  ;;  %v3347_v57 = vrot.slane %v7455_v17, %v6390_v36  ;;  %v7456_v62 = vrot.slane %v6434_v46, %v6384_v61  ;;  %v7458_v46 = vld [vmem:[#allocation39_spill] sm:$0xff]  ;;  %v7465_v17 = vld [vmem:[#allocation18_spill] sm:$0xff] }
 0x5c7   : > { %v6838_v20 = vpop.xlane.xlu0 %2616  ;;  %v3338_v30 = vsel %vm3082_vm8, %v3337_v44, %v3333_v34  ;;  %v3466_v19 = vrot.slane %v2860_v43, %v6349_v25  ;;  %v3470_v7 = vrot.slane %v2861_v58, %v6354_v35  ;;  %v3180_v21 = vsel %vm3082_vm8, %v3179_v1, %v3175_v24  ;;  %v7460_v1 = vld [vmem:[#allocation16_spill] sm:$0xff] }
 0x5c8   : > { %v3083_v22 = vsel %vm3082_vm8, %v7456_v62, %v3076_v48  ;;  %v3343_v42 = vsel %vm3089_vm9, %v3342_v53, %v3338_v30  ;;  %v3209_v2 = vrot.slane %v7457_v8, %v6368_v12  ;;  %v3263_v54 = vrot.slane %v7458_v46, %v6387_v0  ;;  %v7466_v62 = vld [vmem:[#allocation42_spill] sm:$0xff] }
 0x5c9   : > { %v3259_v6 = vsel %vm3082_vm8, %v3258_v15, %v3254_v5  ;;  %v2862_v43 = vadd.f32 %v6370_v50, %v7459_v9  ;;  %v3352_v44 = vrot.slane %v7460_v1, %v6393_v13  ;;  %v3471_v59 = vsel %vm3047_vm3, %v3470_v7, %v3466_v19  ;;  %v7463_v5 = vld [vmem:[#allocation31_spill] sm:$0xff] }
 0x5ca   : > { %v6860_v56 = vpop.xlane.xlu1 %2649  ;;  %v7461_v48 = vrot.slane %v6438_v4, %v6387_v0  ;;  %v3348_v34 = vsel %vm3096_vm10, %v3347_v57, %v3343_v42  ;;  %v3268_v53 = vrot.slane %v7462_v32, %v6390_v36  ;;  %v3357_v51 = vrot.slane %v7463_v5, %v6362_v63  ;;  %v7468_v42 = vld [vmem:[#allocation15_spill] sm:$0xff]  ;;  %v7473_v32 = vld [vmem:[#allocation45_spill] sm:$0xff] }
 0x5cb   : > { %v6869_v18 = vpop.xlane.xlu0 %2706  ;;  %v7464_v58 = vrot.slane %v6506_v40, %v6387_v0  ;;  %v3475_v15 = vrot.slane %v2862_v43, %v6357_v37  ;;  %v3362_v4 = vrot.slane %v7465_v17, %v6396_v45  ;;  %v3264_v57 = vsel %vm3089_vm9, %v3263_v54, %v3259_v6  ;;  %v7469_v54 = vld [vmem:[#allocation41_spill] sm:$0xff]  ;;  %v7470_v1 = vld [vmem:[#allocation19_spill] sm:$0xff]  ;;  %v7475_v17 = vld [vmem:[#allocation46_spill] sm:$0xff] }
 0x5cc   : > { %v3090_v24 = vsel %vm3089_vm9, %v7461_v48, %v3083_v22  ;;  %v2878_v22 = vadd.f32 %v6370_v50, %v7466_v62  ;;  %v3353_v30 = vsel %vm3103_vm11, %v3352_v44, %v3348_v34  ;;  %v7467_v40 = vrot.slane %v6442_v3, %v6390_v36  ;;  %v7476_v62 = vld [vmem:[#allocation33_spill] sm:$0xff] }
 0x5cd   : > { %v3185_v33 = vsel %vm3089_vm9, %v7464_v58, %v3180_v21  ;;  %v3476_v7 = vsel %vm3054_vm4, %v3475_v15, %v3471_v59  ;;  %v2876_v46 = vadd.f32 %v6370_v50, %v7468_v42  ;;  %v3358_v9 = vsel %vm3110_vm12, %v3357_v51, %v3353_v30  ;;  %v7474_v58 = vld [vmem:[#allocation11_spill] sm:$0xff] }
 0x5ce   : > { %v6894_v19 = vpop.xlane.xlu1 %2739  ;;  %v3097_v21 = vsel %vm3096_vm10, %v7467_v40, %v3090_v24  ;;  %v3273_v6 = vrot.slane %v7469_v54, %v6393_v13  ;;  %v3278_v44 = vrot.slane %v7470_v1, %v6362_v63  ;;  %v3367_v59 = vrot.slane %v6697_v38, %v6368_v12  ;;  %v7472_v24 = vld [vmem:[#allocation20_spill] sm:$0xff] }
 0x5cf   : > { %v6904_v43 = vpop.xlane.xlu0 %2619  ;;  %v7471_v3 = vrot.slane %v6510_v49, %v6390_v36  ;;  %v3372_v34 = vrot.slane %v7472_v24, %v6399_v11  ;;  %v3377_v5 = vrot.slane %v6705_v31, %v7473_v32  ;;  %v3363_v51 = vsel %vm3117_vm13, %v3362_v4, %v3358_v9  ;;  %v7480_v1 = vld [vmem:[#allocation48_spill] sm:$0xff] }
 0x5d0   : > { %v2877_v15 = vadd.f32 %v6370_v50, %v7474_v58  ;;  %v3382_v30 = vrot.slane %v7476_v62, %v7475_v17  ;;  %v3269_v38 = vsel %vm3096_vm10, %v3268_v53, %v3264_v57  ;;  %v7477_v49 = vrot.slane %v6446_v23, %v6393_v13  ;;  %v7479_v23 = vld [vmem:[#allocation44_spill] sm:$0xff] }
 0x5d1   : > { %v3190_v48 = vsel %vm3096_vm10, %v7471_v3, %v3185_v33  ;;  %v3368_v40 = vsel %vm3124_vm14, %v3367_v59, %v3363_v51  ;;  %v3554_v31 = vrot.slane %v2878_v22, %v6357_v37  ;;  %v7478_v4 = vrot.slane %v6514_v52, %v6393_v13  ;;  %v7481_v22 = vld [vmem:[#allocation32_spill] sm:$0xff]  ;;  %v7482_v52 = vld [vmem:[#allocation54_spill] sm:$0xff] }
 0x5d2   : > { %v3104_v33 = vsel %vm3103_vm11, %v7477_v49, %v3097_v21  ;;  %v6931_v42 = vpop.xlane.xlu1 %2697  ;;  %v3545_v54 = vrot.slane %v2876_v46, %v6349_v25  ;;  %v3549_v53 = vrot.slane %v2877_v15, %v6354_v35  ;;  %v2893_v21 = vadd.f32 %v6370_v50, %v7479_v23 }
 0x5d3   : > { %v3195_v9 = vsel %vm3103_vm11, %v7478_v4, %v3190_v48  ;;  %v6940_v57 = vpop.xlane.xlu0 %2709  ;;  %v2879_v59 = vadd.f32 %v6370_v50, %v7480_v1  ;;  %v3373_v3 = vsel %vm3131_vm15, %v3372_v34, %v3368_v40  ;;  %v2863_v24 = vadd.f32 %v6370_v50, %v7481_v22  ;;  %v7489_v22 = vld [vmem:[#allocation34_spill] sm:$0xff] }
 0x5d4   : > { %v2865_v48 = vadd.f32 %v6370_v50, %v7482_v52  ;;  %v3274_v46 = vsel %vm3103_vm11, %v3273_v6, %v3269_v38  ;;  %v7483_v51 = vrot.slane %v6450_v39, %v6362_v63  ;;  %v3550_v15 = vsel %vm3047_vm3, %v3549_v53, %v3545_v54  ;;  %v7485_v6 = vld [vmem:[#allocation57_spill] sm:$0xff]  ;;  %v7486_v38 = vld [vmem:[#allocation10_spill] sm:$0xff] }
 0x5d5   : > { %v7484_v62 = vrot.slane %v6518_v47, %v6362_v63  ;;  %v3555_v49 = vsel %vm3054_vm4, %v3554_v31, %v3550_v15  ;;  %v3480_v40 = vrot.slane %v2863_v24, %v6365_v29  ;;  %v3378_v4 = vsel %vm3138_vm0, %v3377_v5, %v3373_v3  ;;  %v7487_v54 = vld [vmem:[#allocation21_spill] sm:$0xff] }
 0x5d6   : > { %v3111_v58 = vsel %vm3110_vm12, %v7483_v51, %v3104_v33  ;;  %v6964_v23 = vpop.xlane.xlu1 %2655  ;;  %v3214_v39 = vrot.slane %v7485_v6, %v6399_v11  ;;  %v3283_v33 = vrot.slane %v7486_v38, %v6396_v45  ;;  %v3288_v53 = vrot.slane %v7487_v54, %v6368_v12  ;;  %v7490_v51 = vld [vmem:[#allocation61_spill] sm:$0xff]  ;;  %v7494_v38 = vld [vmem:[#allocation23_spill] sm:$0xff] }
 0x5d7   : > { %v3200_v34 = vsel %vm3110_vm12, %v7484_v62, %v3195_v9  ;;  %v6973_v47 = vsel %vm3145_vm1, %v3382_v30, %v3378_v4  ;;  %v2623_v9 = vpop.xlane.xlu0 %2622  ;;  %v3279_v31 = vsel %vm3110_vm12, %v3278_v44, %v3274_v46  ;;  %v7488_v5 = vrot.slane %v6454_v14, %v6396_v45  ;;  %v7491_v30 = vld [vmem:[#allocation35_spill] sm:$0xff] }
 0x5d8   : > { %v3481_v3 = vsel %vm3061_vm5, %v3480_v40, %v3476_v7  ;;  %v2892_v24 = vadd.f32 %v6370_v50, %v7489_v22  ;;  %v3628_v52 = vrot.slane %v2893_v21, %v6354_v35  ;;  %v2895_v15 = vadd.f32 %v6370_v50, %v7490_v51  ;;  %v7492_v40 = vld [vmem:[#allocation49_spill] sm:$0xff] }
 0x5d9   : > { %v3118_v1 = vsel %vm3117_vm13, %v7488_v5, %v3111_v58  ;;  %v3205_v44 = vsel %vm3117_vm13, %v3204_v10, %v3200_v34  ;;  %v2864_v14 = vadd.f32 %v6370_v50, %v7491_v30  ;;  %v3559_v46 = vrot.slane %v2879_v59, %v6365_v29 }
 0x5da   : > { %v3490_v7 = vrot.slane %v2865_v48, %v6381_v26  ;;  %v3624_v58 = vrot.slane %v2892_v24, %v6349_v25  ;;  %v2894_v35 = vadd.f32 %v6370_v50, %v6801_v41  ;;  %v6997_v21 = vpop.xlane.xlu1 %2745  ;;  %v3284_v62 = vsel %vm3117_vm13, %v3283_v33, %v3279_v31 }
 0x5db   : > { %v7493_v55 = vrot.slane %v7492_v40, %v6368_v12  ;;  %v3485_v34 = vrot.slane %v2864_v14, %v6375_v28  ;;  %v2880_v59 = vadd.f32 %v6370_v50, %v6828_v16  ;;  %v7007_v48 = vpop.xlane.xlu0 %2712  ;;  %v3210_v25 = vsel %vm3124_vm14, %v3209_v2, %v3205_v44  ;;  %v7499_v14 = vld [vmem:[#allocation29_spill] sm:$0xff] }
 0x5dc   : > { %v3629_v41 = vsel %vm3047_vm3, %v3628_v52, %v3624_v58  ;;  %v3633_v4 = vrot.slane %v2894_v35, %v6357_v37  ;;  %v3560_v6 = vsel %vm3061_vm5, %v3559_v46, %v3555_v49  ;;  %v3293_v33 = vrot.slane %v7494_v38, %v6399_v11  ;;  %v7495_v49 = vld [vmem:[#allocation50_spill] sm:$0xff] }
 0x5dd   : > { %v3125_v10 = vsel %vm3124_vm14, %v7493_v55, %v3118_v1  ;;  %v3638_v54 = vrot.slane %v2895_v15, %v6365_v29  ;;  %v3486_v16 = vsel %vm3068_vm6, %v3485_v34, %v3481_v3  ;;  %v3564_v31 = vrot.slane %v2880_v59, %v6375_v28  ;;  %v7498_v15 = vld [vmem:[#allocation59_spill] sm:$0xff]  ;;  %v7501_v34 = vld [vmem:[#allocation52_spill] sm:$0xff] }
 0x5de   : > { %v3289_v5 = vsel %vm3124_vm14, %v3288_v53, %v3284_v62  ;;  %v3634_v8 = vsel %vm3054_vm4, %v3633_v4, %v3629_v41  ;;  %v2866_v2 = vadd.f32 %v6370_v50, %v6860_v56  ;;  %v3491_v37 = vsel %vm3075_vm7, %v3490_v7, %v3486_v16  ;;  %v7026_v1 = vpop.xlane.xlu1 %2658  ;;  %v7497_v56 = vld [vmem:[#allocation51_spill] sm:$0xff]  ;;  %v7500_v7 = vld [vmem:[#allocation26_spill] sm:$0xff]  ;;  %v7503_v4 = vld [vmem:[#allocation12_spill] sm:$0xff] }
 0x5df   : > { %v7496_v22 = vrot.slane %v7495_v49, %v6399_v11  ;;  %v3215_v3 = vsel %vm3131_vm15, %v3214_v39, %v3210_v25  ;;  %v7034_v24 = vsel %vm3068_vm6, %v3564_v31, %v3560_v6  ;;  %v7037_v53 = vsel %vm3061_vm5, %v3638_v54, %v3634_v8  ;;  %v2626_v52 = vpop.xlane.xlu0 %2625  ;;  %v7502_v25 = vld [vmem:[#allocation60_spill] sm:$0xff] }
 0x5e0   : > { %v3137_v51 = vrot.slane %v7497_v56, %v7473_v32  ;;  %v3219_v44 = vrot.slane %v7498_v15, %v7473_v32  ;;  %v3495_v30 = vrot.slane %v2866_v2, %v6384_v61  ;;  %v2827_v46 = vadd.f32 %v6370_v50, %v7499_v14 }
 0x5e1   : > { %v3132_v29 = vsel %vm3131_vm15, %v7496_v22, %v3125_v10  ;;  %v3294_v39 = vsel %vm3131_vm15, %v3293_v33, %v3289_v5  ;;  %v2854_v58 = vadd.f32 %v6370_v50, %v7500_v7  ;;  %v2855_v40 = vadd.f32 %v6370_v50, %v6838_v20 }
 0x5e2   : > { %v3139_v35 = vsel %vm3138_vm0, %v3137_v51, %v3132_v29  ;;  %v3220_v62 = vsel %vm3138_vm0, %v3219_v44, %v3215_v3  ;;  %v7054_v55 = vsel %vm3082_vm8, %v3495_v30, %v3491_v37  ;;  %v7056_v10 = vpop.xlane.xlu1 %2748  ;;  %v3144_v59 = vrot.slane %v7501_v34, %v7475_v17 }
 0x5e3   : > { %v3224_v41 = vrot.slane %v7502_v25, %v7475_v17  ;;  %v3298_v6 = vrot.slane %v7503_v4, %v7473_v32  ;;  %v2856_v38 = vadd.f32 %v6370_v50, %v6904_v43  ;;  %v7066_v33 = vpop.xlane.xlu0 %2715  ;;  %v2857_v20 = vadd.f32 %v6370_v50, %v2623_v9  ;;  %v7504_v25 = vld [vmem:[#allocation17_spill] sm:$0xff] }
 0x5e4   : > { %v3146_v16 = vsel %vm3145_vm1, %v3144_v59, %v3139_v35  ;;  %v3436_v5 = vrot.slane %v2854_v58, %v6362_v63  ;;  %v3303_v8 = vrot.slane %v2827_v46, %v7475_v17  ;;  %v3441_v2 = vrot.slane %v2855_v40, %v6396_v45 }
 0x5e5   : > { %v3299_v54 = vsel %vm3138_vm0, %v3298_v6, %v3294_v39  ;;  %v3225_v31 = vsel %vm3145_vm1, %v3224_v41, %v3220_v62  ;;  %v3446_v43 = vrot.slane %v2856_v38, %v6368_v12  ;;  %v2858_v49 = vadd.f32 %v6370_v50, %v2626_v52 }
 0x5e6   : > { %v2662_v37 = vpop.xlane.xlu1 %2661  ;;  %vm3702_vm3 = vcmask 1042434   ;;  %v3304_v9 = vsel %vm3145_vm1, %v3303_v8, %v3299_v54  ;;  %v3701_v29 = vsel %vm3700_vm2, %v3225_v31, %v3146_v16  ;;  %v3451_v3 = vrot.slane %v2857_v20, %v6399_v11  ;;  %v7506_v54 = vld [vmem:[#allocation22_spill] sm:$0xff]  ;;  %v7507_v8 = vld [vmem:[#allocation24_spill] sm:$0xff] }
 0x5e7   : > { %v2629_v22 = vpop.xlane.xlu0 %2628  ;;  %v3437_v56 = vsel %vm3110_vm12, %v3436_v5, %v6818_v27  ;;  %v3456_v51 = vrot.slane %v2858_v49, %v7473_v32  ;;  %vm3704_vm4 = vcmask 1043459   ;;  %v3703_v14 = vsel %vm3702_vm3, %v3304_v9, %v3701_v29 }
 0x5e8   : > { %v3442_v15 = vsel %vm3117_vm13, %v3441_v2, %v3437_v56  ;;  %v2859_v44 = vadd.f32 %v6370_v50, %v2629_v22  ;;  %vm3706_vm5 = vcmask 1044484   ;;  %v3705_v27 = vsel %vm3704_vm4, %v6973_v47, %v3703_v14  ;;  %v7505_v47 = vld [vmem:[#allocation25_spill] sm:$0xff] }
 0x5e9   : > { %v3447_v52 = vsel %vm3124_vm14, %v3446_v43, %v3442_v15  ;;  %v2881_v41 = vadd.f32 %v6370_v50, %v7504_v25  ;;  %v2882_v4 = vadd.f32 %v6370_v50, %v6931_v42  ;;  %v2868_v6 = vadd.f32 %v6370_v50, %v6964_v23 }
 0x5ea   : > { %v2752_v30 = vpop.xlane.xlu1 %2751  ;;  %v3452_v46 = vsel %vm3131_vm15, %v3451_v3, %v3447_v52  ;;  %v3461_v39 = vrot.slane %v2859_v44, %v7475_v17  ;;  %v2867_v20 = vadd.f32 %v6370_v50, %v7505_v47  ;;  %v7104_v16 = vadd.f32 %v6370_v50, %v7506_v54 }
 0x5eb   : > { %v3457_v7 = vsel %vm3138_vm0, %v3456_v51, %v3452_v46  ;;  %v7098_v38 = vpop.xlane.xlu0 %2718  ;;  %v2869_v31 = vadd.f32 %v6370_v50, %v7026_v1  ;;  %v2883_v2 = vadd.f32 %v6370_v50, %v7507_v8  ;;  %v2884_v42 = vadd.f32 %v6370_v50, %v6808_v60 }
 0x5ec   : > { %v3462_v58 = vsel %vm3145_vm1, %v3461_v39, %v3457_v7  ;;  %v2896_v23 = vadd.f32 %v6370_v50, %v6894_v19  ;;  %v2870_v43 = vadd.f32 %v6370_v50, %v2662_v37  ;;  %v2885_v49 = vadd.f32 %v6370_v50, %v6869_v18 }
 0x5ed   : > { %v7090_v62 = vsel %vm3706_vm5, %v3462_v58, %v3705_v27  ;;  %v3569_v9 = vrot.slane %v2881_v41, %v6381_v26  ;;  %v3574_v1 = vrot.slane %v2882_v4, %v6384_v61  ;;  %v3505_v29 = vrot.slane %v2868_v6, %v6390_v36 }
 0x5ee   : > { %v2665_v35 = vpop.xlane.xlu1 %2664  ;;  %v3500_v60 = vrot.slane %v2867_v20, %v6387_v0  ;;  %v3648_v19 = vrot.slane %v7104_v16, %v6381_v26  ;;  %v3510_v37 = vrot.slane %v2869_v31, %v6393_v13  ;;  %v3579_v51 = vrot.slane %v2883_v2, %v6387_v0 }
 0x5ef   : > { %v2871_v22 = vadd.f32 %v6370_v50, %v2665_v35  ;;  %v3584_v15 = vrot.slane %v2884_v42, %v6390_v36  ;;  %v3643_v44 = vrot.slane %v2896_v23, %v6375_v28  ;;  %v3515_v14 = vrot.slane %v2870_v43, %v6362_v63  ;;  %v2677_v52 = vpop.xlane.xlu0 %2676 }
 0x5f0   : > { %v3589_v46 = vrot.slane %v2885_v49, %v6393_v13  ;;  %v3570_v39 = vsel %vm3075_vm7, %v3569_v9, %v7034_v24  ;;  %v3501_v26 = vsel %vm3089_vm9, %v3500_v60, %v7054_v55  ;;  %v2898_v28 = vadd.f32 %v6370_v50, %v6997_v21 }
 0x5f1   : > { %v3520_v7 = vrot.slane %v2871_v22, %v6396_v45  ;;  %v3575_v27 = vsel %vm3082_vm8, %v3574_v1, %v3570_v39  ;;  %v3506_v58 = vsel %vm3096_vm10, %v3505_v29, %v3501_v26  ;;  %v2875_v24 = vadd.f32 %v6370_v50, %v2677_v52 }
 0x5f2   : > { %v2755_v40 = vpop.xlane.xlu1 %2754  ;;  %v3511_v25 = vsel %vm3103_vm11, %v3510_v37, %v3506_v58  ;;  %v3644_v4 = vsel %vm3068_vm6, %v3643_v44, %v7037_v53  ;;  %v2899_v6 = vadd.f32 %v6370_v50, %v7056_v10  ;;  %v3580_v20 = vsel %vm3089_vm9, %v3579_v51, %v3575_v27 }
 0x5f3   : > { %v3516_v21 = vsel %vm3110_vm12, %v3515_v14, %v3511_v25  ;;  %v2900_v54 = vadd.f32 %v6370_v50, %v2752_v30  ;;  %v3653_v31 = vrot.slane %v2898_v28, %v6384_v61  ;;  %v2901_v53 = vadd.f32 %v6370_v50, %v2755_v40  ;;  %v2767_v43 = vpop.xlane.xlu0 %2766 }
 0x5f4   : > { %v3521_v16 = vsel %vm3117_vm13, %v3520_v7, %v3516_v21  ;;  %v3540_v8 = vrot.slane %v2875_v24, %v7475_v17  ;;  %vm3708_vm6 = vcmask 1045509   ;;  %v3658_v30 = vrot.slane %v2899_v6, %v6387_v0 }
 0x5f5   : > { %v2888_v49 = vadd.f32 %v6370_v50, %v7066_v33  ;;  %v3663_v22 = vrot.slane %v2900_v54, %v6390_v36  ;;  %v3649_v1 = vsel %vm3075_vm7, %v3648_v19, %v3644_v4  ;;  %v2889_v29 = vadd.f32 %v6370_v50, %v7098_v38 }
 0x5f6   : > { %v2668_v34 = vpop.xlane.xlu1 %2667  ;;  %v3668_v0 = vrot.slane %v2901_v53, %v6393_v13  ;;  %v3654_v37 = vsel %vm3082_vm8, %v3653_v31, %v3649_v1  ;;  %v2905_v52 = vadd.f32 %v6370_v50, %v2767_v43  ;;  %vm3710_vm7 = vcmask 1046534  }
 0x5f7   : > { %v2872_v3 = vadd.f32 %v6370_v50, %v2668_v34  ;;  %v2886_v34 = vadd.f32 %v6370_v50, %v6940_v57  ;;  %v2887_v57 = vadd.f32 %v6370_v50, %v7007_v48  ;;  %v3585_v48 = vsel %vm3096_vm10, %v3584_v15, %v3580_v20 }
 0x5f8   : > { %v3590_v60 = vsel %vm3103_vm11, %v3589_v46, %v3585_v48  ;;  %v3609_v44 = vrot.slane %v2889_v29, %v6399_v11  ;;  %v2770_v46 = vpop.xlane.xlu0 %2769  ;;  %v3688_v25 = vrot.slane %v2905_v52, %v6399_v11  ;;  %vm3712_vm8 = vcmask 1047559  }
 0x5f9   : > { %v3525_v35 = vrot.slane %v2872_v3, %v6368_v12  ;;  %v3594_v13 = vrot.slane %v2886_v34, %v6362_v63  ;;  %v2906_v28 = vadd.f32 %v6370_v50, %v2770_v46 }
 0x5fa   : > { %v2758_v59 = vpop.xlane.xlu1 %2757 }
 0x5fb   : > { %v2902_v2 = vadd.f32 %v6370_v50, %v2758_v59 }
 0x5fd   : > { %v3673_v33 = vrot.slane %v2902_v2, %v6362_v63 }
 0x5fe   : > { %v2671_v5 = vpop.xlane.xlu1 %2670 }
 0x5ff   : > { %v2873_v56 = vadd.f32 %v6370_v50, %v2671_v5  ;;  %v3526_v5 = vsel %vm3124_vm14, %v3525_v35, %v3521_v16 }
 0x601   : > { %v3530_v55 = vrot.slane %v2873_v56, %v6399_v11  ;;  %v3599_v56 = vrot.slane %v2887_v57, %v6396_v45 }
 0x602   : > { %v2761_v18 = vpop.xlane.xlu1 %2760 }
 0x603   : > { %v3531_v42 = vsel %vm3131_vm15, %v3530_v55, %v3526_v5  ;;  %v2903_v61 = vadd.f32 %v6370_v50, %v2761_v18  ;;  %v3659_v18 = vsel %vm3089_vm9, %v3658_v30, %v3654_v37 }
 0x604   : > { %v3664_v51 = vsel %vm3096_vm10, %v3663_v22, %v3659_v18 }
 0x605   : > { %v3678_v19 = vrot.slane %v2903_v61, %v6396_v45  ;;  %v3669_v14 = vsel %vm3103_vm11, %v3668_v0, %v3664_v51  ;;  %v3595_v45 = vsel %vm3110_vm12, %v3594_v13, %v3590_v60 }
 0x606   : > { %v2674_v41 = vpop.xlane.xlu1 %2673  ;;  %v3674_v39 = vsel %vm3110_vm12, %v3673_v33, %v3669_v14  ;;  %v3600_v7 = vsel %vm3117_vm13, %v3599_v56, %v3595_v45 }
 0x607   : > { %v2874_v47 = vadd.f32 %v6370_v50, %v2674_v41 }
 0x609   : > { %v3535_v10 = vrot.slane %v2874_v47, %v7473_v32  ;;  %v3693_v47 = vrot.slane %v2906_v28, %v7473_v32 }
 0x60a   : > { %v2764_v23 = vpop.xlane.xlu1 %2763 }
 0x60b   : > { %v3536_v40 = vsel %vm3138_vm0, %v3535_v10, %v3531_v42  ;;  %v2904_v9 = vadd.f32 %v6370_v50, %v2764_v23 }
 0x60c   : > { %v3541_v59 = vsel %vm3145_vm1, %v3540_v8, %v3536_v40 }
 0x60d   : > { %v3709_v3 = vsel %vm3708_vm6, %v3541_v59, %v7090_v62  ;;  %v3604_v62 = vrot.slane %v2888_v49, %v6368_v12  ;;  %v3683_v15 = vrot.slane %v2904_v9, %v6368_v12  ;;  %v3679_v12 = vsel %vm3117_vm13, %v3678_v19, %v3674_v39 }
 0x60e   : > { %v2722_v36 = vpop.xlane.xlu1 %2721 }
 0x60f   : > { %v2890_v38 = vadd.f32 %v6370_v50, %v2722_v36  ;;  %v3605_v58 = vsel %vm3124_vm14, %v3604_v62, %v3600_v7  ;;  %v3684_v35 = vsel %vm3124_vm14, %v3683_v15, %v3679_v12 }
 0x610   : > { %v3610_v34 = vsel %vm3131_vm15, %v3609_v44, %v3605_v58  ;;  %v3689_v4 = vsel %vm3131_vm15, %v3688_v25, %v3684_v35 }
 0x611   : > { %v3614_v63 = vrot.slane %v2890_v38, %v7473_v32  ;;  %v3694_v57 = vsel %vm3138_vm0, %v3693_v47, %v3689_v4 }
 0x612   : > { %v2725_v26 = vpop.xlane.xlu1 %2724 }
 0x613   : > { %v2891_v27 = vadd.f32 %v6370_v50, %v2725_v26  ;;  %v3615_v55 = vsel %vm3138_vm0, %v3614_v63, %v3610_v34 }
 0x615   : > { %v3619_v24 = vrot.slane %v2891_v27, %v7475_v17 }
 0x616   : > { %v2773_v41 = vpop.xlane.xlu1 %2772 }
 0x617   : > { %v3620_v6 = vsel %vm3145_vm1, %v3619_v24, %v3615_v55  ;;  %v2907_v21 = vadd.f32 %v6370_v50, %v2773_v41 }
 0x618   : > { %v3711_v20 = vsel %vm3710_vm7, %v3620_v6, %v3709_v3 }
 0x619   : > { %v3698_v11 = vrot.slane %v2907_v21, %v7475_v17 }
 0x61b   : > { %v3699_v54 = vsel %vm3145_vm1, %v3698_v11, %v3694_v57 }
 0x61c   : > { %v3713_v50 = vsel %vm3712_vm8, %v3699_v54, %v3711_v20 }
 0x61d   : > { %3715 = vst [vmem:[%s5193_s8] sm:$0xff] %v3713_v50 }
 0x61e   : > { %4570 = shalt.err (!%p4567_p12)
}
 0x61f   : > { %s4571_s8 = scalar_lea.hbm %s7219_s17, 128  ;;  %s4575_s30 = scalar_lea.hbm %s7279_s5, 512 }
 0x620   : > { %p4572_p13 = scmp.ne.s32.totalorder %s7219_s17, %s4571_s8  ;;  %p4576_p2 = scmp.lt.u32.totalorder %s7219_s17, %s7279_s5 }
 0x621   : > { %p4577_p3 = scmp.lt.u32.totalorder %s4575_s30, %s4571_s8  ;;  %p4579_p5 = scmp.lt.u32.totalorder %s4571_s8, %s7219_s17 }
 0x622   : > { %p4573_p0 = pnand %p4572_p13, %p4890_p8 }
 0x623   : > { %p4578_p4 = por %p4577_p3, %p4576_p2 }
 0x624   : > { %p4574_p1 = pneg %p4573_p0 }
 0x625   : > { %p4580_p6 = por %p4579_p5, %p4578_p4 }
 0x627   : > { %p4581_p7 = pnand %p4580_p6, %p4574_p1 }
 0x629   : > { %4584 = shalt.err (!%p4581_p7)
}
 0x62a   : > { %4217 = dma.vmem_to_hbm [thread:$0]  (%p4890_p8), %s7221_s13, 128, %s7219_s17, %s3717_s18  }
 0x62b PF: > { %p4223_p10 = scmp.ge.s32.totalorder %s4719_s28, 2  ;;  %s3753_s25 = sand.u32 1, %s4691_s21  }
 0x62c   : > { %s3754_s14 = scalar_lea.sflag [#allocation5], %s3753_s25 }
 0x62d   : > { %p4220_p11 = pnand %p4223_p10, %p4894_p9 }
 0x62f   : > { %4686 = dma.done.wait (!%p4220_p11), %s3754_s14, 128  }
 0x630   : > { %4688 = vsyncadd (!%p4220_p11), %s3754_s14, 4294967168  ;;  %s20_s28 = sadd.s32 1, %s4719_s28   ;;  %s7508_s11 = sld [smem:[#allocation7_spill]] }
 0x631   : > { %p17_p12 = scmp.ge.s32.totalorder %s20_s28, 6   ;;  %s7509_s21 = smov %s4695_s22 }
 0x632   : > { %s7510_s22 = smov %s4699_s23  ;;  %s7511_s23 = smov %s4902_s16 }
 0x633   : > { %s7512_s24 = smov %s4711_s26  ;;  %s7513_s25 = smov %s4715_s27 }
 0x634   : > { %s7514_s26 = smov %s7517_s7  ;;  %19 = sbr.rel (!%p17_p12) target bundleno = 7 (0x7), region = 157 }
 0x636   : > { %s7515_s27 = smov %s7508_s11 }
 0x63b   :  { %3767 = vsyncpa [#allocation5], 1 }
 0x63c   :  { %3769 = vsyncpa [#allocation5 + $0x1], 1 }

</bundles_post_ra>
